<compile_context>
chip_gen: v5e
topology: v5e:2x2
jax: 0.10.0
libtpu: 0.0.40
codegen_flags: <defaults>
</compile_context>

<pallas_src>
import numpy as np
import jax
import jax.numpy as jnp
from jax import lax
from jax.experimental import pallas as pl
from jax.experimental.pallas import tpu as pltpu

_HP = lax.Precision.HIGHEST   # only for tiny XLA-side glue and the reference


# ----------------------- constant (glue) tables -----------------------

def _up_mat(n_in, n_out):
    """Bilinear x2 (align_corners=True) interpolation matrix (n_out, n_in)."""
    m = np.zeros((n_out, n_in), np.float32)
    if n_in == 1:
        m[:, 0] = 1.0
        return m
    scale = (n_in - 1) / (n_out - 1)
    for i in range(n_out):
        s = i * scale
        i0 = min(int(np.floor(s)), n_in - 1)
        f = s - i0
        i1 = min(i0 + 1, n_in - 1)
        m[i, i0] += 1.0 - f
        m[i, i1] += f
    return m


def build_glue_constants(H, W, B):
    """Upsample factors + per-batch interior masks for the flattened padded spatial layout."""
    Ho, Wo = 2 * H, 2 * W
    Wp = Wo + 2                                   # padded row width (1-pixel zero ring)
    Npad = (Ho + 2) * Wp                          # flattened padded spatial size per batch
    NpadP = ((Npad + 127) // 128) * 128           # per-batch lane segment, 128-aligned
    Ntot = B * NpadP                              # total lane extent (multiple of 128)
    # shift-containment: interior reads never leave their batch segment
    assert Wo + 1 < Wp and (Ho + 1) * Wp + Wo + 1 < NpadP
    Uh = _up_mat(H, Ho)
    Uw = _up_mat(W, Wo)
    bmask = np.zeros((B, Ntot), np.float32)       # row b: 1.0 at batch-b interior pixels
    for b in range(B):
        for i in range(Ho):
            for j in range(Wo):
                bmask[b, b * NpadP + (i + 1) * Wp + (j + 1)] = 1.0
    return Uh, Uw, bmask, Wp, Npad, NpadP, Ntot


# ----------------------- the fused Pallas kernel -----------------------

def make_up_kernel(B, Ho, Wo, Wp, NpadP, Ntot, CP, Cin, Cmid, Cout):
    n_pix = float(Ho * Wo)
    # flat spatial shift per conv tap (dy, dx), tap index t = dy*3 + dx
    TAPS = [(dy - 1) * Wp + (dx - 1) for dy in range(3) for dx in range(3)]

    def gelu(x):
        # tanh-approx GELU (tanh -> EUP slot); ~3e-4 abs delta vs erf, within test tolerance
        return 0.5 * x * (1.0 + jnp.tanh(0.7978845608028654 * (x + 0.044715 * x * x * x)))

    def conv3x3(x, w_ref, col_ref):
        # x: (CP, Ntot), exactly zero outside the interior pixels (clean zero pad ring).
        # im2col on the SUBLANE axis: block t of col holds x spatially shifted by TAPS[t].
        # pltpu.roll uses the np.roll convention (out[p] = x[p + s] with shift = -s); interior
        # outputs never read across a batch segment, and wrapped/ring garbage only lands on
        # non-interior outputs which the next GroupNorm re-masks to zero.
        for t, s in enumerate(TAPS):
            shifted = x if s == 0 else pltpu.roll(x, shift=(-s) % Ntot, axis=1)
            col_ref[t * CP:(t + 1) * CP, :] = shifted          # sublane-aligned, lane-full store
        # one K-packed MXU matmul per conv (DEFAULT-precision f32 inputs, f32 accumulation)
        return jnp.dot(w_ref[...], col_ref[...], preferred_element_type=jnp.float32)

    def groupnorm(x, g_ref, b_ref, c_real, bms, mask):
        # GroupNorm(num_groups=1, eps=1e-5) per batch segment.  Stats use the interior pixels of
        # the c_real real channels (phantom zero-padded channels contribute exactly 0 to the sums
        # and are excluded via n).  Fused moments with a var>=0 guard.
        n = n_pix * c_real
        a_pos = jnp.zeros((1, Ntot), jnp.float32)
        c_pos = jnp.zeros((1, Ntot), jnp.float32)
        for bm in bms:                                          # static unroll over B
            xm = x * bm
            mu = jnp.sum(xm, keepdims=True) / n                 # (1, 1)
            var = jnp.maximum(jnp.sum(xm * xm, keepdims=True) / n - mu * mu, 0.0)
            inv = lax.rsqrt(var + 1e-5)
            a_pos = a_pos + inv * bm
            c_pos = c_pos - (mu * inv) * bm
        # re-mask the output: pad ring / alignment tail / phantom channels come out exactly zero,
        # so every conv input is clean zero padding (invariant flagged in the review).
        return ((x * a_pos + c_pos) * g_ref[...] + b_ref[...]) * mask

    def kernel(cat_ref, bmask_ref, emb_ref,
               w1a_ref, g1a_ref, b1a_ref, w1b_ref, g1b_ref, b1b_ref,
               w2a_ref, g2a_ref, b2a_ref, w2b_ref, g2b_ref, b2b_ref,
               out_ref, col_ref):
        # hoisted per-batch interior masks (reused by all 4 GroupNorms)
        bms = [bmask_ref[b:b + 1, :] for b in range(B)]         # B x (1, Ntot)
        mask = bms[0]
        for r in bms[1:]:
            mask = mask + r                                     # (1, Ntot) all-interior indicator

        cat = cat_ref[...]                                      # (CP, Ntot), zero ring from wrapper

        # DoubleConv(in_ch, in_ch, residual=True)
        h = conv3x3(cat, w1a_ref, col_ref)
        h = gelu(groupnorm(h, g1a_ref, b1a_ref, Cin, bms, mask))
        h = conv3x3(h, w1b_ref, col_ref)
        h = groupnorm(h, g1b_ref, b1b_ref, Cin, bms, mask)
        y1 = gelu(cat + h)                                      # ring stays exactly zero

        # DoubleConv(in_ch, out_ch, mid_ch=in_ch//2)
        # TODO(synk): the source DoubleConv.forward drops its return value in the non-residual
        # branch (returns None, which would crash Up.forward); we implement the clearly intended
        # `return self.double_conv(x)` semantics.
        h = conv3x3(y1, w2a_ref, col_ref)
        h = gelu(groupnorm(h, g2a_ref, b2a_ref, Cmid, bms, mask))
        h = conv3x3(h, w2b_ref, col_ref)
        y2 = groupnorm(h, g2b_ref, b2b_ref, Cout, bms, mask)

        # + time embedding (precomputed & broadcast in the wrapper); lane-dense (CP, Ntot) store
        out_ref[...] = y2 + emb_ref[...]

    return kernel


# ----------------------- wrapper (glue) -----------------------

def up_pallas(x_nchw, skip_nchw, t, params):
    B, Cx, H, W = x_nchw.shape
    _, Cs, Ho, Wo = skip_nchw.shape
    assert Ho == 2 * H and Wo == 2 * W
    Cin = Cx + Cs
    Cmid = params['w2a'].shape[2]
    Cout = params['w2b'].shape[2]
    CP = ((max(Cin, Cmid, Cout) + 7) // 8) * 8        # internal channel width (sublane multiple)
    assert params['w1a'].shape[1] == Cin

    Uh, Uw, bmask_np, Wp, Npad, NpadP, Ntot = build_glue_constants(H, W, B)

    # --- cheap XLA-side glue: separable bilinear x2 upsample, channel concat, zero pad ring,
    # per-batch lane-aligned flatten, and the (B,E)@(E,Cout) time-embedding linear.
    Uh_j, Uw_j = jnp.asarray(Uh), jnp.asarray(Uw)
    xu = jnp.einsum('ih,bchw->bciw', Uh_j, x_nchw, precision=_HP)
    xu = jnp.einsum('jw,bciw->bcij', Uw_j, xu, precision=_HP)
    cat = jnp.concatenate([skip_nchw, xu], axis=1)                           # (B, Cin, Ho, Wo)
    cat = jnp.pad(cat, ((0, 0), (0, CP - Cin), (1, 1), (1, Wp - Wo - 1)))    # ring + phantom chans
    cat = cat.reshape(B, CP, Npad)
    cat = jnp.pad(cat, ((0, 0), (0, 0), (0, NpadP - Npad)))                  # 128-aligned segments
    cat = jnp.transpose(cat, (1, 0, 2)).reshape(CP, Ntot)                    # channels-on-sublanes

    emb = jnp.dot(jax.nn.silu(t), params['wemb'], precision=_HP) + params['bemb']   # (B, Cout)
    emb = jnp.pad(emb, ((0, 0), (0, CP - Cout)))                                     # (B, CP)
    emb_bcast = jnp.repeat(emb.T, NpadP, axis=1)                                     # (CP, Ntot)

    def pack_w(w9, cin, cout):
        # (9, cin, cout) -> (CP, 9*CP) K-packed, tap-major, zero-padded phantom channels
        wp = jnp.zeros((9, CP, CP), jnp.float32).at[:, :cin, :cout].set(w9)
        return jnp.transpose(wp, (2, 0, 1)).reshape(CP, 9 * CP)

    def pack_affine(v, c):
        # (1, c) -> (CP, 1); phantom rows get gamma=beta=0 so padded channels stay exactly zero
        return jnp.zeros((CP, 1), jnp.float32).at[:c, 0].set(v[0])

    w1a = pack_w(params['w1a'], Cin, Cin);  g1a = pack_affine(params['g1a'], Cin);  b1a = pack_affine(params['b1a'], Cin)
    w1b = pack_w(params['w1b'], Cin, Cin);  g1b = pack_affine(params['g1b'], Cin);  b1b = pack_affine(params['b1b'], Cin)
    w2a = pack_w(params['w2a'], Cin, Cmid); g2a = pack_affine(params['g2a'], Cmid); b2a = pack_affine(params['b2a'], Cmid)
    w2b = pack_w(params['w2b'], Cmid, Cout); g2b = pack_affine(params['g2b'], Cout); b2b = pack_affine(params['b2b'], Cout)

    kernel = make_up_kernel(B, Ho, Wo, Wp, NpadP, Ntot, CP, Cin, Cmid, Cout)

    inputs = (cat, jnp.asarray(bmask_np), emb_bcast,
              w1a, g1a, b1a, w1b, g1b, b1b,
              w2a, g2a, b2a, w2b, g2b, b2b)
    c00 = lambda i: (0, 0)
    in_specs = [pl.BlockSpec(a.shape, c00) for a in inputs]                  # all 2-D, full blocks
    out_spec = pl.BlockSpec((CP, Ntot), c00)

    out_flat = pl.pallas_call(
        kernel,
        out_shape=jax.ShapeDtypeStruct((CP, Ntot), jnp.float32),
        grid_spec=pltpu.PrefetchScalarGridSpec(
            num_scalar_prefetch=0,
            grid=(1,),                                                       # batches folded on lanes
            in_specs=in_specs,
            out_specs=out_spec,
            scratch_shapes=[pltpu.VMEM((9 * CP, Ntot), jnp.float32)]),       # im2col scratch
        compiler_params=pltpu.CompilerParams(dimension_semantics=("arbitrary",)),
    )(*inputs)

    # drop the alignment tail, pad ring and phantom channels; back to NCHW
    out = out_flat.reshape(CP, B, NpadP)[:Cout, :, :Npad]
    out = out.reshape(Cout, B, Ho + 2, Wp)[:, :, 1:Ho + 1, 1:Wo + 1]
    return jnp.transpose(out, (1, 0, 2, 3))


# ----------------------- parameters (deterministic, synthetic) -----------------------

def init_params(key, in_ch, out_ch, emb_dim):
    mid = in_ch // 2
    ks = jax.random.split(key, 10)

    def conv_w(k, cin, cout):        # (9, cin, cout), tap index = dy*3+dx
        return jax.random.normal(k, (9, cin, cout), jnp.float32) * float(1.0 / np.sqrt(9.0 * cin))

    def affine(k, c):
        k1, k2 = jax.random.split(k)
        return (1.0 + 0.1 * jax.random.normal(k1, (1, c), jnp.float32),
                0.1 * jax.random.normal(k2, (1, c), jnp.float32))

    g1a, b1a = affine(ks[1], in_ch)
    g1b, b1b = affine(ks[3], in_ch)
    g2a, b2a = affine(ks[5], mid)
    g2b, b2b = affine(ks[7], out_ch)
    return dict(
        w1a=conv_w(ks[0], in_ch, in_ch), g1a=g1a, b1a=b1a,
        w1b=conv_w(ks[2], in_ch, in_ch), g1b=g1b, b1b=b1b,
        w2a=conv_w(ks[4], in_ch, mid),   g2a=g2a, b2a=b2a,
        w2b=conv_w(ks[6], mid, out_ch),  g2b=g2b, b2b=b2b,
        wemb=jax.random.normal(ks[8], (emb_dim, out_ch), jnp.float32) * float(1.0 / np.sqrt(emb_dim)),
        bemb=0.1 * jax.random.normal(ks[9], (1, out_ch), jnp.float32),
    )


# ----------------------- pure-JAX reference (for verification only) -----------------------

def up_reference(x_nchw, skip_nchw, t, params, Uh, Uw):
    x = jnp.transpose(x_nchw, (0, 2, 3, 1))
    skip = jnp.transpose(skip_nchw, (0, 2, 3, 1))
    xu = jnp.einsum('ih,bhwc,jw->bijc', jnp.asarray(Uh), x, jnp.asarray(Uw), precision=_HP)
    h0 = jnp.concatenate([skip, xu], axis=-1)

    def conv(v, w9):
        k = w9.reshape(3, 3, w9.shape[1], w9.shape[2])
        return lax.conv_general_dilated(v, k, (1, 1), 'SAME',
                                        dimension_numbers=('NHWC', 'HWIO', 'NHWC'),
                                        precision=_HP)

    def gn(v, g, b):
        mu = jnp.mean(v, axis=(1, 2, 3), keepdims=True)
        var = jnp.mean((v - mu) ** 2, axis=(1, 2, 3), keepdims=True)
        return (v - mu) * lax.rsqrt(var + 1e-5) * g.reshape(1, 1, 1, -1) + b.reshape(1, 1, 1, -1)

    gelu = lambda v: jax.nn.gelu(v, approximate=False)

    h = conv(h0, params['w1a']); h = gelu(gn(h, params['g1a'], params['b1a']))
    h = conv(h, params['w1b']); h = gn(h, params['g1b'], params['b1b'])
    y1 = gelu(h0 + h)
    h = conv(y1, params['w2a']); h = gelu(gn(h, params['g2a'], params['b2a']))
    h = conv(h, params['w2b']); y2 = gn(h, params['g2b'], params['b2b'])

    emb = jnp.dot(jax.nn.silu(t), params['wemb'], precision=_HP) + params['bemb']
    out = y2 + emb[:, None, None, :]
    return jnp.transpose(out, (0, 3, 1, 2))


# ----------------------- main -----------------------

if __name__ == "__main__":
    B, in_ch, out_ch, emb_dim = 2, 8, 8, 32
    H = W = 8                       # x spatial; skip / output spatial = 16x16
    cx = in_ch // 2
    cs = in_ch - cx

    key = jax.random.PRNGKey(0)
    kx, ksk, kt, kp = jax.random.split(key, 4)
    x = jax.random.normal(kx, (B, cx, H, W), jnp.float32)
    skip_x = jax.random.normal(ksk, (B, cs, 2 * H, 2 * W), jnp.float32)
    t = jax.random.normal(kt, (B, emb_dim), jnp.float32)
    params = init_params(kp, in_ch, out_ch, emb_dim)

    out = jax.block_until_ready(up_pallas(x, skip_x, t, params))
    assert out.shape == (B, out_ch, 2 * H, 2 * W), out.shape

    Uh, Uw, _, _, _, _, _ = build_glue_constants(H, W, B)
    ref = jax.block_until_ready(up_reference(x, skip_x, t, params, Uh, Uw))
    # accuracy contract: in-kernel conv matmuls use single-pass DEFAULT-precision MXU inputs
    # (f32 accumulation) and GELU is the tanh approximation -> ~3e-2 agreement vs erf/HIGHEST ref.
    np.testing.assert_allclose(np.asarray(out), np.asarray(ref), rtol=3e-2, atol=3e-2)
    print("KERNEL_OK")
</pallas_src>

<mosaic_0001>
module attributes {stable_mosaic.version = 11 : i64} {
  func.func @kernel(%arg0: i32, %arg1: memref<8x768xf32, #tpu.memory_space<vmem>>, %arg2: memref<2x768xf32, #tpu.memory_space<vmem>>, %arg3: memref<8x768xf32, #tpu.memory_space<vmem>>, %arg4: memref<8x72xf32, #tpu.memory_space<vmem>>, %arg5: memref<8x1xf32, #tpu.memory_space<vmem>>, %arg6: memref<8x1xf32, #tpu.memory_space<vmem>>, %arg7: memref<8x72xf32, #tpu.memory_space<vmem>>, %arg8: memref<8x1xf32, #tpu.memory_space<vmem>>, %arg9: memref<8x1xf32, #tpu.memory_space<vmem>>, %arg10: memref<8x72xf32, #tpu.memory_space<vmem>>, %arg11: memref<8x1xf32, #tpu.memory_space<vmem>>, %arg12: memref<8x1xf32, #tpu.memory_space<vmem>>, %arg13: memref<8x72xf32, #tpu.memory_space<vmem>>, %arg14: memref<8x1xf32, #tpu.memory_space<vmem>>, %arg15: memref<8x1xf32, #tpu.memory_space<vmem>>, %arg16: memref<8x768xf32, #tpu.memory_space<vmem>>, %arg17: memref<72x768xf32, #tpu.memory_space<vmem>>) attributes {dimension_semantics = [#tpu.dimension_semantics<arbitrary>], iteration_bounds = array<i64: 1>, scalar_prefetch = 0 : i64, scratch_operands = 1 : i64, tpu.core_type = #tpu.core_type<tc>, window_params = [{pipeline_mode = #tpu.pipeline_mode<synchronous>, transform_indices = @transform_0, window_bounds = array<i64: 8, 768>}, {pipeline_mode = #tpu.pipeline_mode<synchronous>, transform_indices = @transform_1, window_bounds = array<i64: 2, 768>}, {pipeline_mode = #tpu.pipeline_mode<synchronous>, transform_indices = @transform_2, window_bounds = array<i64: 8, 768>}, {pipeline_mode = #tpu.pipeline_mode<synchronous>, transform_indices = @transform_3, window_bounds = array<i64: 8, 72>}, {pipeline_mode = #tpu.pipeline_mode<synchronous>, transform_indices = @transform_4, window_bounds = array<i64: 8, 1>}, {pipeline_mode = #tpu.pipeline_mode<synchronous>, transform_indices = @transform_5, window_bounds = array<i64: 8, 1>}, {pipeline_mode = #tpu.pipeline_mode<synchronous>, transform_indices = @transform_6, window_bounds = array<i64: 8, 72>}, {pipeline_mode = #tpu.pipeline_mode<synchronous>, transform_indices = @transform_7, window_bounds = array<i64: 8, 1>}, {pipeline_mode = #tpu.pipeline_mode<synchronous>, transform_indices = @transform_8, window_bounds = array<i64: 8, 1>}, {pipeline_mode = #tpu.pipeline_mode<synchronous>, transform_indices = @transform_9, window_bounds = array<i64: 8, 72>}, {pipeline_mode = #tpu.pipeline_mode<synchronous>, transform_indices = @transform_10, window_bounds = array<i64: 8, 1>}, {pipeline_mode = #tpu.pipeline_mode<synchronous>, transform_indices = @transform_11, window_bounds = array<i64: 8, 1>}, {pipeline_mode = #tpu.pipeline_mode<synchronous>, transform_indices = @transform_12, window_bounds = array<i64: 8, 72>}, {pipeline_mode = #tpu.pipeline_mode<synchronous>, transform_indices = @transform_13, window_bounds = array<i64: 8, 1>}, {pipeline_mode = #tpu.pipeline_mode<synchronous>, transform_indices = @transform_14, window_bounds = array<i64: 8, 1>}, {pipeline_mode = #tpu.pipeline_mode<synchronous>, transform_indices = @transform_15, window_bounds = array<i64: 8, 768>}]} {
    %c0 = arith.constant 0 : index
    %c0_0 = arith.constant 0 : index
    %0 = vector.load %arg2[%c0, %c0_0] : memref<2x768xf32, #tpu.memory_space<vmem>>, vector<1x768xf32>
    %c1 = arith.constant 1 : index
    %c0_1 = arith.constant 0 : index
    %1 = vector.load %arg2[%c1, %c0_1] : memref<2x768xf32, #tpu.memory_space<vmem>>, vector<1x768xf32>
    %2 = arith.addf %0, %1 : vector<1x768xf32>
    %c0_2 = arith.constant 0 : index
    %c0_3 = arith.constant 0 : index
    %3 = vector.load %arg1[%c0_2, %c0_3] : memref<8x768xf32, #tpu.memory_space<vmem>>, vector<8x768xf32>
    %c19_i32 = arith.constant 19 : i32
    %4 = tpu.dynamic_rotate %3 by %c19_i32 dim 1 : vector<8x768xf32>, i32 -> vector<8x768xf32>
    %c0_4 = arith.constant 0 : index
    %c0_5 = arith.constant 0 : index
    %5 = vector.load %arg17[%c0_4, %c0_5] : memref<72x768xf32, #tpu.memory_space<vmem>>, vector<8x768xf32>
    tpu.vector_store %arg17[%c0_4, %c0_5], %4 {strides = array<i32>} : memref<72x768xf32, #tpu.memory_space<vmem>>, vector<8x768xf32>,
    %c18_i32 = arith.constant 18 : i32
    %6 = tpu.dynamic_rotate %3 by %c18_i32 dim 1 : vector<8x768xf32>, i32 -> vector<8x768xf32>
    %c8 = arith.constant 8 : index
    %c0_6 = arith.constant 0 : index
    %7 = vector.load %arg17[%c8, %c0_6] : memref<72x768xf32, #tpu.memory_space<vmem>>, vector<8x768xf32>
    tpu.vector_store %arg17[%c8, %c0_6], %6 {strides = array<i32>} : memref<72x768xf32, #tpu.memory_space<vmem>>, vector<8x768xf32>,
    %c17_i32 = arith.constant 17 : i32
    %8 = tpu.dynamic_rotate %3 by %c17_i32 dim 1 : vector<8x768xf32>, i32 -> vector<8x768xf32>
    %c16 = arith.constant 16 : index
    %c0_7 = arith.constant 0 : index
    %9 = vector.load %arg17[%c16, %c0_7] : memref<72x768xf32, #tpu.memory_space<vmem>>, vector<8x768xf32>
    tpu.vector_store %arg17[%c16, %c0_7], %8 {strides = array<i32>} : memref<72x768xf32, #tpu.memory_space<vmem>>, vector<8x768xf32>,
    %c1_i32 = arith.constant 1 : i32
    %10 = tpu.dynamic_rotate %3 by %c1_i32 dim 1 : vector<8x768xf32>, i32 -> vector<8x768xf32>
    %c24 = arith.constant 24 : index
    %c0_8 = arith.constant 0 : index
    %11 = vector.load %arg17[%c24, %c0_8] : memref<72x768xf32, #tpu.memory_space<vmem>>, vector<8x768xf32>
    tpu.vector_store %arg17[%c24, %c0_8], %10 {strides = array<i32>} : memref<72x768xf32, #tpu.memory_space<vmem>>, vector<8x768xf32>,
    %c32 = arith.constant 32 : index
    %c0_9 = arith.constant 0 : index
    %12 = vector.load %arg17[%c32, %c0_9] : memref<72x768xf32, #tpu.memory_space<vmem>>, vector<8x768xf32>
    tpu.vector_store %arg17[%c32, %c0_9], %3 {strides = array<i32>} : memref<72x768xf32, #tpu.memory_space<vmem>>, vector<8x768xf32>,
    %c767_i32 = arith.constant 767 : i32
    %13 = tpu.dynamic_rotate %3 by %c767_i32 dim 1 : vector<8x768xf32>, i32 -> vector<8x768xf32>
    %c40 = arith.constant 40 : index
    %c0_10 = arith.constant 0 : index
    %14 = vector.load %arg17[%c40, %c0_10] : memref<72x768xf32, #tpu.memory_space<vmem>>, vector<8x768xf32>
    tpu.vector_store %arg17[%c40, %c0_10], %13 {strides = array<i32>} : memref<72x768xf32, #tpu.memory_space<vmem>>, vector<8x768xf32>,
    %c751_i32 = arith.constant 751 : i32
    %15 = tpu.dynamic_rotate %3 by %c751_i32 dim 1 : vector<8x768xf32>, i32 -> vector<8x768xf32>
    %c48 = arith.constant 48 : index
    %c0_11 = arith.constant 0 : index
    %16 = vector.load %arg17[%c48, %c0_11] : memref<72x768xf32, #tpu.memory_space<vmem>>, vector<8x768xf32>
    tpu.vector_store %arg17[%c48, %c0_11], %15 {strides = array<i32>} : memref<72x768xf32, #tpu.memory_space<vmem>>, vector<8x768xf32>,
    %c750_i32 = arith.constant 750 : i32
    %17 = tpu.dynamic_rotate %3 by %c750_i32 dim 1 : vector<8x768xf32>, i32 -> vector<8x768xf32>
    %c56 = arith.constant 56 : index
    %c0_12 = arith.constant 0 : index
    %18 = vector.load %arg17[%c56, %c0_12] : memref<72x768xf32, #tpu.memory_space<vmem>>, vector<8x768xf32>
    tpu.vector_store %arg17[%c56, %c0_12], %17 {strides = array<i32>} : memref<72x768xf32, #tpu.memory_space<vmem>>, vector<8x768xf32>,
    %c749_i32 = arith.constant 749 : i32
    %19 = tpu.dynamic_rotate %3 by %c749_i32 dim 1 : vector<8x768xf32>, i32 -> vector<8x768xf32>
    %c64 = arith.constant 64 : index
    %c0_13 = arith.constant 0 : index
    %20 = vector.load %arg17[%c64, %c0_13] : memref<72x768xf32, #tpu.memory_space<vmem>>, vector<8x768xf32>
    tpu.vector_store %arg17[%c64, %c0_13], %19 {strides = array<i32>} : memref<72x768xf32, #tpu.memory_space<vmem>>, vector<8x768xf32>,
    %c0_14 = arith.constant 0 : index
    %c0_15 = arith.constant 0 : index
    %21 = vector.load %arg4[%c0_14, %c0_15] : memref<8x72xf32, #tpu.memory_space<vmem>>, vector<8x72xf32>
    %c0_16 = arith.constant 0 : index
    %c0_17 = arith.constant 0 : index
    %22 = vector.load %arg17[%c0_16, %c0_17] : memref<72x768xf32, #tpu.memory_space<vmem>>, vector<72x768xf32>
    %cst = arith.constant dense<0.000000e+00> : vector<8x768xf32>
    %23 = tpu.matmul %21, %22, %cst {dimension_numbers = #tpu.dot_dimension_numbers<[1], [0], [0], [1], [0, 0, 1, 1], [], []>} : vector<8x72xf32>, vector<72x768xf32>, vector<8x768xf32> -> vector<8x768xf32>
    %cst_18 = arith.constant 0.000000e+00 : f32
    %24 = vector.broadcast %cst_18 : f32 to vector<1x768xf32>
    %cst_19 = arith.constant 0.000000e+00 : f32
    %25 = vector.broadcast %cst_19 : f32 to vector<1x768xf32>
    %26 = vector.broadcast %0 : vector<1x768xf32> to vector<8x768xf32>
    %27 = arith.mulf %23, %26 : vector<8x768xf32>
    %28 = vector.shape_cast %27 : vector<8x768xf32> to vector<1x8x768xf32>
    %cst_20 = arith.constant dense<0.000000e+00> : vector<1xf32>
    %29 = vector.multi_reduction <add>, %28, %cst_20 [1, 2] : vector<1x8x768xf32> to vector<1xf32>
    %30 = vector.shape_cast %29 : vector<1xf32> to vector<1x1x1xf32>
    %31 = vector.extract %30[0, 0, 0] : f32 from vector<1x1x1xf32>
    %32 = vector.broadcast %31 : f32 to vector<1x1xf32>
    %cst_21 = arith.constant 2.048000e+03 : f32
    %33 = vector.broadcast %cst_21 : f32 to vector<1x1xf32>
    %34 = arith.divf %32, %33 : vector<1x1xf32>
    %35 = arith.mulf %27, %27 : vector<8x768xf32>
    %36 = vector.shape_cast %35 : vector<8x768xf32> to vector<1x8x768xf32>
    %cst_22 = arith.constant dense<0.000000e+00> : vector<1xf32>
    %37 = vector.multi_reduction <add>, %36, %cst_22 [1, 2] : vector<1x8x768xf32> to vector<1xf32>
    %38 = vector.shape_cast %37 : vector<1xf32> to vector<1x1x1xf32>
    %39 = vector.extract %38[0, 0, 0] : f32 from vector<1x1x1xf32>
    %40 = vector.broadcast %39 : f32 to vector<1x1xf32>
    %cst_23 = arith.constant 2.048000e+03 : f32
    %41 = vector.broadcast %cst_23 : f32 to vector<1x1xf32>
    %42 = arith.divf %40, %41 : vector<1x1xf32>
    %43 = arith.mulf %34, %34 : vector<1x1xf32>
    %44 = arith.subf %42, %43 : vector<1x1xf32>
    %cst_24 = arith.constant 0.000000e+00 : f32
    %45 = vector.broadcast %cst_24 : f32 to vector<1x1xf32>
    %46 = arith.maximumf %44, %45 : vector<1x1xf32>
    %cst_25 = arith.constant 9.99999974E-6 : f32
    %47 = vector.broadcast %cst_25 : f32 to vector<1x1xf32>
    %48 = arith.addf %46, %47 : vector<1x1xf32>
    %49 = math.rsqrt %48 : vector<1x1xf32>
    %50 = vector.broadcast %49 : vector<1x1xf32> to vector<1x768xf32>
    %51 = arith.mulf %50, %0 : vector<1x768xf32>
    %52 = arith.addf %24, %51 : vector<1x768xf32>
    %53 = arith.mulf %34, %49 : vector<1x1xf32>
    %54 = vector.broadcast %53 : vector<1x1xf32> to vector<1x768xf32>
    %55 = arith.mulf %54, %0 : vector<1x768xf32>
    %56 = arith.subf %25, %55 : vector<1x768xf32>
    %57 = vector.broadcast %1 : vector<1x768xf32> to vector<8x768xf32>
    %58 = arith.mulf %23, %57 : vector<8x768xf32>
    %59 = vector.shape_cast %58 : vector<8x768xf32> to vector<1x8x768xf32>
    %cst_26 = arith.constant dense<0.000000e+00> : vector<1xf32>
    %60 = vector.multi_reduction <add>, %59, %cst_26 [1, 2] : vector<1x8x768xf32> to vector<1xf32>
    %61 = vector.shape_cast %60 : vector<1xf32> to vector<1x1x1xf32>
    %62 = vector.extract %61[0, 0, 0] : f32 from vector<1x1x1xf32>
    %63 = vector.broadcast %62 : f32 to vector<1x1xf32>
    %cst_27 = arith.constant 2.048000e+03 : f32
    %64 = vector.broadcast %cst_27 : f32 to vector<1x1xf32>
    %65 = arith.divf %63, %64 : vector<1x1xf32>
    %66 = arith.mulf %58, %58 : vector<8x768xf32>
    %67 = vector.shape_cast %66 : vector<8x768xf32> to vector<1x8x768xf32>
    %cst_28 = arith.constant dense<0.000000e+00> : vector<1xf32>
    %68 = vector.multi_reduction <add>, %67, %cst_28 [1, 2] : vector<1x8x768xf32> to vector<1xf32>
    %69 = vector.shape_cast %68 : vector<1xf32> to vector<1x1x1xf32>
    %70 = vector.extract %69[0, 0, 0] : f32 from vector<1x1x1xf32>
    %71 = vector.broadcast %70 : f32 to vector<1x1xf32>
    %cst_29 = arith.constant 2.048000e+03 : f32
    %72 = vector.broadcast %cst_29 : f32 to vector<1x1xf32>
    %73 = arith.divf %71, %72 : vector<1x1xf32>
    %74 = arith.mulf %65, %65 : vector<1x1xf32>
    %75 = arith.subf %73, %74 : vector<1x1xf32>
    %cst_30 = arith.constant 0.000000e+00 : f32
    %76 = vector.broadcast %cst_30 : f32 to vector<1x1xf32>
    %77 = arith.maximumf %75, %76 : vector<1x1xf32>
    %cst_31 = arith.constant 9.99999974E-6 : f32
    %78 = vector.broadcast %cst_31 : f32 to vector<1x1xf32>
    %79 = arith.addf %77, %78 : vector<1x1xf32>
    %80 = math.rsqrt %79 : vector<1x1xf32>
    %81 = vector.broadcast %80 : vector<1x1xf32> to vector<1x768xf32>
    %82 = arith.mulf %81, %1 : vector<1x768xf32>
    %83 = arith.addf %52, %82 : vector<1x768xf32>
    %84 = arith.mulf %65, %80 : vector<1x1xf32>
    %85 = vector.broadcast %84 : vector<1x1xf32> to vector<1x768xf32>
    %86 = arith.mulf %85, %1 : vector<1x768xf32>
    %87 = arith.subf %56, %86 : vector<1x768xf32>
    %88 = vector.broadcast %83 : vector<1x768xf32> to vector<8x768xf32>
    %89 = arith.mulf %23, %88 : vector<8x768xf32>
    %90 = vector.broadcast %87 : vector<1x768xf32> to vector<8x768xf32>
    %91 = arith.addf %89, %90 : vector<8x768xf32>
    %c0_32 = arith.constant 0 : index
    %c0_33 = arith.constant 0 : index
    %92 = vector.load %arg5[%c0_32, %c0_33] : memref<8x1xf32, #tpu.memory_space<vmem>>, vector<8x1xf32>
    %93 = vector.broadcast %92 : vector<8x1xf32> to vector<8x768xf32>
    %94 = arith.mulf %91, %93 : vector<8x768xf32>
    %c0_34 = arith.constant 0 : index
    %c0_35 = arith.constant 0 : index
    %95 = vector.load %arg6[%c0_34, %c0_35] : memref<8x1xf32, #tpu.memory_space<vmem>>, vector<8x1xf32>
    %96 = vector.broadcast %95 : vector<8x1xf32> to vector<8x768xf32>
    %97 = arith.addf %94, %96 : vector<8x768xf32>
    %98 = vector.broadcast %2 : vector<1x768xf32> to vector<8x768xf32>
    %99 = arith.mulf %97, %98 : vector<8x768xf32>
    %cst_36 = arith.constant 5.000000e-01 : f32
    %100 = vector.broadcast %cst_36 : f32 to vector<8x768xf32>
    %101 = arith.mulf %100, %99 : vector<8x768xf32>
    %cst_37 = arith.constant 4.471500e-02 : f32
    %102 = vector.broadcast %cst_37 : f32 to vector<8x768xf32>
    %103 = arith.mulf %102, %99 : vector<8x768xf32>
    %104 = arith.mulf %103, %99 : vector<8x768xf32>
    %105 = arith.mulf %104, %99 : vector<8x768xf32>
    %106 = arith.addf %99, %105 : vector<8x768xf32>
    %cst_38 = arith.constant 0.797884583 : f32
    %107 = vector.broadcast %cst_38 : f32 to vector<8x768xf32>
    %108 = arith.mulf %107, %106 : vector<8x768xf32>
    %109 = math.tanh %108 : vector<8x768xf32>
    %cst_39 = arith.constant 1.000000e+00 : f32
    %110 = vector.broadcast %cst_39 : f32 to vector<8x768xf32>
    %111 = arith.addf %110, %109 : vector<8x768xf32>
    %112 = arith.mulf %101, %111 : vector<8x768xf32>
    %c19_i32_40 = arith.constant 19 : i32
    %113 = tpu.dynamic_rotate %112 by %c19_i32_40 dim 1 : vector<8x768xf32>, i32 -> vector<8x768xf32>
    %c0_41 = arith.constant 0 : index
    %c0_42 = arith.constant 0 : index
    %114 = vector.load %arg17[%c0_41, %c0_42] : memref<72x768xf32, #tpu.memory_space<vmem>>, vector<8x768xf32>
    tpu.vector_store %arg17[%c0_41, %c0_42], %113 {strides = array<i32>} : memref<72x768xf32, #tpu.memory_space<vmem>>, vector<8x768xf32>,
    %c18_i32_43 = arith.constant 18 : i32
    %115 = tpu.dynamic_rotate %112 by %c18_i32_43 dim 1 : vector<8x768xf32>, i32 -> vector<8x768xf32>
    %c8_44 = arith.constant 8 : index
    %c0_45 = arith.constant 0 : index
    %116 = vector.load %arg17[%c8_44, %c0_45] : memref<72x768xf32, #tpu.memory_space<vmem>>, vector<8x768xf32>
    tpu.vector_store %arg17[%c8_44, %c0_45], %115 {strides = array<i32>} : memref<72x768xf32, #tpu.memory_space<vmem>>, vector<8x768xf32>,
    %c17_i32_46 = arith.constant 17 : i32
    %117 = tpu.dynamic_rotate %112 by %c17_i32_46 dim 1 : vector<8x768xf32>, i32 -> vector<8x768xf32>
    %c16_47 = arith.constant 16 : index
    %c0_48 = arith.constant 0 : index
    %118 = vector.load %arg17[%c16_47, %c0_48] : memref<72x768xf32, #tpu.memory_space<vmem>>, vector<8x768xf32>
    tpu.vector_store %arg17[%c16_47, %c0_48], %117 {strides = array<i32>} : memref<72x768xf32, #tpu.memory_space<vmem>>, vector<8x768xf32>,
    %c1_i32_49 = arith.constant 1 : i32
    %119 = tpu.dynamic_rotate %112 by %c1_i32_49 dim 1 : vector<8x768xf32>, i32 -> vector<8x768xf32>
    %c24_50 = arith.constant 24 : index
    %c0_51 = arith.constant 0 : index
    %120 = vector.load %arg17[%c24_50, %c0_51] : memref<72x768xf32, #tpu.memory_space<vmem>>, vector<8x768xf32>
    tpu.vector_store %arg17[%c24_50, %c0_51], %119 {strides = array<i32>} : memref<72x768xf32, #tpu.memory_space<vmem>>, vector<8x768xf32>,
    %c32_52 = arith.constant 32 : index
    %c0_53 = arith.constant 0 : index
    %121 = vector.load %arg17[%c32_52, %c0_53] : memref<72x768xf32, #tpu.memory_space<vmem>>, vector<8x768xf32>
    tpu.vector_store %arg17[%c32_52, %c0_53], %112 {strides = array<i32>} : memref<72x768xf32, #tpu.memory_space<vmem>>, vector<8x768xf32>,
    %c767_i32_54 = arith.constant 767 : i32
    %122 = tpu.dynamic_rotate %112 by %c767_i32_54 dim 1 : vector<8x768xf32>, i32 -> vector<8x768xf32>
    %c40_55 = arith.constant 40 : index
    %c0_56 = arith.constant 0 : index
    %123 = vector.load %arg17[%c40_55, %c0_56] : memref<72x768xf32, #tpu.memory_space<vmem>>, vector<8x768xf32>
    tpu.vector_store %arg17[%c40_55, %c0_56], %122 {strides = array<i32>} : memref<72x768xf32, #tpu.memory_space<vmem>>, vector<8x768xf32>,
    %c751_i32_57 = arith.constant 751 : i32
    %124 = tpu.dynamic_rotate %112 by %c751_i32_57 dim 1 : vector<8x768xf32>, i32 -> vector<8x768xf32>
    %c48_58 = arith.constant 48 : index
    %c0_59 = arith.constant 0 : index
    %125 = vector.load %arg17[%c48_58, %c0_59] : memref<72x768xf32, #tpu.memory_space<vmem>>, vector<8x768xf32>
    tpu.vector_store %arg17[%c48_58, %c0_59], %124 {strides = array<i32>} : memref<72x768xf32, #tpu.memory_space<vmem>>, vector<8x768xf32>,
    %c750_i32_60 = arith.constant 750 : i32
    %126 = tpu.dynamic_rotate %112 by %c750_i32_60 dim 1 : vector<8x768xf32>, i32 -> vector<8x768xf32>
    %c56_61 = arith.constant 56 : index
    %c0_62 = arith.constant 0 : index
    %127 = vector.load %arg17[%c56_61, %c0_62] : memref<72x768xf32, #tpu.memory_space<vmem>>, vector<8x768xf32>
    tpu.vector_store %arg17[%c56_61, %c0_62], %126 {strides = array<i32>} : memref<72x768xf32, #tpu.memory_space<vmem>>, vector<8x768xf32>,
    %c749_i32_63 = arith.constant 749 : i32
    %128 = tpu.dynamic_rotate %112 by %c749_i32_63 dim 1 : vector<8x768xf32>, i32 -> vector<8x768xf32>
    %c64_64 = arith.constant 64 : index
    %c0_65 = arith.constant 0 : index
    %129 = vector.load %arg17[%c64_64, %c0_65] : memref<72x768xf32, #tpu.memory_space<vmem>>, vector<8x768xf32>
    tpu.vector_store %arg17[%c64_64, %c0_65], %128 {strides = array<i32>} : memref<72x768xf32, #tpu.memory_space<vmem>>, vector<8x768xf32>,
    %c0_66 = arith.constant 0 : index
    %c0_67 = arith.constant 0 : index
    %130 = vector.load %arg7[%c0_66, %c0_67] : memref<8x72xf32, #tpu.memory_space<vmem>>, vector<8x72xf32>
    %c0_68 = arith.constant 0 : index
    %c0_69 = arith.constant 0 : index
    %131 = vector.load %arg17[%c0_68, %c0_69] : memref<72x768xf32, #tpu.memory_space<vmem>>, vector<72x768xf32>
    %cst_70 = arith.constant dense<0.000000e+00> : vector<8x768xf32>
    %132 = tpu.matmul %130, %131, %cst_70 {dimension_numbers = #tpu.dot_dimension_numbers<[1], [0], [0], [1], [0, 0, 1, 1], [], []>} : vector<8x72xf32>, vector<72x768xf32>, vector<8x768xf32> -> vector<8x768xf32>
    %cst_71 = arith.constant 0.000000e+00 : f32
    %133 = vector.broadcast %cst_71 : f32 to vector<1x768xf32>
    %cst_72 = arith.constant 0.000000e+00 : f32
    %134 = vector.broadcast %cst_72 : f32 to vector<1x768xf32>
    %135 = vector.broadcast %0 : vector<1x768xf32> to vector<8x768xf32>
    %136 = arith.mulf %132, %135 : vector<8x768xf32>
    %137 = vector.shape_cast %136 : vector<8x768xf32> to vector<1x8x768xf32>
    %cst_73 = arith.constant dense<0.000000e+00> : vector<1xf32>
    %138 = vector.multi_reduction <add>, %137, %cst_73 [1, 2] : vector<1x8x768xf32> to vector<1xf32>
    %139 = vector.shape_cast %138 : vector<1xf32> to vector<1x1x1xf32>
    %140 = vector.extract %139[0, 0, 0] : f32 from vector<1x1x1xf32>
    %141 = vector.broadcast %140 : f32 to vector<1x1xf32>
    %cst_74 = arith.constant 2.048000e+03 : f32
    %142 = vector.broadcast %cst_74 : f32 to vector<1x1xf32>
    %143 = arith.divf %141, %142 : vector<1x1xf32>
    %144 = arith.mulf %136, %136 : vector<8x768xf32>
    %145 = vector.shape_cast %144 : vector<8x768xf32> to vector<1x8x768xf32>
    %cst_75 = arith.constant dense<0.000000e+00> : vector<1xf32>
    %146 = vector.multi_reduction <add>, %145, %cst_75 [1, 2] : vector<1x8x768xf32> to vector<1xf32>
    %147 = vector.shape_cast %146 : vector<1xf32> to vector<1x1x1xf32>
    %148 = vector.extract %147[0, 0, 0] : f32 from vector<1x1x1xf32>
    %149 = vector.broadcast %148 : f32 to vector<1x1xf32>
    %cst_76 = arith.constant 2.048000e+03 : f32
    %150 = vector.broadcast %cst_76 : f32 to vector<1x1xf32>
    %151 = arith.divf %149, %150 : vector<1x1xf32>
    %152 = arith.mulf %143, %143 : vector<1x1xf32>
    %153 = arith.subf %151, %152 : vector<1x1xf32>
    %cst_77 = arith.constant 0.000000e+00 : f32
    %154 = vector.broadcast %cst_77 : f32 to vector<1x1xf32>
    %155 = arith.maximumf %153, %154 : vector<1x1xf32>
    %cst_78 = arith.constant 9.99999974E-6 : f32
    %156 = vector.broadcast %cst_78 : f32 to vector<1x1xf32>
    %157 = arith.addf %155, %156 : vector<1x1xf32>
    %158 = math.rsqrt %157 : vector<1x1xf32>
    %159 = vector.broadcast %158 : vector<1x1xf32> to vector<1x768xf32>
    %160 = arith.mulf %159, %0 : vector<1x768xf32>
    %161 = arith.addf %133, %160 : vector<1x768xf32>
    %162 = arith.mulf %143, %158 : vector<1x1xf32>
    %163 = vector.broadcast %162 : vector<1x1xf32> to vector<1x768xf32>
    %164 = arith.mulf %163, %0 : vector<1x768xf32>
    %165 = arith.subf %134, %164 : vector<1x768xf32>
    %166 = vector.broadcast %1 : vector<1x768xf32> to vector<8x768xf32>
    %167 = arith.mulf %132, %166 : vector<8x768xf32>
    %168 = vector.shape_cast %167 : vector<8x768xf32> to vector<1x8x768xf32>
    %cst_79 = arith.constant dense<0.000000e+00> : vector<1xf32>
    %169 = vector.multi_reduction <add>, %168, %cst_79 [1, 2] : vector<1x8x768xf32> to vector<1xf32>
    %170 = vector.shape_cast %169 : vector<1xf32> to vector<1x1x1xf32>
    %171 = vector.extract %170[0, 0, 0] : f32 from vector<1x1x1xf32>
    %172 = vector.broadcast %171 : f32 to vector<1x1xf32>
    %cst_80 = arith.constant 2.048000e+03 : f32
    %173 = vector.broadcast %cst_80 : f32 to vector<1x1xf32>
    %174 = arith.divf %172, %173 : vector<1x1xf32>
    %175 = arith.mulf %167, %167 : vector<8x768xf32>
    %176 = vector.shape_cast %175 : vector<8x768xf32> to vector<1x8x768xf32>
    %cst_81 = arith.constant dense<0.000000e+00> : vector<1xf32>
    %177 = vector.multi_reduction <add>, %176, %cst_81 [1, 2] : vector<1x8x768xf32> to vector<1xf32>
    %178 = vector.shape_cast %177 : vector<1xf32> to vector<1x1x1xf32>
    %179 = vector.extract %178[0, 0, 0] : f32 from vector<1x1x1xf32>
    %180 = vector.broadcast %179 : f32 to vector<1x1xf32>
    %cst_82 = arith.constant 2.048000e+03 : f32
    %181 = vector.broadcast %cst_82 : f32 to vector<1x1xf32>
    %182 = arith.divf %180, %181 : vector<1x1xf32>
    %183 = arith.mulf %174, %174 : vector<1x1xf32>
    %184 = arith.subf %182, %183 : vector<1x1xf32>
    %cst_83 = arith.constant 0.000000e+00 : f32
    %185 = vector.broadcast %cst_83 : f32 to vector<1x1xf32>
    %186 = arith.maximumf %184, %185 : vector<1x1xf32>
    %cst_84 = arith.constant 9.99999974E-6 : f32
    %187 = vector.broadcast %cst_84 : f32 to vector<1x1xf32>
    %188 = arith.addf %186, %187 : vector<1x1xf32>
    %189 = math.rsqrt %188 : vector<1x1xf32>
    %190 = vector.broadcast %189 : vector<1x1xf32> to vector<1x768xf32>
    %191 = arith.mulf %190, %1 : vector<1x768xf32>
    %192 = arith.addf %161, %191 : vector<1x768xf32>
    %193 = arith.mulf %174, %189 : vector<1x1xf32>
    %194 = vector.broadcast %193 : vector<1x1xf32> to vector<1x768xf32>
    %195 = arith.mulf %194, %1 : vector<1x768xf32>
    %196 = arith.subf %165, %195 : vector<1x768xf32>
    %197 = vector.broadcast %192 : vector<1x768xf32> to vector<8x768xf32>
    %198 = arith.mulf %132, %197 : vector<8x768xf32>
    %199 = vector.broadcast %196 : vector<1x768xf32> to vector<8x768xf32>
    %200 = arith.addf %198, %199 : vector<8x768xf32>
    %c0_85 = arith.constant 0 : index
    %c0_86 = arith.constant 0 : index
    %201 = vector.load %arg8[%c0_85, %c0_86] : memref<8x1xf32, #tpu.memory_space<vmem>>, vector<8x1xf32>
    %202 = vector.broadcast %201 : vector<8x1xf32> to vector<8x768xf32>
    %203 = arith.mulf %200, %202 : vector<8x768xf32>
    %c0_87 = arith.constant 0 : index
    %c0_88 = arith.constant 0 : index
    %204 = vector.load %arg9[%c0_87, %c0_88] : memref<8x1xf32, #tpu.memory_space<vmem>>, vector<8x1xf32>
    %205 = vector.broadcast %204 : vector<8x1xf32> to vector<8x768xf32>
    %206 = arith.addf %203, %205 : vector<8x768xf32>
    %207 = vector.broadcast %2 : vector<1x768xf32> to vector<8x768xf32>
    %208 = arith.mulf %206, %207 : vector<8x768xf32>
    %209 = arith.addf %3, %208 : vector<8x768xf32>
    %cst_89 = arith.constant 5.000000e-01 : f32
    %210 = vector.broadcast %cst_89 : f32 to vector<8x768xf32>
    %211 = arith.mulf %210, %209 : vector<8x768xf32>
    %cst_90 = arith.constant 4.471500e-02 : f32
    %212 = vector.broadcast %cst_90 : f32 to vector<8x768xf32>
    %213 = arith.mulf %212, %209 : vector<8x768xf32>
    %214 = arith.mulf %213, %209 : vector<8x768xf32>
    %215 = arith.mulf %214, %209 : vector<8x768xf32>
    %216 = arith.addf %209, %215 : vector<8x768xf32>
    %cst_91 = arith.constant 0.797884583 : f32
    %217 = vector.broadcast %cst_91 : f32 to vector<8x768xf32>
    %218 = arith.mulf %217, %216 : vector<8x768xf32>
    %219 = math.tanh %218 : vector<8x768xf32>
    %cst_92 = arith.constant 1.000000e+00 : f32
    %220 = vector.broadcast %cst_92 : f32 to vector<8x768xf32>
    %221 = arith.addf %220, %219 : vector<8x768xf32>
    %222 = arith.mulf %211, %221 : vector<8x768xf32>
    %c19_i32_93 = arith.constant 19 : i32
    %223 = tpu.dynamic_rotate %222 by %c19_i32_93 dim 1 : vector<8x768xf32>, i32 -> vector<8x768xf32>
    %c0_94 = arith.constant 0 : index
    %c0_95 = arith.constant 0 : index
    %224 = vector.load %arg17[%c0_94, %c0_95] : memref<72x768xf32, #tpu.memory_space<vmem>>, vector<8x768xf32>
    tpu.vector_store %arg17[%c0_94, %c0_95], %223 {strides = array<i32>} : memref<72x768xf32, #tpu.memory_space<vmem>>, vector<8x768xf32>,
    %c18_i32_96 = arith.constant 18 : i32
    %225 = tpu.dynamic_rotate %222 by %c18_i32_96 dim 1 : vector<8x768xf32>, i32 -> vector<8x768xf32>
    %c8_97 = arith.constant 8 : index
    %c0_98 = arith.constant 0 : index
    %226 = vector.load %arg17[%c8_97, %c0_98] : memref<72x768xf32, #tpu.memory_space<vmem>>, vector<8x768xf32>
    tpu.vector_store %arg17[%c8_97, %c0_98], %225 {strides = array<i32>} : memref<72x768xf32, #tpu.memory_space<vmem>>, vector<8x768xf32>,
    %c17_i32_99 = arith.constant 17 : i32
    %227 = tpu.dynamic_rotate %222 by %c17_i32_99 dim 1 : vector<8x768xf32>, i32 -> vector<8x768xf32>
    %c16_100 = arith.constant 16 : index
    %c0_101 = arith.constant 0 : index
    %228 = vector.load %arg17[%c16_100, %c0_101] : memref<72x768xf32, #tpu.memory_space<vmem>>, vector<8x768xf32>
    tpu.vector_store %arg17[%c16_100, %c0_101], %227 {strides = array<i32>} : memref<72x768xf32, #tpu.memory_space<vmem>>, vector<8x768xf32>,
    %c1_i32_102 = arith.constant 1 : i32
    %229 = tpu.dynamic_rotate %222 by %c1_i32_102 dim 1 : vector<8x768xf32>, i32 -> vector<8x768xf32>
    %c24_103 = arith.constant 24 : index
    %c0_104 = arith.constant 0 : index
    %230 = vector.load %arg17[%c24_103, %c0_104] : memref<72x768xf32, #tpu.memory_space<vmem>>, vector<8x768xf32>
    tpu.vector_store %arg17[%c24_103, %c0_104], %229 {strides = array<i32>} : memref<72x768xf32, #tpu.memory_space<vmem>>, vector<8x768xf32>,
    %c32_105 = arith.constant 32 : index
    %c0_106 = arith.constant 0 : index
    %231 = vector.load %arg17[%c32_105, %c0_106] : memref<72x768xf32, #tpu.memory_space<vmem>>, vector<8x768xf32>
    tpu.vector_store %arg17[%c32_105, %c0_106], %222 {strides = array<i32>} : memref<72x768xf32, #tpu.memory_space<vmem>>, vector<8x768xf32>,
    %c767_i32_107 = arith.constant 767 : i32
    %232 = tpu.dynamic_rotate %222 by %c767_i32_107 dim 1 : vector<8x768xf32>, i32 -> vector<8x768xf32>
    %c40_108 = arith.constant 40 : index
    %c0_109 = arith.constant 0 : index
    %233 = vector.load %arg17[%c40_108, %c0_109] : memref<72x768xf32, #tpu.memory_space<vmem>>, vector<8x768xf32>
    tpu.vector_store %arg17[%c40_108, %c0_109], %232 {strides = array<i32>} : memref<72x768xf32, #tpu.memory_space<vmem>>, vector<8x768xf32>,
    %c751_i32_110 = arith.constant 751 : i32
    %234 = tpu.dynamic_rotate %222 by %c751_i32_110 dim 1 : vector<8x768xf32>, i32 -> vector<8x768xf32>
    %c48_111 = arith.constant 48 : index
    %c0_112 = arith.constant 0 : index
    %235 = vector.load %arg17[%c48_111, %c0_112] : memref<72x768xf32, #tpu.memory_space<vmem>>, vector<8x768xf32>
    tpu.vector_store %arg17[%c48_111, %c0_112], %234 {strides = array<i32>} : memref<72x768xf32, #tpu.memory_space<vmem>>, vector<8x768xf32>,
    %c750_i32_113 = arith.constant 750 : i32
    %236 = tpu.dynamic_rotate %222 by %c750_i32_113 dim 1 : vector<8x768xf32>, i32 -> vector<8x768xf32>
    %c56_114 = arith.constant 56 : index
    %c0_115 = arith.constant 0 : index
    %237 = vector.load %arg17[%c56_114, %c0_115] : memref<72x768xf32, #tpu.memory_space<vmem>>, vector<8x768xf32>
    tpu.vector_store %arg17[%c56_114, %c0_115], %236 {strides = array<i32>} : memref<72x768xf32, #tpu.memory_space<vmem>>, vector<8x768xf32>,
    %c749_i32_116 = arith.constant 749 : i32
    %238 = tpu.dynamic_rotate %222 by %c749_i32_116 dim 1 : vector<8x768xf32>, i32 -> vector<8x768xf32>
    %c64_117 = arith.constant 64 : index
    %c0_118 = arith.constant 0 : index
    %239 = vector.load %arg17[%c64_117, %c0_118] : memref<72x768xf32, #tpu.memory_space<vmem>>, vector<8x768xf32>
    tpu.vector_store %arg17[%c64_117, %c0_118], %238 {strides = array<i32>} : memref<72x768xf32, #tpu.memory_space<vmem>>, vector<8x768xf32>,
    %c0_119 = arith.constant 0 : index
    %c0_120 = arith.constant 0 : index
    %240 = vector.load %arg10[%c0_119, %c0_120] : memref<8x72xf32, #tpu.memory_space<vmem>>, vector<8x72xf32>
    %c0_121 = arith.constant 0 : index
    %c0_122 = arith.constant 0 : index
    %241 = vector.load %arg17[%c0_121, %c0_122] : memref<72x768xf32, #tpu.memory_space<vmem>>, vector<72x768xf32>
    %cst_123 = arith.constant dense<0.000000e+00> : vector<8x768xf32>
    %242 = tpu.matmul %240, %241, %cst_123 {dimension_numbers = #tpu.dot_dimension_numbers<[1], [0], [0], [1], [0, 0, 1, 1], [], []>} : vector<8x72xf32>, vector<72x768xf32>, vector<8x768xf32> -> vector<8x768xf32>
    %cst_124 = arith.constant 0.000000e+00 : f32
    %243 = vector.broadcast %cst_124 : f32 to vector<1x768xf32>
    %cst_125 = arith.constant 0.000000e+00 : f32
    %244 = vector.broadcast %cst_125 : f32 to vector<1x768xf32>
    %245 = vector.broadcast %0 : vector<1x768xf32> to vector<8x768xf32>
    %246 = arith.mulf %242, %245 : vector<8x768xf32>
    %247 = vector.shape_cast %246 : vector<8x768xf32> to vector<1x8x768xf32>
    %cst_126 = arith.constant dense<0.000000e+00> : vector<1xf32>
    %248 = vector.multi_reduction <add>, %247, %cst_126 [1, 2] : vector<1x8x768xf32> to vector<1xf32>
    %249 = vector.shape_cast %248 : vector<1xf32> to vector<1x1x1xf32>
    %250 = vector.extract %249[0, 0, 0] : f32 from vector<1x1x1xf32>
    %251 = vector.broadcast %250 : f32 to vector<1x1xf32>
    %cst_127 = arith.constant 1.024000e+03 : f32
    %252 = vector.broadcast %cst_127 : f32 to vector<1x1xf32>
    %253 = arith.divf %251, %252 : vector<1x1xf32>
    %254 = arith.mulf %246, %246 : vector<8x768xf32>
    %255 = vector.shape_cast %254 : vector<8x768xf32> to vector<1x8x768xf32>
    %cst_128 = arith.constant dense<0.000000e+00> : vector<1xf32>
    %256 = vector.multi_reduction <add>, %255, %cst_128 [1, 2] : vector<1x8x768xf32> to vector<1xf32>
    %257 = vector.shape_cast %256 : vector<1xf32> to vector<1x1x1xf32>
    %258 = vector.extract %257[0, 0, 0] : f32 from vector<1x1x1xf32>
    %259 = vector.broadcast %258 : f32 to vector<1x1xf32>
    %cst_129 = arith.constant 1.024000e+03 : f32
    %260 = vector.broadcast %cst_129 : f32 to vector<1x1xf32>
    %261 = arith.divf %259, %260 : vector<1x1xf32>
    %262 = arith.mulf %253, %253 : vector<1x1xf32>
    %263 = arith.subf %261, %262 : vector<1x1xf32>
    %cst_130 = arith.constant 0.000000e+00 : f32
    %264 = vector.broadcast %cst_130 : f32 to vector<1x1xf32>
    %265 = arith.maximumf %263, %264 : vector<1x1xf32>
    %cst_131 = arith.constant 9.99999974E-6 : f32
    %266 = vector.broadcast %cst_131 : f32 to vector<1x1xf32>
    %267 = arith.addf %265, %266 : vector<1x1xf32>
    %268 = math.rsqrt %267 : vector<1x1xf32>
    %269 = vector.broadcast %268 : vector<1x1xf32> to vector<1x768xf32>
    %270 = arith.mulf %269, %0 : vector<1x768xf32>
    %271 = arith.addf %243, %270 : vector<1x768xf32>
    %272 = arith.mulf %253, %268 : vector<1x1xf32>
    %273 = vector.broadcast %272 : vector<1x1xf32> to vector<1x768xf32>
    %274 = arith.mulf %273, %0 : vector<1x768xf32>
    %275 = arith.subf %244, %274 : vector<1x768xf32>
    %276 = vector.broadcast %1 : vector<1x768xf32> to vector<8x768xf32>
    %277 = arith.mulf %242, %276 : vector<8x768xf32>
    %278 = vector.shape_cast %277 : vector<8x768xf32> to vector<1x8x768xf32>
    %cst_132 = arith.constant dense<0.000000e+00> : vector<1xf32>
    %279 = vector.multi_reduction <add>, %278, %cst_132 [1, 2] : vector<1x8x768xf32> to vector<1xf32>
    %280 = vector.shape_cast %279 : vector<1xf32> to vector<1x1x1xf32>
    %281 = vector.extract %280[0, 0, 0] : f32 from vector<1x1x1xf32>
    %282 = vector.broadcast %281 : f32 to vector<1x1xf32>
    %cst_133 = arith.constant 1.024000e+03 : f32
    %283 = vector.broadcast %cst_133 : f32 to vector<1x1xf32>
    %284 = arith.divf %282, %283 : vector<1x1xf32>
    %285 = arith.mulf %277, %277 : vector<8x768xf32>
    %286 = vector.shape_cast %285 : vector<8x768xf32> to vector<1x8x768xf32>
    %cst_134 = arith.constant dense<0.000000e+00> : vector<1xf32>
    %287 = vector.multi_reduction <add>, %286, %cst_134 [1, 2] : vector<1x8x768xf32> to vector<1xf32>
    %288 = vector.shape_cast %287 : vector<1xf32> to vector<1x1x1xf32>
    %289 = vector.extract %288[0, 0, 0] : f32 from vector<1x1x1xf32>
    %290 = vector.broadcast %289 : f32 to vector<1x1xf32>
    %cst_135 = arith.constant 1.024000e+03 : f32
    %291 = vector.broadcast %cst_135 : f32 to vector<1x1xf32>
    %292 = arith.divf %290, %291 : vector<1x1xf32>
    %293 = arith.mulf %284, %284 : vector<1x1xf32>
    %294 = arith.subf %292, %293 : vector<1x1xf32>
    %cst_136 = arith.constant 0.000000e+00 : f32
    %295 = vector.broadcast %cst_136 : f32 to vector<1x1xf32>
    %296 = arith.maximumf %294, %295 : vector<1x1xf32>
    %cst_137 = arith.constant 9.99999974E-6 : f32
    %297 = vector.broadcast %cst_137 : f32 to vector<1x1xf32>
    %298 = arith.addf %296, %297 : vector<1x1xf32>
    %299 = math.rsqrt %298 : vector<1x1xf32>
    %300 = vector.broadcast %299 : vector<1x1xf32> to vector<1x768xf32>
    %301 = arith.mulf %300, %1 : vector<1x768xf32>
    %302 = arith.addf %271, %301 : vector<1x768xf32>
    %303 = arith.mulf %284, %299 : vector<1x1xf32>
    %304 = vector.broadcast %303 : vector<1x1xf32> to vector<1x768xf32>
    %305 = arith.mulf %304, %1 : vector<1x768xf32>
    %306 = arith.subf %275, %305 : vector<1x768xf32>
    %307 = vector.broadcast %302 : vector<1x768xf32> to vector<8x768xf32>
    %308 = arith.mulf %242, %307 : vector<8x768xf32>
    %309 = vector.broadcast %306 : vector<1x768xf32> to vector<8x768xf32>
    %310 = arith.addf %308, %309 : vector<8x768xf32>
    %c0_138 = arith.constant 0 : index
    %c0_139 = arith.constant 0 : index
    %311 = vector.load %arg11[%c0_138, %c0_139] : memref<8x1xf32, #tpu.memory_space<vmem>>, vector<8x1xf32>
    %312 = vector.broadcast %311 : vector<8x1xf32> to vector<8x768xf32>
    %313 = arith.mulf %310, %312 : vector<8x768xf32>
    %c0_140 = arith.constant 0 : index
    %c0_141 = arith.constant 0 : index
    %314 = vector.load %arg12[%c0_140, %c0_141] : memref<8x1xf32, #tpu.memory_space<vmem>>, vector<8x1xf32>
    %315 = vector.broadcast %314 : vector<8x1xf32> to vector<8x768xf32>
    %316 = arith.addf %313, %315 : vector<8x768xf32>
    %317 = vector.broadcast %2 : vector<1x768xf32> to vector<8x768xf32>
    %318 = arith.mulf %316, %317 : vector<8x768xf32>
    %cst_142 = arith.constant 5.000000e-01 : f32
    %319 = vector.broadcast %cst_142 : f32 to vector<8x768xf32>
    %320 = arith.mulf %319, %318 : vector<8x768xf32>
    %cst_143 = arith.constant 4.471500e-02 : f32
    %321 = vector.broadcast %cst_143 : f32 to vector<8x768xf32>
    %322 = arith.mulf %321, %318 : vector<8x768xf32>
    %323 = arith.mulf %322, %318 : vector<8x768xf32>
    %324 = arith.mulf %323, %318 : vector<8x768xf32>
    %325 = arith.addf %318, %324 : vector<8x768xf32>
    %cst_144 = arith.constant 0.797884583 : f32
    %326 = vector.broadcast %cst_144 : f32 to vector<8x768xf32>
    %327 = arith.mulf %326, %325 : vector<8x768xf32>
    %328 = math.tanh %327 : vector<8x768xf32>
    %cst_145 = arith.constant 1.000000e+00 : f32
    %329 = vector.broadcast %cst_145 : f32 to vector<8x768xf32>
    %330 = arith.addf %329, %328 : vector<8x768xf32>
    %331 = arith.mulf %320, %330 : vector<8x768xf32>
    %c19_i32_146 = arith.constant 19 : i32
    %332 = tpu.dynamic_rotate %331 by %c19_i32_146 dim 1 : vector<8x768xf32>, i32 -> vector<8x768xf32>
    %c0_147 = arith.constant 0 : index
    %c0_148 = arith.constant 0 : index
    %333 = vector.load %arg17[%c0_147, %c0_148] : memref<72x768xf32, #tpu.memory_space<vmem>>, vector<8x768xf32>
    tpu.vector_store %arg17[%c0_147, %c0_148], %332 {strides = array<i32>} : memref<72x768xf32, #tpu.memory_space<vmem>>, vector<8x768xf32>,
    %c18_i32_149 = arith.constant 18 : i32
    %334 = tpu.dynamic_rotate %331 by %c18_i32_149 dim 1 : vector<8x768xf32>, i32 -> vector<8x768xf32>
    %c8_150 = arith.constant 8 : index
    %c0_151 = arith.constant 0 : index
    %335 = vector.load %arg17[%c8_150, %c0_151] : memref<72x768xf32, #tpu.memory_space<vmem>>, vector<8x768xf32>
    tpu.vector_store %arg17[%c8_150, %c0_151], %334 {strides = array<i32>} : memref<72x768xf32, #tpu.memory_space<vmem>>, vector<8x768xf32>,
    %c17_i32_152 = arith.constant 17 : i32
    %336 = tpu.dynamic_rotate %331 by %c17_i32_152 dim 1 : vector<8x768xf32>, i32 -> vector<8x768xf32>
    %c16_153 = arith.constant 16 : index
    %c0_154 = arith.constant 0 : index
    %337 = vector.load %arg17[%c16_153, %c0_154] : memref<72x768xf32, #tpu.memory_space<vmem>>, vector<8x768xf32>
    tpu.vector_store %arg17[%c16_153, %c0_154], %336 {strides = array<i32>} : memref<72x768xf32, #tpu.memory_space<vmem>>, vector<8x768xf32>,
    %c1_i32_155 = arith.constant 1 : i32
    %338 = tpu.dynamic_rotate %331 by %c1_i32_155 dim 1 : vector<8x768xf32>, i32 -> vector<8x768xf32>
    %c24_156 = arith.constant 24 : index
    %c0_157 = arith.constant 0 : index
    %339 = vector.load %arg17[%c24_156, %c0_157] : memref<72x768xf32, #tpu.memory_space<vmem>>, vector<8x768xf32>
    tpu.vector_store %arg17[%c24_156, %c0_157], %338 {strides = array<i32>} : memref<72x768xf32, #tpu.memory_space<vmem>>, vector<8x768xf32>,
    %c32_158 = arith.constant 32 : index
    %c0_159 = arith.constant 0 : index
    %340 = vector.load %arg17[%c32_158, %c0_159] : memref<72x768xf32, #tpu.memory_space<vmem>>, vector<8x768xf32>
    tpu.vector_store %arg17[%c32_158, %c0_159], %331 {strides = array<i32>} : memref<72x768xf32, #tpu.memory_space<vmem>>, vector<8x768xf32>,
    %c767_i32_160 = arith.constant 767 : i32
    %341 = tpu.dynamic_rotate %331 by %c767_i32_160 dim 1 : vector<8x768xf32>, i32 -> vector<8x768xf32>
    %c40_161 = arith.constant 40 : index
    %c0_162 = arith.constant 0 : index
    %342 = vector.load %arg17[%c40_161, %c0_162] : memref<72x768xf32, #tpu.memory_space<vmem>>, vector<8x768xf32>
    tpu.vector_store %arg17[%c40_161, %c0_162], %341 {strides = array<i32>} : memref<72x768xf32, #tpu.memory_space<vmem>>, vector<8x768xf32>,
    %c751_i32_163 = arith.constant 751 : i32
    %343 = tpu.dynamic_rotate %331 by %c751_i32_163 dim 1 : vector<8x768xf32>, i32 -> vector<8x768xf32>
    %c48_164 = arith.constant 48 : index
    %c0_165 = arith.constant 0 : index
    %344 = vector.load %arg17[%c48_164, %c0_165] : memref<72x768xf32, #tpu.memory_space<vmem>>, vector<8x768xf32>
    tpu.vector_store %arg17[%c48_164, %c0_165], %343 {strides = array<i32>} : memref<72x768xf32, #tpu.memory_space<vmem>>, vector<8x768xf32>,
    %c750_i32_166 = arith.constant 750 : i32
    %345 = tpu.dynamic_rotate %331 by %c750_i32_166 dim 1 : vector<8x768xf32>, i32 -> vector<8x768xf32>
    %c56_167 = arith.constant 56 : index
    %c0_168 = arith.constant 0 : index
    %346 = vector.load %arg17[%c56_167, %c0_168] : memref<72x768xf32, #tpu.memory_space<vmem>>, vector<8x768xf32>
    tpu.vector_store %arg17[%c56_167, %c0_168], %345 {strides = array<i32>} : memref<72x768xf32, #tpu.memory_space<vmem>>, vector<8x768xf32>,
    %c749_i32_169 = arith.constant 749 : i32
    %347 = tpu.dynamic_rotate %331 by %c749_i32_169 dim 1 : vector<8x768xf32>, i32 -> vector<8x768xf32>
    %c64_170 = arith.constant 64 : index
    %c0_171 = arith.constant 0 : index
    %348 = vector.load %arg17[%c64_170, %c0_171] : memref<72x768xf32, #tpu.memory_space<vmem>>, vector<8x768xf32>
    tpu.vector_store %arg17[%c64_170, %c0_171], %347 {strides = array<i32>} : memref<72x768xf32, #tpu.memory_space<vmem>>, vector<8x768xf32>,
    %c0_172 = arith.constant 0 : index
    %c0_173 = arith.constant 0 : index
    %349 = vector.load %arg13[%c0_172, %c0_173] : memref<8x72xf32, #tpu.memory_space<vmem>>, vector<8x72xf32>
    %c0_174 = arith.constant 0 : index
    %c0_175 = arith.constant 0 : index
    %350 = vector.load %arg17[%c0_174, %c0_175] : memref<72x768xf32, #tpu.memory_space<vmem>>, vector<72x768xf32>
    %cst_176 = arith.constant dense<0.000000e+00> : vector<8x768xf32>
    %351 = tpu.matmul %349, %350, %cst_176 {dimension_numbers = #tpu.dot_dimension_numbers<[1], [0], [0], [1], [0, 0, 1, 1], [], []>} : vector<8x72xf32>, vector<72x768xf32>, vector<8x768xf32> -> vector<8x768xf32>
    %cst_177 = arith.constant 0.000000e+00 : f32
    %352 = vector.broadcast %cst_177 : f32 to vector<1x768xf32>
    %cst_178 = arith.constant 0.000000e+00 : f32
    %353 = vector.broadcast %cst_178 : f32 to vector<1x768xf32>
    %354 = vector.broadcast %0 : vector<1x768xf32> to vector<8x768xf32>
    %355 = arith.mulf %351, %354 : vector<8x768xf32>
    %356 = vector.shape_cast %355 : vector<8x768xf32> to vector<1x8x768xf32>
    %cst_179 = arith.constant dense<0.000000e+00> : vector<1xf32>
    %357 = vector.multi_reduction <add>, %356, %cst_179 [1, 2] : vector<1x8x768xf32> to vector<1xf32>
    %358 = vector.shape_cast %357 : vector<1xf32> to vector<1x1x1xf32>
    %359 = vector.extract %358[0, 0, 0] : f32 from vector<1x1x1xf32>
    %360 = vector.broadcast %359 : f32 to vector<1x1xf32>
    %cst_180 = arith.constant 2.048000e+03 : f32
    %361 = vector.broadcast %cst_180 : f32 to vector<1x1xf32>
    %362 = arith.divf %360, %361 : vector<1x1xf32>
    %363 = arith.mulf %355, %355 : vector<8x768xf32>
    %364 = vector.shape_cast %363 : vector<8x768xf32> to vector<1x8x768xf32>
    %cst_181 = arith.constant dense<0.000000e+00> : vector<1xf32>
    %365 = vector.multi_reduction <add>, %364, %cst_181 [1, 2] : vector<1x8x768xf32> to vector<1xf32>
    %366 = vector.shape_cast %365 : vector<1xf32> to vector<1x1x1xf32>
    %367 = vector.extract %366[0, 0, 0] : f32 from vector<1x1x1xf32>
    %368 = vector.broadcast %367 : f32 to vector<1x1xf32>
    %cst_182 = arith.constant 2.048000e+03 : f32
    %369 = vector.broadcast %cst_182 : f32 to vector<1x1xf32>
    %370 = arith.divf %368, %369 : vector<1x1xf32>
    %371 = arith.mulf %362, %362 : vector<1x1xf32>
    %372 = arith.subf %370, %371 : vector<1x1xf32>
    %cst_183 = arith.constant 0.000000e+00 : f32
    %373 = vector.broadcast %cst_183 : f32 to vector<1x1xf32>
    %374 = arith.maximumf %372, %373 : vector<1x1xf32>
    %cst_184 = arith.constant 9.99999974E-6 : f32
    %375 = vector.broadcast %cst_184 : f32 to vector<1x1xf32>
    %376 = arith.addf %374, %375 : vector<1x1xf32>
    %377 = math.rsqrt %376 : vector<1x1xf32>
    %378 = vector.broadcast %377 : vector<1x1xf32> to vector<1x768xf32>
    %379 = arith.mulf %378, %0 : vector<1x768xf32>
    %380 = arith.addf %352, %379 : vector<1x768xf32>
    %381 = arith.mulf %362, %377 : vector<1x1xf32>
    %382 = vector.broadcast %381 : vector<1x1xf32> to vector<1x768xf32>
    %383 = arith.mulf %382, %0 : vector<1x768xf32>
    %384 = arith.subf %353, %383 : vector<1x768xf32>
    %385 = vector.broadcast %1 : vector<1x768xf32> to vector<8x768xf32>
    %386 = arith.mulf %351, %385 : vector<8x768xf32>
    %387 = vector.shape_cast %386 : vector<8x768xf32> to vector<1x8x768xf32>
    %cst_185 = arith.constant dense<0.000000e+00> : vector<1xf32>
    %388 = vector.multi_reduction <add>, %387, %cst_185 [1, 2] : vector<1x8x768xf32> to vector<1xf32>
    %389 = vector.shape_cast %388 : vector<1xf32> to vector<1x1x1xf32>
    %390 = vector.extract %389[0, 0, 0] : f32 from vector<1x1x1xf32>
    %391 = vector.broadcast %390 : f32 to vector<1x1xf32>
    %cst_186 = arith.constant 2.048000e+03 : f32
    %392 = vector.broadcast %cst_186 : f32 to vector<1x1xf32>
    %393 = arith.divf %391, %392 : vector<1x1xf32>
    %394 = arith.mulf %386, %386 : vector<8x768xf32>
    %395 = vector.shape_cast %394 : vector<8x768xf32> to vector<1x8x768xf32>
    %cst_187 = arith.constant dense<0.000000e+00> : vector<1xf32>
    %396 = vector.multi_reduction <add>, %395, %cst_187 [1, 2] : vector<1x8x768xf32> to vector<1xf32>
    %397 = vector.shape_cast %396 : vector<1xf32> to vector<1x1x1xf32>
    %398 = vector.extract %397[0, 0, 0] : f32 from vector<1x1x1xf32>
    %399 = vector.broadcast %398 : f32 to vector<1x1xf32>
    %cst_188 = arith.constant 2.048000e+03 : f32
    %400 = vector.broadcast %cst_188 : f32 to vector<1x1xf32>
    %401 = arith.divf %399, %400 : vector<1x1xf32>
    %402 = arith.mulf %393, %393 : vector<1x1xf32>
    %403 = arith.subf %401, %402 : vector<1x1xf32>
    %cst_189 = arith.constant 0.000000e+00 : f32
    %404 = vector.broadcast %cst_189 : f32 to vector<1x1xf32>
    %405 = arith.maximumf %403, %404 : vector<1x1xf32>
    %cst_190 = arith.constant 9.99999974E-6 : f32
    %406 = vector.broadcast %cst_190 : f32 to vector<1x1xf32>
    %407 = arith.addf %405, %406 : vector<1x1xf32>
    %408 = math.rsqrt %407 : vector<1x1xf32>
    %409 = vector.broadcast %408 : vector<1x1xf32> to vector<1x768xf32>
    %410 = arith.mulf %409, %1 : vector<1x768xf32>
    %411 = arith.addf %380, %410 : vector<1x768xf32>
    %412 = arith.mulf %393, %408 : vector<1x1xf32>
    %413 = vector.broadcast %412 : vector<1x1xf32> to vector<1x768xf32>
    %414 = arith.mulf %413, %1 : vector<1x768xf32>
    %415 = arith.subf %384, %414 : vector<1x768xf32>
    %416 = vector.broadcast %411 : vector<1x768xf32> to vector<8x768xf32>
    %417 = arith.mulf %351, %416 : vector<8x768xf32>
    %418 = vector.broadcast %415 : vector<1x768xf32> to vector<8x768xf32>
    %419 = arith.addf %417, %418 : vector<8x768xf32>
    %c0_191 = arith.constant 0 : index
    %c0_192 = arith.constant 0 : index
    %420 = vector.load %arg14[%c0_191, %c0_192] : memref<8x1xf32, #tpu.memory_space<vmem>>, vector<8x1xf32>
    %421 = vector.broadcast %420 : vector<8x1xf32> to vector<8x768xf32>
    %422 = arith.mulf %419, %421 : vector<8x768xf32>
    %c0_193 = arith.constant 0 : index
    %c0_194 = arith.constant 0 : index
    %423 = vector.load %arg15[%c0_193, %c0_194] : memref<8x1xf32, #tpu.memory_space<vmem>>, vector<8x1xf32>
    %424 = vector.broadcast %423 : vector<8x1xf32> to vector<8x768xf32>
    %425 = arith.addf %422, %424 : vector<8x768xf32>
    %426 = vector.broadcast %2 : vector<1x768xf32> to vector<8x768xf32>
    %427 = arith.mulf %425, %426 : vector<8x768xf32>
    %c0_195 = arith.constant 0 : index
    %c0_196 = arith.constant 0 : index
    %428 = vector.load %arg3[%c0_195, %c0_196] : memref<8x768xf32, #tpu.memory_space<vmem>>, vector<8x768xf32>
    %429 = arith.addf %427, %428 : vector<8x768xf32>
    %c0_197 = arith.constant 0 : index
    %c0_198 = arith.constant 0 : index
    %430 = vector.load %arg16[%c0_197, %c0_198] : memref<8x768xf32, #tpu.memory_space<vmem>>, vector<8x768xf32>
    tpu.vector_store %arg16[%c0_197, %c0_198], %429 {strides = array<i32>} : memref<8x768xf32, #tpu.memory_space<vmem>>, vector<8x768xf32>,
    return
  }
  func.func @transform_0(%arg0: i32) -> (i32, i32) {
    %c0_i32 = arith.constant 0 : i32
    %c0_i32_0 = arith.constant 0 : i32
    %c0_i32_1 = arith.constant 0 : i32
    return %c0_i32, %c0_i32_0 : i32, i32
  }
  func.func @transform_1(%arg0: i32) -> (i32, i32) {
    %c0_i32 = arith.constant 0 : i32
    %c0_i32_0 = arith.constant 0 : i32
    %c0_i32_1 = arith.constant 0 : i32
    return %c0_i32, %c0_i32_0 : i32, i32
  }
  func.func @transform_2(%arg0: i32) -> (i32, i32) {
    %c0_i32 = arith.constant 0 : i32
    %c0_i32_0 = arith.constant 0 : i32
    %c0_i32_1 = arith.constant 0 : i32
    return %c0_i32, %c0_i32_0 : i32, i32
  }
  func.func @transform_3(%arg0: i32) -> (i32, i32) {
    %c0_i32 = arith.constant 0 : i32
    %c0_i32_0 = arith.constant 0 : i32
    %c0_i32_1 = arith.constant 0 : i32
    return %c0_i32, %c0_i32_0 : i32, i32
  }
  func.func @transform_4(%arg0: i32) -> (i32, i32) {
    %c0_i32 = arith.constant 0 : i32
    %c0_i32_0 = arith.constant 0 : i32
    %c0_i32_1 = arith.constant 0 : i32
    return %c0_i32, %c0_i32_0 : i32, i32
  }
  func.func @transform_5(%arg0: i32) -> (i32, i32) {
    %c0_i32 = arith.constant 0 : i32
    %c0_i32_0 = arith.constant 0 : i32
    %c0_i32_1 = arith.constant 0 : i32
    return %c0_i32, %c0_i32_0 : i32, i32
  }
  func.func @transform_6(%arg0: i32) -> (i32, i32) {
    %c0_i32 = arith.constant 0 : i32
    %c0_i32_0 = arith.constant 0 : i32
    %c0_i32_1 = arith.constant 0 : i32
    return %c0_i32, %c0_i32_0 : i32, i32
  }
  func.func @transform_7(%arg0: i32) -> (i32, i32) {
    %c0_i32 = arith.constant 0 : i32
    %c0_i32_0 = arith.constant 0 : i32
    %c0_i32_1 = arith.constant 0 : i32
    return %c0_i32, %c0_i32_0 : i32, i32
  }
  func.func @transform_8(%arg0: i32) -> (i32, i32) {
    %c0_i32 = arith.constant 0 : i32
    %c0_i32_0 = arith.constant 0 : i32
    %c0_i32_1 = arith.constant 0 : i32
    return %c0_i32, %c0_i32_0 : i32, i32
  }
  func.func @transform_9(%arg0: i32) -> (i32, i32) {
    %c0_i32 = arith.constant 0 : i32
    %c0_i32_0 = arith.constant 0 : i32
    %c0_i32_1 = arith.constant 0 : i32
    return %c0_i32, %c0_i32_0 : i32, i32
  }
  func.func @transform_10(%arg0: i32) -> (i32, i32) {
    %c0_i32 = arith.constant 0 : i32
    %c0_i32_0 = arith.constant 0 : i32
    %c0_i32_1 = arith.constant 0 : i32
    return %c0_i32, %c0_i32_0 : i32, i32
  }
  func.func @transform_11(%arg0: i32) -> (i32, i32) {
    %c0_i32 = arith.constant 0 : i32
    %c0_i32_0 = arith.constant 0 : i32
    %c0_i32_1 = arith.constant 0 : i32
    return %c0_i32, %c0_i32_0 : i32, i32
  }
  func.func @transform_12(%arg0: i32) -> (i32, i32) {
    %c0_i32 = arith.constant 0 : i32
    %c0_i32_0 = arith.constant 0 : i32
    %c0_i32_1 = arith.constant 0 : i32
    return %c0_i32, %c0_i32_0 : i32, i32
  }
  func.func @transform_13(%arg0: i32) -> (i32, i32) {
    %c0_i32 = arith.constant 0 : i32
    %c0_i32_0 = arith.constant 0 : i32
    %c0_i32_1 = arith.constant 0 : i32
    return %c0_i32, %c0_i32_0 : i32, i32
  }
  func.func @transform_14(%arg0: i32) -> (i32, i32) {
    %c0_i32 = arith.constant 0 : i32
    %c0_i32_0 = arith.constant 0 : i32
    %c0_i32_1 = arith.constant 0 : i32
    return %c0_i32, %c0_i32_0 : i32, i32
  }
  func.func @transform_15(%arg0: i32) -> (i32, i32) {
    %c0_i32 = arith.constant 0 : i32
    %c0_i32_0 = arith.constant 0 : i32
    %c0_i32_1 = arith.constant 0 : i32
    return %c0_i32, %c0_i32_0 : i32, i32
  }
}

</mosaic_0001>

<bundles_post_ra>
// kernel: tpu_custom_call.1
= control target key start
LH: loop header
LB: loop body
LE: loop exit
PB: predicated region body
PF: predicated region fallthrough
CT: control target
= control target key end

     0   :  { %20 = vsyncpa [#allocation4], 0  ;;  %s4897_s0 = inlined_call_operand.hbm [shape: f32[8,768], index: 0, kind: input, shape index: {}]   ;;  %s4898_s1 = inlined_call_operand.vmem [shape: f32[2,768], index: 1, kind: input, shape index: {}]   ;;  %s4899_s2 = inlined_call_operand.hbm [shape: f32[8,768], index: 2, kind: input, shape index: {}]   ;;  %s4900_s3 = inlined_call_operand.vmem [shape: f32[8,72], index: 3, kind: input, shape index: {}]   ;;  %s4901_s4 = inlined_call_operand.vmem [shape: f32[8,1], index: 4, kind: input, shape index: {}]   ;;  %s4902_s5 = inlined_call_operand.vmem [shape: f32[8,1], index: 5, kind: input, shape index: {}]   ;;  %s4903_s6 = inlined_call_operand.vmem [shape: f32[8,72], index: 6, kind: input, shape index: {}]   ;;  %s4904_s7 = inlined_call_operand.vmem [shape: f32[8,1], index: 7, kind: input, shape index: {}]   ;;  %s4905_s8 = inlined_call_operand.vmem [shape: f32[8,1], index: 8, kind: input, shape index: {}]   ;;  %s4906_s9 = inlined_call_operand.vmem [shape: f32[8,72], index: 9, kind: input, shape index: {}]   ;;  %s4907_s10 = inlined_call_operand.vmem [shape: f32[8,1], index: 10, kind: input, shape index: {}]   ;;  %s4908_s11 = inlined_call_operand.vmem [shape: f32[8,1], index: 11, kind: input, shape index: {}]   ;;  %s4909_s12 = inlined_call_operand.vmem [shape: f32[8,72], index: 12, kind: input, shape index: {}]   ;;  %s4910_s13 = inlined_call_operand.vmem [shape: f32[8,1], index: 13, kind: input, shape index: {}]   ;;  %s4911_s14 = inlined_call_operand.vmem [shape: f32[8,1], index: 14, kind: input, shape index: {}]   ;;  %s4912_s15 = inlined_call_operand.hbm [shape: f32[8,768], index: 15, kind: output, shape index: {}]  }
   0x1   :  { %21 = vsyncpa [#allocation7], 0 }
   0x2   :  { %22 = vsyncpa [#allocation5], 0  ;;  %s28_s20 = sshll.u32 %s4897_s0, 4  ;;  %s3295_s21 = smov [#allocation3]   ;;  %s29_s20 = int_to_ptr.hbm [resolvable:$true] %s28_s20 }
   0x3   :  { %s30_s22 = sshll.u32 %s3295_s21, 4  ;;  %s41_s25 = sshll.u32 %s4899_s2, 4  ;;  %s31_s22 = int_to_ptr.vmem [resolvable:$true] %s30_s22  ;;  %s42_s25 = int_to_ptr.hbm [resolvable:$true] %s41_s25 }
   0x4   :  { %33 = dma.hbm_to_vmem [thread:$0]  %s29_s20, 768, %s31_s22, [#allocation4]  }
   0x5   :  { %s3296_s26 = smov [#allocation6]  }
   0x6   :  { %s43_s27 = sshll.u32 %s3296_s26, 4  ;;  %s44_s27 = int_to_ptr.vmem [resolvable:$true] %s43_s27 }
   0x7   :  { %46 = dma.hbm_to_vmem [thread:$0]  %s42_s25, 768, %s44_s27, [#allocation7]  }
   0x8   :  { %3289 = dma.done.wait [#allocation4], 768  }
   0x9   :  { %3290 = vsyncadd [#allocation4], 4294966528 }
   0xa   :  { %3291 = dma.done.wait [#allocation7], 768  }
   0xb   :  { %3292 = vsyncadd [#allocation7], 4294966528  ;;  %v3395_v0 = vld [vmem:[#allocation3 + $0x10] sm:$0xff]  ;;  %v3397_v1 = vld [vmem:[#allocation3 + $0x18] sm:$0xff]  ;;  %s3297_s0 = smov 109   ;;  %s3298_s2 = smov 111   ;;  %v101_v13 = vlaneseq }
   0xc   :  { %v3399_v2 = vld [vmem:[#allocation3] sm:$0xff]  ;;  %v2708_v3 = vpack.i.bf16 %v3397_v1, %v3395_v0  ;;  %v3403_v4 = vld [vmem:[#allocation3 + $0x8] sm:$0xff]  ;;  %s3299_s28 = smov 110   ;;  %s3300_s29 = smov 127   ;;  %vm352_vm8 = vcmask 588800  }
   0xd   :  { %v2718_v5 = vpack.i.bf16 %v3403_v4, %v3399_v2  ;;  %v3410_v6 = vld [vmem:[#allocation3 + $0x20] sm:$0xff]  ;;  %v3412_v7 = vld [vmem:[#allocation3 + $0x28] sm:$0xff]  ;;  %v2768_v9 = vpack.i.bf16 %v3395_v0, %v3403_v4  ;;  %v2778_v10 = vpack.i.bf16 %v3397_v1, %v3399_v2  ;;  %s3301_s30 = smov 1   ;;  %s3302_s16 = smov 17   ;;  %v3457_v14 = vand.u32 127, %v101_v13 }
   0xe   :  { %2709 = vrot.lane.b32.xlu0 %v2708_v3, %s3297_s0  ;;  %2729 = vrot.lane.b32.xlu2 %v2708_v3, %s3298_s2  ;;  %v2723_v8 = vpack.i.bf16 %v3412_v7, %v3410_v6  ;;  %s3303_s17 = smov 18   ;;  %s3304_s18 = smov 19  }
   0xf   :  { %2719 = vrot.lane.b32.xlu1 %v2718_v5, %s3297_s0  ;;  %vm284_vm0 = vcmp.lt.s32.totalorder %v3457_v14, 109  ;;  %vm259_vm1 = vcmp.lt.s32.totalorder %v3457_v14, 110  ;;  %vm234_vm2 = vcmp.lt.s32.totalorder %v3457_v14, 111  ;;  %vm209_vm3 = vcmp.lt.s32.totalorder %v3457_v14, 127 }
  0x10   :  { %vm178_vm4 = vcmp.lt.s32.totalorder %v3457_v14, 1  ;;  %vm153_vm5 = vcmp.lt.s32.totalorder %v3457_v14, 17  ;;  %vm128_vm6 = vcmp.lt.s32.totalorder %v3457_v14, 18  ;;  %vm103_vm7 = vcmp.lt.s32.totalorder %v3457_v14, 19 }
  0x16   :  { %2714 = vrot.lane.b32.xlu0 %v2708_v3, %s3299_s28  ;;  %2734 = vrot.lane.b32.xlu2 %v2718_v5, %s3299_s28 }
  0x17   :  { %2724 = vrot.lane.b32.xlu1 %v2723_v8, %s3297_s0 }
  0x1e   :  { %2739 = vrot.lane.b32.xlu0 %v2723_v8, %s3299_s28  ;;  %2749 = vrot.lane.b32.xlu2 %v2718_v5, %s3298_s2 }
  0x1f   :  { %2744 = vrot.lane.b32.xlu1 %v2708_v3, %s3300_s29 }
  0x26   :  { %2754 = vrot.lane.b32.xlu0 %v2723_v8, %s3298_s2  ;;  %2764 = vrot.lane.b32.xlu2 %v2723_v8, %s3300_s29 }
  0x27   :  { %2759 = vrot.lane.b32.xlu1 %v2718_v5, %s3300_s29 }
  0x2e   :  { %2769 = vrot.lane.b32.xlu0 %v2768_v9, %s3301_s30  ;;  %2779 = vrot.lane.b32.xlu2 %v2778_v10, %s3301_s30 }
  0x2f   :  { %2774 = vrot.lane.b32.xlu1 %v2768_v9, %s3302_s16 }
  0x36   :  { %176 = vrot.lane.b32.xlu0 %v3412_v7, %s3301_s30  ;;  %2789 = vrot.lane.b32.xlu2 %v2778_v10, %s3302_s16 }
  0x37   :  { %2784 = vrot.lane.b32.xlu1 %v2768_v9, %s3303_s17 }
  0x3e   :  { %151 = vrot.lane.b32.xlu0 %v3412_v7, %s3302_s16  ;;  %2799 = vrot.lane.b32.xlu2 %v2778_v10, %s3303_s17 }
  0x3f   :  { %2794 = vrot.lane.b32.xlu1 %v2768_v9, %s3304_s18 }
  0x46   :  { %126 = vrot.lane.b32.xlu0 %v3412_v7, %s3303_s17  ;;  %99 = vrot.lane.b32.xlu2 %v3412_v7, %s3304_s18 }
  0x47   :  { %2804 = vrot.lane.b32.xlu1 %v2778_v10, %s3304_s18 }
  0x4e   :  { %174 = vrot.lane.b32.xlu0 %v3410_v6, %s3301_s30  ;;  %124 = vrot.lane.b32.xlu2 %v3410_v6, %s3303_s17 }
  0x4f   :  { %149 = vrot.lane.b32.xlu1 %v3410_v6, %s3302_s16 }
  0x56   :  { %97 = vrot.lane.b32.xlu0 %v3410_v6, %s3304_s18 }
  0x68   :  { %v3453_v11 = vpop.permute.xlu2 %2729 }
  0x69   :  { %v2732_v32 = vunpack.i.h.bf16 %v3453_v11  ;;  %v2731_v33 = vunpack.i.l.bf16 %v3453_v11 }
  0x6b   :  { %v237_v43 = vsel %vm234_vm2, %v2731_v33, %v2732_v32 }
  0x70   :  { %v3455_v12 = vpop.permute.xlu2 %2734 }
  0x71   :  { %v2736_v15 = vunpack.i.l.bf16 %v3455_v12  ;;  %v2737_v21 = vunpack.i.h.bf16 %v3455_v12 }
  0x73   :  { %v264_v29 = vsel %vm259_vm1, %v2736_v15, %v2737_v21 }
  0x78   :  { %v3463_v20 = vpop.permute.xlu2 %2749 }
  0x79   :  { %v2751_v24 = vunpack.i.l.bf16 %v3463_v20  ;;  %v2752_v26 = vunpack.i.h.bf16 %v3463_v20 }
  0x7b   :  { %v239_v30 = vsel %vm234_vm2, %v2751_v24, %v2752_v26  ;;  %v238_v42 = vsel %vm234_vm2, %v2752_v26, %v2731_v33 }
  0x80   :  { %v2710_v16 = vpop.permute.xlu0 %2709  ;;  %v3492_v37 = vpop.permute.xlu2 %2764 }
  0x81   :  { %v2712_v17 = vunpack.i.h.bf16 %v2710_v16  ;;  %v2711_v18 = vunpack.i.l.bf16 %v2710_v16  ;;  %v3461_v19 = vpop.permute.xlu1 %2719  ;;  %v2766_v53 = vunpack.i.l.bf16 %v3492_v37 }
  0x82   :  { %v2722_v22 = vunpack.i.h.bf16 %v3461_v19  ;;  %v2721_v23 = vunpack.i.l.bf16 %v3461_v19 }
  0x83   :  { %v287_v25 = vsel %vm284_vm0, %v2711_v18, %v2712_v17 }
  0x84   :  { %v289_v27 = vsel %vm284_vm0, %v2721_v23, %v2722_v22  ;;  %v288_v28 = vsel %vm284_vm0, %v2722_v22, %v2711_v18  ;;  %403 = vmatpush.msra.mxu2 %v287_v25 }
  0x85   :  { %363 = vmatpush.msra.mxu0 %v289_v27  ;;  %383 = vmatpush.msra.mxu1 %v288_v28 }
  0x87   :  { %364 = vmatpush.msra.mxu0 %v264_v29 }
  0x88   :  { %v2715_v31 = vpop.permute.xlu0 %2714  ;;  %v3511_v49 = vpop.permute.xlu2 %2779 }
  0x89   :  { %v2717_v34 = vunpack.i.h.bf16 %v2715_v31  ;;  %v2716_v35 = vunpack.i.l.bf16 %v2715_v31  ;;  %v3490_v36 = vpop.permute.xlu1 %2724  ;;  %365 = vmatpush.msra.mxu0 %v239_v30  ;;  %v2782_v63 = vunpack.i.h.bf16 %v3511_v49 }
  0x8a   :  { %v2726_v38 = vunpack.i.l.bf16 %v3490_v36 }
  0x8b   :  { %v262_v39 = vsel %vm259_vm1, %v2716_v35, %v2717_v34  ;;  %v263_v40 = vsel %vm259_vm1, %v2737_v21, %v2716_v35 }
  0x8c   :  { %404 = vmatpush.msra.mxu2 %v262_v39  ;;  %384 = vmatpush.msra.mxu1 %v263_v40  ;;  %v286_v41 = vsel %vm284_vm0, %v2712_v17, %v2726_v38 }
  0x8d   :  { %423 = vmatpush.msra.mxu3 %v286_v41 }
  0x8e   :  { %385 = vmatpush.msra.mxu1 %v238_v42  ;;  %405 = vmatpush.msra.mxu2 %v237_v43  ;;  %v3593_v43 = vld [vmem:[%s4900_s3] sm:$0xff] }
  0x90   :  { %v3507_v44 = vpop.permute.xlu0 %2739  ;;  %v3538_v61 = vpop.permute.xlu2 %2789 }
  0x91   :  { %v2741_v45 = vunpack.i.l.bf16 %v3507_v44  ;;  %v2745_v46 = vpop.permute.xlu1 %2744  ;;  %v2791_v5 = vunpack.i.l.bf16 %v3538_v61  ;;  %v2792_v11 = vunpack.i.h.bf16 %v3538_v61  ;;  %v3686_v61 = vld [vmem:[%s4898_s1 + $0x1] ss:$2 sm:$0x3f] }
  0x92   :  { %v2747_v47 = vunpack.i.h.bf16 %v2745_v46  ;;  %v2746_v48 = vunpack.i.l.bf16 %v2745_v46 }
  0x93   :  { %v261_v50 = vsel %vm259_vm1, %v2717_v34, %v2741_v45 }
  0x94   :  { %v212_v51 = vsel %vm209_vm3, %v2746_v48, %v2747_v47  ;;  %424 = vmatpush.msra.mxu3 %v261_v50  ;;  %v211_v62 = vsel %vm209_vm3, %v2747_v47, %v2766_v53 }
  0x95   :  { %406 = vmatpush.msra.mxu2 %v212_v51 }
  0x97   :  { %407 = vmatpush.msra.mxu2 %v3395_v0  ;;  %v2781_v0 = vunpack.i.l.bf16 %v3511_v49 }
  0x98   :  { %v3520_v52 = vpop.permute.xlu0 %2754  ;;  %v3569_v22 = vpop.permute.xlu2 %2799 }
  0x99   :  { %v2756_v54 = vunpack.i.l.bf16 %v3520_v52  ;;  %v3524_v55 = vpop.permute.xlu1 %2759  ;;  %v2802_v25 = vunpack.i.h.bf16 %v3569_v22  ;;  %v2801_v26 = vunpack.i.l.bf16 %v3569_v22 }
  0x9a   :  { %v2762_v56 = vunpack.i.h.bf16 %v3524_v55  ;;  %v2761_v57 = vunpack.i.l.bf16 %v3524_v55 }
  0x9b   :  { %v236_v58 = vsel %vm234_vm2, %v2732_v32, %v2756_v54 }
  0x9c   :  { %v214_v59 = vsel %vm209_vm3, %v2761_v57, %v2762_v56  ;;  %v213_v60 = vsel %vm209_vm3, %v2762_v56, %v2746_v48  ;;  %425 = vmatpush.msra.mxu3 %v236_v58  ;;  %v2727_v48 = vunpack.i.h.bf16 %v3490_v36  ;;  %v2767_v36 = vunpack.i.h.bf16 %v3492_v37 }
  0x9d   :  { %366 = vmatpush.msra.mxu0 %v214_v59  ;;  %386 = vmatpush.msra.mxu1 %v213_v60  ;;  %v2742_v59 = vunpack.i.h.bf16 %v3507_v44 }
  0x9e   :  { %426 = vmatpush.msra.mxu3 %v211_v62  ;;  %v215_v44 = vsel %vm209_vm3, %v2767_v36, %v2761_v57  ;;  %v3681_v57 = vld [vmem:[%s4898_s1] ss:$2 sm:$0x3f] }
  0x9f   :  { %387 = vmatpush.msra.mxu1 %v3403_v4  ;;  %367 = vmatpush.msra.mxu0 %v3399_v2  ;;  %v265_v19 = vsel %vm259_vm1, %v2742_v59, %v2736_v15  ;;  %v210_v15 = vsel %vm209_vm3, %v2766_v53, %v2767_v36 }
  0xa0   :  { %v2770_v3 = vpop.permute.xlu0 %2769  ;;  %427 = vmatpush.msra.mxu3 %v3397_v1  ;;  %v100_v60 = vpop.permute.xlu2 %99 }
  0xa1   :  { %v2772_v8 = vunpack.i.h.bf16 %v2770_v3  ;;  %v2771_v9 = vunpack.i.l.bf16 %v2770_v3  ;;  %v2775_v10 = vpop.permute.xlu1 %2774 }
  0xa2   :  { %v2777_v13 = vunpack.i.h.bf16 %v2775_v10  ;;  %v2776_v16 = vunpack.i.l.bf16 %v2775_v10  ;;  %v260_v10 = vsel %vm259_vm1, %v2741_v45, %v2742_v59  ;;  %v3746_v59 = vperm.slane %v3681_v57, 5 }
  0xa3   :  { %v183_v4 = vsel %vm178_vm4, %v2781_v0, %v2771_v9  ;;  %v182_v2 = vsel %vm178_vm4, %v2771_v9, %v2772_v8  ;;  %v181_v1 = vsel %vm178_vm4, %v2772_v8, %v2782_v63  ;;  %v285_v8 = vsel %vm284_vm0, %v2726_v38, %v2727_v48 }
  0xa4   :  { %388 = vmatpush.msra.mxu1 %v183_v4  ;;  %408 = vmatpush.msra.mxu2 %v182_v2  ;;  %v158_v17 = vsel %vm153_vm5, %v2791_v5, %v2776_v16  ;;  %v157_v18 = vsel %vm153_vm5, %v2776_v16, %v2777_v13  ;;  %v156_v21 = vsel %vm153_vm5, %v2777_v13, %v2792_v11  ;;  %v3695_v13 = vperm.slane %v3686_v61, 0 }
  0xa5   :  { %428 = vmatpush.msra.mxu3 %v181_v1  ;;  %v290_v9 = vsel %vm284_vm0, %v2727_v48, %v2721_v23  ;;  %v3700_v4 = vperm.slane %v3686_v61, 1  ;;  %v3305_v1 = vmov 0  }
  0xa6   :  { %389 = vmatpush.msra.mxu1 %v158_v17  ;;  %409 = vmatpush.msra.mxu2 %v157_v18 }
  0xa7   :  { %429 = vmatpush.msra.mxu3 %v156_v21  ;;  %2808 = vset.pattern.permute.xlu1 %v3305_v1  ;;  %v3709_v21 = vperm.slane %v3681_v57, 2 }
  0xa8   :  { %v3573_v27 = vpop.permute.xlu0 %176  ;;  %2809 = vset.pattern.permute.xlu2 %v3305_v1  ;;  %2930 = vset.pattern.permute.xlu0 %v3305_v1 }
  0xa9   :  { %v2785_v28 = vpop.permute.xlu1 %2784  ;;  %v184_v29 = vsel %vm178_vm4, %v3573_v27, %v2781_v0 }
  0xaa   :  { %v2787_v30 = vunpack.i.h.bf16 %v2785_v28  ;;  %v2786_v31 = vunpack.i.l.bf16 %v2785_v28  ;;  %368 = vmatpush.msra.mxu0 %v184_v29 }
  0xac   :  { %v133_v32 = vsel %vm128_vm6, %v2801_v26, %v2786_v31  ;;  %v132_v33 = vsel %vm128_vm6, %v2786_v31, %v2787_v30  ;;  %v131_v34 = vsel %vm128_vm6, %v2787_v30, %v2802_v25  ;;  %v3723_v31 = vperm.slane %v3681_v57, 3 }
  0xad   :  { %390 = vmatpush.msra.mxu1 %v133_v32  ;;  %410 = vmatpush.msra.mxu2 %v132_v33 }
  0xae   :  { %430 = vmatpush.msra.mxu3 %v131_v34 }
  0xb0   :  { %v152_v35 = vpop.permute.xlu0 %151 }
  0xb1   :  { %v2795_v39 = vpop.permute.xlu1 %2794  ;;  %v159_v40 = vsel %vm153_vm5, %v152_v35, %v2791_v5  ;;  %v2757_v5 = vunpack.i.h.bf16 %v3520_v52 }
  0xb2   :  { %v2797_v41 = vunpack.i.h.bf16 %v2795_v39  ;;  %v2796_v42 = vunpack.i.l.bf16 %v2795_v39  ;;  %369 = vmatpush.msra.mxu0 %v159_v40  ;;  %v3730_v39 = vperm.slane %v3686_v61, 3 }
  0xb3   :  { %v235_v23 = vsel %vm234_vm2, %v2756_v54, %v2757_v5  ;;  %v240_v12 = vsel %vm234_vm2, %v2757_v5, %v2751_v24  ;;  %v125_v24 = vpop.permute.xlu2 %124 }
  0xb4   :  { %v107_v46 = vsel %vm103_vm7, %v2796_v42, %v2797_v41  ;;  %v130_v49 = vsel %vm128_vm6, %v2802_v25, %v125_v24 }
  0xb5   :  { %411 = vmatpush.msra.mxu2 %v107_v46 }
  0xb6   :  { %2640 = vmatmul.msk.f32.vlgmr.msra.gmra.mxu2 %vm352_vm8, %v3593_v43 }
  0xb8   :  { %v127_v47 = vpop.permute.xlu0 %126 }
  0xb9   :  { %v2805_v50 = vpop.permute.xlu1 %2804  ;;  %v134_v51 = vsel %vm128_vm6, %v127_v47, %v2801_v26  ;;  %v129_v53 = vsel %vm128_vm6, %v125_v24, %v127_v47  ;;  %v3735_v47 = vperm.slane %v3681_v57, 4 }
  0xba   :  { %v2807_v56 = vunpack.i.h.bf16 %v2805_v50  ;;  %v2806_v58 = vunpack.i.l.bf16 %v2805_v50  ;;  %370 = vmatpush.msra.mxu0 %v134_v51 }
  0xbc   :  { %v109_v62 = vsel %vm103_vm7, %v100_v60, %v2806_v58  ;;  %v108_v0 = vsel %vm103_vm7, %v2806_v58, %v2796_v42  ;;  %v106_v3 = vsel %vm103_vm7, %v2797_v41, %v2807_v56  ;;  %v3743_v58 = vperm.slane %v3686_v61, 5 }
  0xbd   :  { %371 = vmatpush.msra.mxu0 %v109_v62  ;;  %391 = vmatpush.msra.mxu1 %v108_v0 }
  0xbe   :  { %431 = vmatpush.msra.mxu3 %v106_v3  ;;  %2639 = vmatmul.msk.f32.vlgmr.msra.gmra.mxu1 %vm352_vm8, %v3593_v43 }
  0xbf   :  { %443 = vmatpush.msrb.mxu0 %v285_v8  ;;  %463 = vmatpush.msrb.mxu1 %v290_v9 }
  0xc0   :  { %2641 = vmatmul.msk.f32.vlgmr.msra.gmra.mxu3 %vm352_vm8, %v3593_v43  ;;  %v175_v38 = vpop.permute.xlu0 %174  ;;  %2638 = vmatmul.msk.f32.vlgmr.msra.gmra.mxu0 %vm352_vm8, %v3593_v43 }
  0xc1   :  { %444 = vmatpush.msrb.mxu0 %v260_v10  ;;  %464 = vmatpush.msrb.mxu1 %v265_v19  ;;  %v150_v45 = vpop.permute.xlu1 %149  ;;  %v180_v20 = vsel %vm178_vm4, %v2782_v63, %v175_v38  ;;  %v179_v37 = vsel %vm178_vm4, %v175_v38, %v3573_v27  ;;  %v3689_v63 = vperm.slane %v3681_v57, 0  ;;  %v3718_v27 = vperm.slane %v3686_v61, 2 }
  0xc2   :  { %v155_v52 = vsel %vm153_vm5, %v2792_v11, %v150_v45  ;;  %v3692_v11 = vperm.slane %v3681_v57, 1 }
  0xc3   :  { %445 = vmatpush.msrb.mxu0 %v235_v23  ;;  %465 = vmatpush.msrb.mxu1 %v240_v12 }
  0xc5   :  { %446 = vmatpush.msrb.mxu0 %v210_v15  ;;  %466 = vmatpush.msrb.mxu1 %v215_v44 }
  0xc7   :  { %447 = vmatpush.msrb.mxu0 %v3410_v6  ;;  %467 = vmatpush.msrb.mxu1 %v3412_v7  ;;  %v154_v7 = vsel %vm153_vm5, %v150_v45, %v152_v35 }
  0xc8   :  { %v98_v6 = vpop.permute.xlu0 %97 }
  0xc9   :  { %448 = vmatpush.msrb.mxu0 %v180_v20  ;;  %468 = vmatpush.msrb.mxu1 %v179_v37  ;;  %v105_v54 = vsel %vm103_vm7, %v2807_v56, %v98_v6  ;;  %v104_v55 = vsel %vm103_vm7, %v98_v6, %v100_v60  ;;  %v3740_v56 = vperm.slane %v3686_v61, 4 }
  0xcb   :  { %449 = vmatpush.msrb.mxu0 %v155_v52  ;;  %469 = vmatpush.msrb.mxu1 %v154_v7 }
  0xcd   :  { %450 = vmatpush.msrb.mxu0 %v130_v49  ;;  %470 = vmatpush.msrb.mxu1 %v129_v53 }
  0xcf   :  { %451 = vmatpush.msrb.mxu0 %v105_v54  ;;  %471 = vmatpush.msrb.mxu1 %v104_v55 }
  0xd0   :  { %2642 = vmatmul.msk.f32.vlgmr.msrb.gmra.mxu0 %vm352_vm8, %v3593_v43  ;;  %2643 = vmatmul.msk.f32.vlgmr.msrb.gmra.mxu1 %vm352_vm8, %v3593_v43 }
 0x139   :  { %v3711_v22 = vpop.f32.mrf.mxu2 }
 0x13a   :  { %v491_v30 = vmul.f32 %v3709_v21, %v3711_v22  ;;  %v574_v35 = vmul.f32 %v3718_v27, %v3711_v22 }
 0x13b   :  { %v3697_v16 = vpop.f32.mrf.mxu1 }
 0x13c   :  { %v490_v18 = vmul.f32 %v3692_v11, %v3697_v16  ;;  %v573_v26 = vmul.f32 %v3700_v4, %v3697_v16  ;;  %v520_v41 = vmul.f32 %v491_v30, %v491_v30  ;;  %v596_v3 = vmul.f32 %v574_v35, %v574_v35 }
 0x13d   :  { %v3702_v2 = vpop.f32.mrf.mxu0 }
 0x13e   :  { %v489_v17 = vmul.f32 %v3689_v63, %v3702_v2  ;;  %v572_v25 = vmul.f32 %v3695_v13, %v3702_v2  ;;  %v519_v29 = vmul.f32 %v490_v18, %v490_v18  ;;  %v595_v46 = vmul.f32 %v573_v26, %v573_v26 }
 0x140   :  { %v518_v28 = vmul.f32 %v489_v17, %v489_v17  ;;  %v495_v33 = vadd.f32 %v490_v18, %v489_v17  ;;  %v578_v34 = vadd.f32 %v573_v26, %v572_v25  ;;  %v594_v43 = vmul.f32 %v572_v25, %v572_v25  ;;  %v673_v18 = vld [vmem:[%s4901_s4] sm:$0xff] }
 0x141   :  { %v685_v25 = vld [vmem:[%s4902_s5] sm:$0xff] }
 0x142   :  { %v524_v40 = vadd.f32 %v519_v29, %v518_v28  ;;  %v496_v48 = vadd.f32 %v495_v33, %v491_v30  ;;  %v579_v50 = vadd.f32 %v578_v34, %v574_v35  ;;  %v600_v0 = vadd.f32 %v595_v46, %v594_v43 }
 0x143   :  { %v3725_v32 = vpop.f32.mrf.mxu3 }
 0x144   :  { %v492_v42 = vmul.f32 %v3723_v31, %v3725_v32  ;;  %v575_v51 = vmul.f32 %v3730_v39, %v3725_v32  ;;  %v525_v62 = vadd.f32 %v524_v40, %v520_v41  ;;  %v601_v24 = vadd.f32 %v600_v0, %v596_v3 }
 0x146   :  { %v521_v60 = vmul.f32 %v492_v42, %v492_v42  ;;  %v580_v36 = vadd.f32 %v579_v50, %v575_v51  ;;  %v497_v19 = vadd.f32 %v496_v48, %v492_v42  ;;  %v597_v37 = vmul.f32 %v575_v51, %v575_v51 }
 0x148   :  { %v526_v45 = vadd.f32 %v525_v62, %v521_v60  ;;  %v602_v54 = vadd.f32 %v601_v24, %v597_v37 }
 0x14d   :  { %v3748_v5 = vpop.f32.mrf.mxu0  ;;  %v3754_v10 = vpop.f32.mrf.mxu1 }
 0x14e   :  { %v493_v8 = vmul.f32 %v3735_v47, %v3748_v5  ;;  %v576_v9 = vmul.f32 %v3740_v56, %v3748_v5  ;;  %v577_v38 = vmul.f32 %v3743_v58, %v3754_v10  ;;  %v494_v23 = vmul.f32 %v3746_v59, %v3754_v10 }
 0x150   :  { %v581_v12 = vadd.f32 %v580_v36, %v576_v9  ;;  %v498_v15 = vadd.f32 %v497_v19, %v493_v8  ;;  %v522_v44 = vmul.f32 %v493_v8, %v493_v8  ;;  %v523_v20 = vmul.f32 %v494_v23, %v494_v23 }
 0x151   :  { %v598_v53 = vmul.f32 %v576_v9, %v576_v9  ;;  %v599_v55 = vmul.f32 %v577_v38, %v577_v38 }
 0x152   :  { %v582_v52 = vadd.f32 %v581_v12, %v577_v38  ;;  %v499_v6 = vadd.f32 %v498_v15, %v494_v23  ;;  %v527_v7 = vadd.f32 %v526_v45, %v522_v44  ;;  %v3306_v45 = vmov 2048.0  }
 0x153   :  { %v603_v1 = vadd.f32 %v602_v54, %v598_v53  ;;  %3151 = vrcp.f32 %v3306_v45 }
 0x154   :  { %583 = vadd.xlane.f32.xlu0 %v582_v52  ;;  %500 = vadd.xlane.f32.xlu1 %v499_v6  ;;  %v528_v49 = vadd.f32 %v527_v7, %v523_v20 }
 0x155   :  { %v604_v17 = vadd.f32 %v603_v1, %v599_v55 }
 0x156   :  { %529 = vadd.xlane.f32.xlu2 %v528_v49 }
 0x159   :  { %v3152_v20 = vpop.eup %3151 }
 0x15a   :  { %v511_v24 = vmul.f32 2048.0, %v3152_v20  ;;  %vm515_vm9 = vweird.f32 %v3152_v20 }
 0x15c   :  { %v512_v37 = vsub.f32 1.0, %v511_v24 }
 0x15e   :  { %605 = vadd.xlane.f32.xlu2 %v604_v17  ;;  %v513_v52 = vmul.f32 %v3152_v20, %v512_v37 }
 0x160   :  { %v514_v6 = vadd.f32 %v3152_v20, %v513_v52 }
 0x162   :  { %v3766_v7 = vsel %vm515_vm9, %v3152_v20, %v514_v6 }
 0x16d   :  { %676 = vperm.xlu1 %2808, %v673_v18  }
 0x176   :  { %688 = vperm.xlu2 %2809, %v685_v25  }
 0x1c7   :  { %v584_v26 = vpop.xlane.xlu0 %583  ;;  %v501_v28 = vpop.xlane.xlu1 %500 }
 0x1c8   :  { %v585_v29 = vrot.slane %v584_v26, 4  ;;  %v502_v30 = vrot.slane %v501_v28, 4 }
 0x1c9   :  { %v530_v33 = vpop.xlane.xlu2 %529 }
 0x1ca   :  { %v586_v34 = vadd.f32 %v585_v29, %v584_v26  ;;  %v503_v35 = vadd.f32 %v502_v30, %v501_v28  ;;  %v531_v40 = vrot.slane %v530_v33, 4 }
 0x1cc   :  { %v587_v41 = vrot.slane %v586_v34, 2  ;;  %v504_v42 = vrot.slane %v503_v35, 2  ;;  %v532_v43 = vadd.f32 %v531_v40, %v530_v33 }
 0x1ce   :  { %v533_v46 = vrot.slane %v532_v43, 2  ;;  %v505_v48 = vadd.f32 %v504_v42, %v503_v35  ;;  %v588_v50 = vadd.f32 %v587_v41, %v586_v34 }
 0x1d0   :  { %v506_v51 = vrot.slane %v505_v48, 1  ;;  %v534_v60 = vadd.f32 %v533_v46, %v532_v43  ;;  %v589_v0 = vrot.slane %v588_v50, 1 }
 0x1d1   :  { %v606_v62 = vpop.xlane.xlu2 %605 }
 0x1d2   :  { %v607_v3 = vrot.slane %v606_v62, 4  ;;  %v507_v8 = vadd.f32 %v506_v51, %v505_v48  ;;  %v535_v9 = vrot.slane %v534_v60, 1  ;;  %v590_v38 = vadd.f32 %v589_v0, %v588_v50 }
 0x1d4   :  { %v608_v36 = vadd.f32 %v607_v3, %v606_v62  ;;  %2662 = vpush %v507_v8  ;;  %v536_v19 = vadd.f32 %v535_v9, %v534_v60 }
 0x1d6   :  { %v609_v23 = vrot.slane %v608_v36, 2  ;;  %2664 = vpush %v536_v19 }
 0x1d7   :  { %2666 = vpush %v590_v38 }
 0x1d8   :  { %v610_v12 = vadd.f32 %v609_v23, %v608_v36 }
 0x1da   :  { %v611_v15 = vrot.slane %v610_v12, 1 }
 0x1dc   :  { %v612_v44 = vadd.f32 %v611_v15, %v610_v12 }
 0x1de   :  { %2668 = vpush %v612_v44 }
 0x205   :  { %s2663_s4 = spop %2662 }
 0x206   :  { %v509_v49 = vstv %s2663_s4 }
 0x207   :  { %v517_v53 = vmul.f32 %v3766_v7, %v509_v49  ;;  %s2665_s5 = spop %2664 }
 0x208   :  { %v538_v54 = vstv %s2665_s5  ;;  %s2667_s19 = spop %2666  ;;  %s2626_s5 = sshll.u32 %s4912_s15, 4  ;;  %s2627_s5 = int_to_ptr.hbm [resolvable:$true] %s2626_s5 }
 0x209   :  { %v540_v55 = vmul.f32 %v517_v53, %v517_v53  ;;  %v539_v1 = vmul.f32 %v538_v54, %v3766_v7  ;;  %v592_v17 = vstv %s2667_s19 }
 0x20a   :  { %v593_v26 = vmul.f32 %v592_v17, %v3766_v7 }
 0x20b   :  { %v541_v18 = vsub.f32 %v539_v1, %v540_v55  ;;  %v82_v55 = vadd.f32 %v3686_v61, %v3681_v57 }
 0x20c   :  { %v616_v30 = vmul.f32 %v593_v26, %v593_v26 }
 0x20d   :  { %v542_v25 = vmax.f32 %v541_v18, 0.0 }
 0x20f   :  { %v543_v28 = vadd.f32 1e-05, %v542_v25  ;;  %s2669_s20 = spop %2668 }
 0x210   :  { %v614_v29 = vstv %s2669_s20 }
 0x211   :  { %3153 = vrsqrt.f32 %v543_v28  ;;  %v615_v33 = vmul.f32 %v614_v29, %v3766_v7  ;;  %vm550_vm11 = vweird.f32 %v543_v28 }
 0x213   :  { %v617_v34 = vsub.f32 %v615_v33, %v616_v30 }
 0x215   :  { %v618_v35 = vmax.f32 %v617_v34, 0.0 }
 0x217   :  { %v3154_v40 = vpop.eup %3153  ;;  %v619_v41 = vadd.f32 1e-05, %v618_v35 }
 0x218   :  { %v545_v42 = vmul.f32 %v3154_v40, %v543_v28  ;;  %vm551_vm10 = vweird.f32 %v3154_v40 }
 0x219   :  { %3155 = vrsqrt.f32 %v619_v41  ;;  %vm552_vm12 = vmor %vm550_vm11, %vm551_vm10  ;;  %vm626_vm14 = vweird.f32 %v619_v41 }
 0x21a   :  { %v546_v43 = vmul.f32 %v3154_v40, %v545_v42 }
 0x21c   :  { %v547_v46 = vmul.f32 0.5, %v546_v43 }
 0x21e   :  { %v548_v48 = vsub.f32 1.5, %v547_v46  ;;  %v689_v46 = vpop.permute.xlu2 %688 }
 0x21f   :  { %v3156_v50 = vpop.eup %3155 }
 0x220   :  { %v549_v51 = vmul.f32 %v3154_v40, %v548_v48  ;;  %v621_v60 = vmul.f32 %v3156_v50, %v619_v41  ;;  %vm627_vm13 = vweird.f32 %v3156_v50  ;;  %v677_v41 = vpop.permute.xlu1 %676 }
 0x221   :  { %vm628_vm15 = vmor %vm626_vm14, %vm627_vm13 }
 0x222   :  { %v553_v62 = vsel %vm552_vm12, %v3154_v40, %v549_v51  ;;  %v622_v0 = vmul.f32 %v3156_v50, %v621_v60 }
 0x223   :  { %v556_v8 = vmul.f32 %v553_v62, %v517_v53  ;;  %v554_v23 = vmul.f32 %v553_v62, %v3681_v57 }
 0x224   :  { %v623_v3 = vmul.f32 0.5, %v622_v0  ;;  %v3792_v0 = vperm.slane %v82_v55, 5 }
 0x225   :  { %v557_v19 = vmul.f32 %v556_v8, %v3681_v57 }
 0x226   :  { %v624_v9 = vsub.f32 1.5, %v623_v3 }
 0x227   :  { %v558_v44 = vsub.f32 0.0, %v557_v19 }
 0x228   :  { %v625_v36 = vmul.f32 %v3156_v50, %v624_v9 }
 0x22a   :  { %v629_v38 = vsel %vm628_vm15, %v3156_v50, %v625_v36  ;;  %v3790_v50 = vperm.slane %v82_v55, 4 }
 0x22b   :  { %v630_v12 = vmul.f32 %v3686_v61, %v629_v38  ;;  %v632_v15 = vmul.f32 %v629_v38, %v593_v26 }
 0x22d   :  { %v631_v45 = vadd.f32 %v630_v12, %v554_v23  ;;  %v633_v20 = vmul.f32 %v3686_v61, %v632_v15 }
 0x22f   :  { %v634_v24 = vsub.f32 %v558_v44, %v633_v20  ;;  %v636_v37 = vperm.slane %v631_v45, 0  ;;  %v637_v52 = vperm.slane %v631_v45, 1  ;;  %v638_v6 = vperm.slane %v631_v45, 2 }
 0x230   :  { %v639_v49 = vperm.slane %v631_v45, 3  ;;  %v640_v53 = vperm.slane %v631_v45, 4  ;;  %v641_v54 = vperm.slane %v631_v45, 5 }
 0x231   :  { %v648_v1 = vmul.f32 %v636_v37, %v3702_v2  ;;  %v649_v17 = vmul.f32 %v637_v52, %v3697_v16  ;;  %v650_v18 = vmul.f32 %v638_v6, %v3711_v22  ;;  %v655_v25 = vperm.slane %v634_v24, 0 }
 0x232   :  { %v651_v26 = vmul.f32 %v639_v49, %v3725_v32  ;;  %v652_v28 = vmul.f32 %v640_v53, %v3748_v5  ;;  %v653_v29 = vmul.f32 %v641_v54, %v3754_v10  ;;  %v656_v30 = vperm.slane %v634_v24, 1 }
 0x233   :  { %v657_v33 = vperm.slane %v634_v24, 2  ;;  %v658_v34 = vperm.slane %v634_v24, 3  ;;  %v659_v35 = vperm.slane %v634_v24, 4  ;;  %v660_v40 = vperm.slane %v634_v24, 5 }
 0x234   :  { %v667_v57 = vadd.f32 %v655_v25, %v648_v1  ;;  %v668_v61 = vadd.f32 %v656_v30, %v649_v17  ;;  %v3784_v2 = vperm.slane %v82_v55, 0  ;;  %v3786_v16 = vperm.slane %v82_v55, 1 }
 0x235   :  { %v669_v22 = vadd.f32 %v657_v33, %v650_v18  ;;  %v670_v42 = vadd.f32 %v658_v34, %v651_v26  ;;  %v671_v43 = vadd.f32 %v659_v35, %v652_v28  ;;  %v672_v32 = vadd.f32 %v660_v40, %v653_v29 }
 0x236   :  { %v679_v5 = vmul.f32 %v677_v41, %v667_v57  ;;  %v680_v48 = vmul.f32 %v677_v41, %v668_v61  ;;  %v3788_v10 = vperm.slane %v82_v55, 2  ;;  %v3801_v52 = vperm.slane %v82_v55, 3 }
 0x237   :  { %v681_v51 = vmul.f32 %v677_v41, %v669_v22  ;;  %v683_v60 = vmul.f32 %v677_v41, %v671_v43  ;;  %v684_v62 = vmul.f32 %v677_v41, %v672_v32  ;;  %v682_v9 = vmul.f32 %v677_v41, %v670_v42 }
 0x238   :  { %v691_v3 = vadd.f32 %v689_v46, %v679_v5  ;;  %v692_v8 = vadd.f32 %v689_v46, %v680_v48 }
 0x239   :  { %v693_v36 = vadd.f32 %v689_v46, %v681_v51  ;;  %v695_v19 = vadd.f32 %v689_v46, %v683_v60  ;;  %v696_v38 = vadd.f32 %v689_v46, %v684_v62  ;;  %v694_v37 = vadd.f32 %v689_v46, %v682_v9 }
 0x23a   :  { %v710_v23 = vmul.f32 %v3784_v2, %v691_v3  ;;  %v711_v12 = vmul.f32 %v3786_v16, %v692_v8 }
 0x23b   :  { %v712_v15 = vmul.f32 %v3788_v10, %v693_v36  ;;  %v714_v44 = vmul.f32 %v3790_v50, %v695_v19  ;;  %v3799_v45 = vmul.f32 %v3792_v0, %v696_v38  ;;  %v713_v26 = vmul.f32 %v3801_v52, %v694_v37 }
 0x23c   :  { %v722_v20 = vmul.f32 0.044715, %v710_v23  ;;  %v723_v24 = vmul.f32 0.044715, %v711_v12  ;;  %v716_v51 = vmul.f32 0.5, %v710_v23  ;;  %v717_v8 = vmul.f32 0.5, %v711_v12 }
 0x23d   :  { %v724_v6 = vmul.f32 0.044715, %v712_v15  ;;  %v726_v49 = vmul.f32 0.044715, %v714_v44  ;;  %v727_v54 = vmul.f32 0.044715, %v3799_v45 }
 0x23e   :  { %v728_v53 = vmul.f32 %v722_v20, %v710_v23  ;;  %v729_v1 = vmul.f32 %v723_v24, %v711_v12  ;;  %v725_v57 = vmul.f32 0.044715, %v713_v26 }
 0x23f   :  { %v730_v17 = vmul.f32 %v724_v6, %v712_v15  ;;  %v732_v18 = vmul.f32 %v726_v49, %v714_v44  ;;  %v733_v28 = vmul.f32 %v727_v54, %v3799_v45 }
 0x240   :  { %v734_v25 = vmul.f32 %v728_v53, %v710_v23  ;;  %v735_v29 = vmul.f32 %v729_v1, %v711_v12  ;;  %v731_v32 = vmul.f32 %v725_v57, %v713_v26  ;;  %v718_v53 = vmul.f32 0.5, %v712_v15 }
 0x241   :  { %v736_v30 = vmul.f32 %v730_v17, %v712_v15  ;;  %v738_v33 = vmul.f32 %v732_v18, %v714_v44  ;;  %v739_v61 = vmul.f32 %v733_v28, %v3799_v45 }
 0x242   :  { %v740_v34 = vadd.f32 %v734_v25, %v710_v23  ;;  %v741_v35 = vadd.f32 %v735_v29, %v711_v12  ;;  %v737_v60 = vmul.f32 %v731_v32, %v713_v26  ;;  %v720_v23 = vmul.f32 0.5, %v714_v44 }
 0x243   :  { %v742_v55 = vadd.f32 %v736_v30, %v712_v15  ;;  %v744_v40 = vadd.f32 %v738_v33, %v714_v44  ;;  %v745_v46 = vadd.f32 %v739_v61, %v3799_v45  ;;  %v721_v15 = vmul.f32 0.5, %v3799_v45 }
 0x244   :  { %v746_v41 = vmul.f32 0.7978846, %v740_v34  ;;  %v747_v22 = vmul.f32 0.7978846, %v741_v35  ;;  %v743_v24 = vadd.f32 %v737_v60, %v713_v26  ;;  %v719_v33 = vmul.f32 0.5, %v713_v26 }
 0x245   :  { %v748_v42 = vmul.f32 0.7978846, %v742_v55  ;;  %v750_v43 = vmul.f32 0.7978846, %v744_v40  ;;  %v751_v62 = vmul.f32 0.7978846, %v745_v46 }
 0x246   :  { %3157 = vtanh.f32 %v746_v41  ;;  %v749_v12 = vmul.f32 0.7978846, %v743_v24 }
 0x247   :  { %3159 = vtanh.f32 %v747_v22 }
 0x248   :  { %3161 = vtanh.f32 %v748_v42 }
 0x249   :  { %3163 = vtanh.f32 %v750_v43 }
 0x24a   :  { %3165 = vtanh.f32 %v751_v62 }
 0x24b   :  { %3167 = vtanh.f32 %v749_v12 }
 0x24c   :  { %v3158_v5 = vpop.eup %3157 }
 0x24d   :  { %v3160_v48 = vpop.eup %3159  ;;  %v758_v3 = vadd.f32 1.0, %v3158_v5 }
 0x24e   :  { %v759_v9 = vadd.f32 1.0, %v3160_v48  ;;  %v3162_v36 = vpop.eup %3161 }
 0x24f   :  { %v3808_v19 = vmul.f32 %v758_v3, %v716_v51  ;;  %v3164_v38 = vpop.eup %3163  ;;  %v760_v37 = vadd.f32 1.0, %v3162_v36 }
 0x250   :  { %v3810_v20 = vmul.f32 %v759_v9, %v717_v8  ;;  %v762_v6 = vadd.f32 1.0, %v3164_v38  ;;  %v3166_v17 = vpop.eup %3165 }
 0x251   :  { %v3817_v54 = vmul.f32 %v760_v37, %v718_v53  ;;  %v763_v18 = vadd.f32 1.0, %v3166_v17  ;;  %v3168_v28 = vpop.eup %3167 }
 0x252   :  { %v2825_v49 = vpack.i.bf16 %v3810_v20, %v3808_v19  ;;  %v3819_v1 = vmul.f32 %v762_v6, %v720_v23  ;;  %v761_v29 = vadd.f32 1.0, %v3168_v28 }
 0x253   :  { %v3827_v44 = vmul.f32 %v763_v18, %v721_v15 }
 0x254   :  { %2826 = vrot.lane.b32.xlu2 %v2825_v49, %s3298_s2  ;;  %2816 = vrot.lane.b32.xlu1 %v2825_v49, %s3299_s28  ;;  %v2840_v25 = vpack.i.bf16 %v3819_v1, %v3817_v54  ;;  %v3834_v45 = vmul.f32 %v761_v29, %v719_v33  ;;  %v2915_v26 = vpack.i.bf16 %v3817_v54, %v3819_v1 }
 0x255   :  { %2811 = vrot.lane.b32.xlu0 %v2825_v49, %s3297_s0  ;;  %v2855_v30 = vpack.i.bf16 %v3827_v44, %v3808_v19 }
 0x256   :  { %v2870_v34 = vpack.i.bf16 %v3834_v45, %v3810_v20  ;;  %v2860_v35 = vpack.i.bf16 %v3834_v45, %v3827_v44 }
 0x25c   :  { %2841 = vrot.lane.b32.xlu2 %v2840_v25, %s3298_s2  ;;  %2831 = vrot.lane.b32.xlu1 %v2840_v25, %s3299_s28 }
 0x25d   :  { %2821 = vrot.lane.b32.xlu0 %v2840_v25, %s3297_s0 }
 0x264   :  { %2856 = vrot.lane.b32.xlu2 %v2855_v30, %s3301_s30  ;;  %2846 = vrot.lane.b32.xlu1 %v2840_v25, %s3300_s29 }
 0x265   :  { %2836 = vrot.lane.b32.xlu0 %v2825_v49, %s3300_s29 }
 0x26c   :  { %2871 = vrot.lane.b32.xlu2 %v2870_v34, %s3301_s30  ;;  %2861 = vrot.lane.b32.xlu1 %v2860_v35, %s3299_s28 }
 0x26d   :  { %2851 = vrot.lane.b32.xlu0 %v2860_v35, %s3297_s0 }
 0x274   :  { %2886 = vrot.lane.b32.xlu2 %v2870_v34, %s3302_s16  ;;  %2876 = vrot.lane.b32.xlu1 %v2860_v35, %s3298_s2 }
 0x275   :  { %2866 = vrot.lane.b32.xlu0 %v2855_v30, %s3302_s16 }
 0x27c   :  { %2901 = vrot.lane.b32.xlu2 %v2870_v34, %s3303_s17  ;;  %2891 = vrot.lane.b32.xlu1 %v2860_v35, %s3300_s29 }
 0x27d   :  { %2881 = vrot.lane.b32.xlu0 %v2855_v30, %s3303_s17 }
 0x284   :  { %2916 = vrot.lane.b32.xlu2 %v2915_v26, %s3302_s16  ;;  %2906 = vrot.lane.b32.xlu1 %v2870_v34, %s3304_s18 }
 0x285   :  { %2896 = vrot.lane.b32.xlu0 %v2855_v30, %s3304_s18 }
 0x28c   :  { %2921 = vrot.lane.b32.xlu1 %v2915_v26, %s3303_s17 }
 0x28d   :  { %2911 = vrot.lane.b32.xlu0 %v2915_v26, %s3301_s30 }
 0x295   :  { %2926 = vrot.lane.b32.xlu0 %v2915_v26, %s3304_s18 }
 0x2ae   :  { %v3857_v55 = vpop.permute.xlu2 %2826 }
 0x2af   :  { %v2829_v32 = vunpack.i.h.bf16 %v3857_v55  ;;  %v2828_v46 = vunpack.i.l.bf16 %v3857_v55 }
 0x2b1   :  { %v912_v62 = vsel %vm234_vm2, %v2828_v46, %v2829_v32 }
 0x2b6   :  { %v3859_v40 = vpop.permute.xlu2 %2841 }
 0x2b7   :  { %v2843_v36 = vunpack.i.l.bf16 %v3859_v40 }
 0x2b9   :  { %v911_v6 = vsel %vm234_vm2, %v2829_v32, %v2843_v36 }
 0x2be   :  { %v3879_v51 = vpop.permute.xlu2 %2856 }
 0x2bf   :  { %v2859_v18 = vunpack.i.h.bf16 %v3879_v51  ;;  %v2858_v25 = vunpack.i.l.bf16 %v3879_v51 }
 0x2c1   :  { %v859_v33 = vsel %vm178_vm4, %v2859_v18, %v2858_v25 }
 0x2c6   :  { %v3861_v41 = vpop.permute.xlu1 %2816  ;;  %v3900_v49 = vpop.permute.xlu2 %2871 }
 0x2c7   :  { %v3863_v57 = vpop.permute.xlu0 %2811  ;;  %v2819_v61 = vunpack.i.h.bf16 %v3861_v41  ;;  %v2818_v22 = vunpack.i.l.bf16 %v3861_v41  ;;  %v2873_v15 = vunpack.i.l.bf16 %v3900_v49 }
 0x2c8   :  { %v2814_v42 = vunpack.i.h.bf16 %v3863_v57  ;;  %v2813_v43 = vunpack.i.l.bf16 %v3863_v57 }
 0x2c9   :  { %v936_v48 = vsel %vm259_vm1, %v2818_v22, %v2819_v61  ;;  %v858_v34 = vsel %vm178_vm4, %v2858_v25, %v2873_v15 }
 0x2ca   :  { %v960_v5 = vsel %vm284_vm0, %v2813_v43, %v2814_v42 }
 0x2cb   :  { %1033 = vmatpush.msrb.mxu2 %v960_v5 }
 0x2cd   :  { %1034 = vmatpush.msrb.mxu2 %v936_v48 }
 0x2ce   :  { %v3881_v60 = vpop.permute.xlu1 %2831  ;;  %v3938_v5 = vpop.permute.xlu2 %2886 }
 0x2cf   :  { %v3887_v3 = vpop.permute.xlu0 %2821  ;;  %1035 = vmatpush.msrb.mxu2 %v912_v62  ;;  %v2833_v8 = vunpack.i.l.bf16 %v3881_v60  ;;  %v2889_v55 = vunpack.i.h.bf16 %v3938_v5 }
 0x2d0   :  { %v2823_v9 = vunpack.i.l.bf16 %v3887_v3 }
 0x2d1   :  { %v935_v24 = vsel %vm259_vm1, %v2819_v61, %v2833_v8  ;;  %v2834_v61 = vunpack.i.h.bf16 %v3881_v60 }
 0x2d2   :  { %v959_v38 = vsel %vm284_vm0, %v2814_v42, %v2823_v9 }
 0x2d3   :  { %1053 = vmatpush.msrb.mxu3 %v959_v38 }
 0x2d5   :  { %1054 = vmatpush.msrb.mxu3 %v935_v24 }
 0x2d6   :  { %v3896_v37 = vpop.permute.xlu1 %2846 }
 0x2d7   :  { %v2848_v53 = vunpack.i.l.bf16 %v3896_v37  ;;  %v3903_v23 = vpop.permute.xlu0 %2836  ;;  %1055 = vmatpush.msrb.mxu3 %v911_v6  ;;  %v2888_v6 = vunpack.i.l.bf16 %v3938_v5 }
 0x2d8   :  { %v2839_v12 = vunpack.i.h.bf16 %v3903_v23  ;;  %v2838_v17 = vunpack.i.l.bf16 %v3903_v23 }
 0x2da   :  { %v888_v28 = vsel %vm209_vm3, %v2838_v17, %v2839_v12  ;;  %v887_v29 = vsel %vm209_vm3, %v2839_v12, %v2848_v53 }
 0x2db   :  { %1036 = vmatpush.msrb.mxu2 %v888_v28  ;;  %1056 = vmatpush.msrb.mxu3 %v887_v29 }
 0x2dd   :  { %1037 = vmatpush.msrb.mxu2 %v3808_v19  ;;  %1057 = vmatpush.msrb.mxu3 %v3810_v20  ;;  %v2824_v19 = vunpack.i.h.bf16 %v3887_v3 }
 0x2de   :  { %v3918_v30 = vpop.permute.xlu1 %2861 }
 0x2df   :  { %v3928_v35 = vpop.permute.xlu0 %2851  ;;  %1038 = vmatpush.msrb.mxu2 %v859_v33  ;;  %1058 = vmatpush.msrb.mxu3 %v858_v34  ;;  %v2864_v20 = vunpack.i.h.bf16 %v3918_v30  ;;  %v3967_v33 = vpop.permute.xlu2 %2901  ;;  %v2849_v34 = vunpack.i.h.bf16 %v3896_v37 }
 0x2e0   :  { %v2854_v26 = vunpack.i.h.bf16 %v3928_v35  ;;  %v2904_v23 = vunpack.i.h.bf16 %v3967_v33 }
 0x2e1   :  { %v934_v48 = vsel %vm259_vm1, %v2833_v8, %v2864_v20  ;;  %v933_v62 = vsel %vm259_vm1, %v2864_v20, %v2834_v61 }
 0x2e2   :  { %v958_v42 = vsel %vm284_vm0, %v2823_v9, %v2854_v26  ;;  %v957_v32 = vsel %vm284_vm0, %v2854_v26, %v2824_v19  ;;  %v2844_v9 = vunpack.i.h.bf16 %v3859_v40 }
 0x2e3   :  { %1073 = vmatpush.msra.mxu0 %v958_v42  ;;  %1093 = vmatpush.msra.mxu1 %v957_v32  ;;  %v2903_v42 = vunpack.i.l.bf16 %v3967_v33 }
 0x2e5   :  { %1074 = vmatpush.msra.mxu0 %v934_v48  ;;  %1094 = vmatpush.msra.mxu1 %v933_v62 }
 0x2e6   :  { %v3946_v3 = vpop.permute.xlu1 %2876 }
 0x2e7   :  { %v2879_v38 = vunpack.i.h.bf16 %v3946_v3  ;;  %v3950_v24 = vpop.permute.xlu0 %2866 }
 0x2e8   :  { %v2869_v12 = vunpack.i.h.bf16 %v3950_v24  ;;  %v2868_v8 = vunpack.i.l.bf16 %v3950_v24 }
 0x2e9   :  { %v910_v25 = vsel %vm234_vm2, %v2843_v36, %v2879_v38  ;;  %v909_v28 = vsel %vm234_vm2, %v2879_v38, %v2844_v9 }
 0x2ea   :  { %v835_v40 = vsel %vm153_vm5, %v2869_v12, %v2868_v8  ;;  %v834_v29 = vsel %vm153_vm5, %v2868_v8, %v2888_v6  ;;  %1075 = vmatpush.msra.mxu0 %v910_v25  ;;  %1095 = vmatpush.msra.mxu1 %v909_v28  ;;  %v2853_v25 = vunpack.i.l.bf16 %v3928_v35  ;;  %v4009_v35 = vld [vmem:[%s4903_s6] sm:$0xff] }
 0x2eb   :  { %1039 = vmatpush.msrb.mxu2 %v835_v40  ;;  %1059 = vmatpush.msrb.mxu3 %v834_v29 }
 0x2ee   :  { %v2892_v36 = vpop.permute.xlu1 %2891 }
 0x2ef   :  { %v2894_v20 = vunpack.i.h.bf16 %v2892_v36  ;;  %v3970_v26 = vpop.permute.xlu0 %2881 }
 0x2f0   :  { %v2884_v32 = vunpack.i.h.bf16 %v3970_v26  ;;  %v2883_v48 = vunpack.i.l.bf16 %v3970_v26 }
 0x2f1   :  { %v886_v62 = vsel %vm209_vm3, %v2848_v53, %v2894_v20  ;;  %v885_v38 = vsel %vm209_vm3, %v2894_v20, %v2849_v34 }
 0x2f2   :  { %v811_v37 = vsel %vm128_vm6, %v2884_v32, %v2883_v48  ;;  %v810_v8 = vsel %vm128_vm6, %v2883_v48, %v2903_v42  ;;  %1076 = vmatpush.msra.mxu0 %v886_v62  ;;  %1096 = vmatpush.msra.mxu1 %v885_v38  ;;  %v2863_v48 = vunpack.i.l.bf16 %v3918_v30  ;;  %v2878_v62 = vunpack.i.l.bf16 %v3946_v3 }
 0x2f3   :  { %1040 = vmatpush.msrb.mxu2 %v811_v37  ;;  %1060 = vmatpush.msrb.mxu3 %v810_v8  ;;  %v956_v30 = vsel %vm284_vm0, %v2824_v19, %v2853_v25  ;;  %v961_v38 = vsel %vm284_vm0, %v2853_v25, %v2813_v43  ;;  %v2917_v37 = vpop.permute.xlu2 %2916  ;;  %v2893_v8 = vunpack.i.l.bf16 %v2892_v36 }
 0x2f4   :  { %1077 = vmatpush.msra.mxu0 %v3817_v54  ;;  %1097 = vmatpush.msra.mxu1 %v3834_v45  ;;  %v937_v3 = vsel %vm259_vm1, %v2863_v48, %v2818_v22  ;;  %v908_v60 = vsel %vm234_vm2, %v2844_v9, %v2878_v62  ;;  %v913_v41 = vsel %vm234_vm2, %v2878_v62, %v2828_v46  ;;  %v2874_v22 = vunpack.i.h.bf16 %v3900_v49 }
 0x2f5   :  { %v2919_v19 = vunpack.i.h.bf16 %v2917_v37  ;;  %v884_v25 = vsel %vm209_vm3, %v2849_v34, %v2893_v8  ;;  %v889_v9 = vsel %vm209_vm3, %v2893_v8, %v2838_v17 }
 0x2f6   :  { %v3989_v53 = vpop.permute.xlu1 %2906 }
 0x2f7   :  { %v2908_v28 = vunpack.i.l.bf16 %v3989_v53  ;;  %v3993_v40 = vpop.permute.xlu0 %2896  ;;  %v833_v49 = vsel %vm153_vm5, %v2888_v6, %v2919_v19  ;;  %v832_v17 = vsel %vm153_vm5, %v2919_v19, %v2889_v55 }
 0x2f8   :  { %v2899_v29 = vunpack.i.h.bf16 %v3993_v40  ;;  %v2898_v20 = vunpack.i.l.bf16 %v3993_v40 }
 0x2fa   :  { %v787_v54 = vsel %vm103_vm7, %v2899_v29, %v2898_v20  ;;  %v786_v45 = vsel %vm103_vm7, %v2898_v20, %v2908_v28  ;;  %v932_v20 = vsel %vm259_vm1, %v2834_v61, %v2863_v48 }
 0x2fb   :  { %1041 = vmatpush.msrb.mxu2 %v787_v54  ;;  %1061 = vmatpush.msrb.mxu3 %v786_v45  ;;  %v2918_v45 = vunpack.i.l.bf16 %v2917_v37 }
 0x2fc   :  { %2644 = vmatmul.msk.f32.vlgmr.msrb.gmra.mxu2 %vm352_vm8, %v4009_v35  ;;  %2645 = vmatmul.msk.f32.vlgmr.msrb.gmra.mxu3 %vm352_vm8, %v4009_v35 }
 0x2fd   :  { %1113 = vmatpush.msra.mxu2 %v956_v30  ;;  %1133 = vmatpush.msra.mxu3 %v961_v38  ;;  %v831_v62 = vsel %vm153_vm5, %v2889_v55, %v2918_v45  ;;  %v830_v51 = vsel %vm153_vm5, %v2918_v45, %v2869_v12 }
 0x2fe   :  { %v2922_v57 = vpop.permute.xlu1 %2921 }
 0x2ff   :  { %1114 = vmatpush.msra.mxu2 %v932_v20  ;;  %1134 = vmatpush.msra.mxu3 %v937_v3  ;;  %v2912_v43 = vpop.permute.xlu0 %2911  ;;  %v2924_v48 = vunpack.i.h.bf16 %v2922_v57 }
 0x300   :  { %v2914_v61 = vunpack.i.h.bf16 %v2912_v43  ;;  %v2913_v36 = vunpack.i.l.bf16 %v2912_v43 }
 0x301   :  { %1115 = vmatpush.msra.mxu2 %v908_v60  ;;  %1135 = vmatpush.msra.mxu3 %v913_v41  ;;  %v808_v5 = vsel %vm128_vm6, %v2924_v48, %v2904_v23 }
 0x302   :  { %v857_v46 = vsel %vm178_vm4, %v2873_v15, %v2914_v61  ;;  %v856_v54 = vsel %vm178_vm4, %v2914_v61, %v2874_v22  ;;  %v2923_v15 = vunpack.i.l.bf16 %v2922_v57  ;;  %v855_v34 = vsel %vm178_vm4, %v2874_v22, %v2913_v36 }
 0x303   :  { %1116 = vmatpush.msra.mxu2 %v884_v25  ;;  %1136 = vmatpush.msra.mxu3 %v889_v9 }
 0x304   :  { %1078 = vmatpush.msra.mxu0 %v857_v46  ;;  %1098 = vmatpush.msra.mxu1 %v856_v54  ;;  %v806_v38 = vsel %vm128_vm6, %v2923_v15, %v2884_v32 }
 0x305   :  { %1117 = vmatpush.msra.mxu2 %v3819_v1  ;;  %1137 = vmatpush.msra.mxu3 %v3827_v44  ;;  %v854_v1 = vsel %vm178_vm4, %v2913_v36, %v2859_v18  ;;  %v809_v44 = vsel %vm128_vm6, %v2903_v42, %v2924_v48  ;;  %v2909_v18 = vunpack.i.h.bf16 %v3989_v53  ;;  %v807_v42 = vsel %vm128_vm6, %v2904_v23, %v2923_v15 }
 0x306   :  { %1079 = vmatpush.msra.mxu0 %v833_v49  ;;  %1099 = vmatpush.msra.mxu1 %v832_v17 }
 0x307   :  { %1118 = vmatpush.msra.mxu2 %v855_v34  ;;  %1138 = vmatpush.msra.mxu3 %v854_v1  ;;  %v2927_v6 = vpop.permute.xlu0 %2926 }
 0x308   :  { %1080 = vmatpush.msra.mxu0 %v809_v44  ;;  %1100 = vmatpush.msra.mxu1 %v808_v5  ;;  %v2929_v33 = vunpack.i.h.bf16 %v2927_v6  ;;  %v2928_v30 = vunpack.i.l.bf16 %v2927_v6 }
 0x309   :  { %1119 = vmatpush.msra.mxu2 %v831_v62  ;;  %1139 = vmatpush.msra.mxu3 %v830_v51 }
 0x30a   :  { %v785_v24 = vsel %vm103_vm7, %v2908_v28, %v2929_v33  ;;  %v784_v12 = vsel %vm103_vm7, %v2929_v33, %v2909_v18  ;;  %v783_v37 = vsel %vm103_vm7, %v2909_v18, %v2928_v30  ;;  %v782_v26 = vsel %vm103_vm7, %v2928_v30, %v2899_v29 }
 0x30b   :  { %1120 = vmatpush.msra.mxu2 %v807_v42  ;;  %1140 = vmatpush.msra.mxu3 %v806_v38 }
 0x30c   :  { %1081 = vmatpush.msra.mxu0 %v785_v24  ;;  %1101 = vmatpush.msra.mxu1 %v784_v12 }
 0x30d   :  { %1121 = vmatpush.msra.mxu2 %v783_v37  ;;  %1141 = vmatpush.msra.mxu3 %v782_v26 }
 0x30e   :  { %2646 = vmatmul.msk.f32.vlgmr.msra.gmra.mxu0 %vm352_vm8, %v4009_v35  ;;  %2648 = vmatmul.msk.f32.vlgmr.msra.gmra.mxu2 %vm352_vm8, %v4009_v35 }
 0x30f   :  { %2647 = vmatmul.msk.f32.vlgmr.msra.gmra.mxu1 %vm352_vm8, %v4009_v35  ;;  %2649 = vmatmul.msk.f32.vlgmr.msra.gmra.mxu3 %vm352_vm8, %v4009_v35 }
 0x37f   :  { %v4104_v32 = vpop.f32.mrf.mxu2  ;;  %v4106_v53 = vpop.f32.mrf.mxu3 }
 0x380   :  { %v1146_v28 = vmul.f32 %v4104_v32, %v3689_v63  ;;  %v1147_v40 = vmul.f32 %v4106_v53, %v3692_v11  ;;  %v1209_v29 = vmul.f32 %v4104_v32, %v3695_v13  ;;  %v1210_v8 = vmul.f32 %v4106_v53, %v3700_v4 }
 0x382   :  { %v1168_v20 = vmul.f32 %v1146_v28, %v1146_v28  ;;  %v1169_v3 = vmul.f32 %v1147_v40, %v1147_v40  ;;  %v1152_v57 = vadd.f32 %v1147_v40, %v1146_v28  ;;  %v1215_v35 = vadd.f32 %v1210_v8, %v1209_v29 }
 0x383   :  { %v1231_v43 = vmul.f32 %v1209_v29, %v1209_v29  ;;  %v1232_v60 = vmul.f32 %v1210_v8, %v1210_v8 }
 0x384   :  { %v1174_v22 = vadd.f32 %v1169_v3, %v1168_v20 }
 0x385   :  { %v1237_v54 = vadd.f32 %v1232_v60, %v1231_v43 }
 0x38b   :  { %v4116_v41 = vpop.f32.mrf.mxu0 }
 0x38c   :  { %v1148_v19 = vmul.f32 %v4116_v41, %v3709_v21  ;;  %v1211_v61 = vmul.f32 %v4116_v41, %v3718_v27  ;;  %v4122_v36 = vpop.f32.mrf.mxu1 }
 0x38d   :  { %v1149_v25 = vmul.f32 %v4122_v36, %v3723_v31  ;;  %v1212_v46 = vmul.f32 %v4122_v36, %v3730_v39 }
 0x38e   :  { %v1153_v9 = vadd.f32 %v1152_v57, %v1148_v19  ;;  %v1170_v55 = vmul.f32 %v1148_v19, %v1148_v19  ;;  %v1216_v48 = vadd.f32 %v1215_v35, %v1211_v61  ;;  %v1233_v45 = vmul.f32 %v1211_v61, %v1211_v61  ;;  %v1322_v57 = vld [vmem:[%s4905_s8] sm:$0xff] }
 0x38f   :  { %v1171_v23 = vmul.f32 %v1149_v25, %v1149_v25  ;;  %v1234_v6 = vmul.f32 %v1212_v46, %v1212_v46  ;;  %v1310_v35 = vld [vmem:[%s4904_s7] sm:$0xff] }
 0x390   :  { %v1175_v49 = vadd.f32 %v1174_v22, %v1170_v55  ;;  %v1217_v44 = vadd.f32 %v1216_v48, %v1212_v46  ;;  %v1154_v5 = vadd.f32 %v1153_v9, %v1149_v25  ;;  %v1238_v18 = vadd.f32 %v1237_v54, %v1233_v45 }
 0x391   :  { %v4128_v17 = vpop.f32.mrf.mxu2 }
 0x392   :  { %v1150_v15 = vmul.f32 %v4128_v17, %v3735_v47  ;;  %v1213_v34 = vmul.f32 %v4128_v17, %v3740_v56  ;;  %v4134_v1 = vpop.f32.mrf.mxu3  ;;  %v1176_v38 = vadd.f32 %v1175_v49, %v1171_v23  ;;  %v1239_v29 = vadd.f32 %v1238_v18, %v1234_v6 }
 0x393   :  { %v1214_v62 = vmul.f32 %v4134_v1, %v3743_v58  ;;  %v1151_v51 = vmul.f32 %v4134_v1, %v3746_v59 }
 0x394   :  { %v1218_v33 = vadd.f32 %v1217_v44, %v1213_v34  ;;  %v1155_v30 = vadd.f32 %v1154_v5, %v1150_v15  ;;  %v1172_v42 = vmul.f32 %v1150_v15, %v1150_v15  ;;  %v1235_v28 = vmul.f32 %v1213_v34, %v1213_v34 }
 0x395   :  { %v1173_v24 = vmul.f32 %v1151_v51, %v1151_v51  ;;  %v1236_v8 = vmul.f32 %v1214_v62, %v1214_v62 }
 0x396   :  { %v1219_v12 = vadd.f32 %v1218_v33, %v1214_v62  ;;  %v1156_v37 = vadd.f32 %v1155_v30, %v1151_v51  ;;  %v1177_v26 = vadd.f32 %v1176_v38, %v1172_v42  ;;  %v1240_v20 = vadd.f32 %v1239_v29, %v1235_v28 }
 0x398   :  { %1220 = vadd.xlane.f32.xlu0 %v1219_v12  ;;  %1157 = vadd.xlane.f32.xlu2 %v1156_v37  ;;  %v1178_v40 = vadd.f32 %v1177_v26, %v1173_v24  ;;  %v1241_v3 = vadd.f32 %v1240_v20, %v1236_v8 }
 0x39a   :  { %1179 = vadd.xlane.f32.xlu1 %v1178_v40 }
 0x3a0   :  { %1242 = vadd.xlane.f32.xlu2 %v1241_v3 }
 0x3ac   :  { %1325 = vperm.xlu0 %2930, %v1322_v57  }
 0x3b3   :  { %1313 = vperm.xlu1 %2808, %v1310_v35  }
 0x40b   :  { %v1221_v43 = vpop.xlane.xlu0 %1220  ;;  %v1158_v60 = vpop.xlane.xlu2 %1157 }
 0x40c   :  { %v1222_v22 = vrot.slane %v1221_v43, 4  ;;  %v1159_v19 = vrot.slane %v1158_v60, 4 }
 0x40d   :  { %v1180_v61 = vpop.xlane.xlu1 %1179 }
 0x40e   :  { %v1223_v25 = vadd.f32 %v1222_v22, %v1221_v43  ;;  %v1160_v9 = vadd.f32 %v1159_v19, %v1158_v60  ;;  %v1181_v55 = vrot.slane %v1180_v61, 4 }
 0x410   :  { %v1224_v48 = vrot.slane %v1223_v25, 2  ;;  %v1161_v46 = vrot.slane %v1160_v9, 2  ;;  %v1182_v54 = vadd.f32 %v1181_v55, %v1180_v61 }
 0x412   :  { %v1183_v45 = vrot.slane %v1182_v54, 2  ;;  %v1162_v23 = vadd.f32 %v1161_v46, %v1160_v9  ;;  %v1225_v49 = vadd.f32 %v1224_v48, %v1223_v25 }
 0x413   :  { %v1243_v15 = vpop.xlane.xlu2 %1242 }
 0x414   :  { %v1244_v34 = vrot.slane %v1243_v15, 4  ;;  %v1163_v44 = vrot.slane %v1162_v23, 1  ;;  %v1184_v5 = vadd.f32 %v1183_v45, %v1182_v54  ;;  %v1226_v6 = vrot.slane %v1225_v49, 1 }
 0x416   :  { %v1245_v62 = vadd.f32 %v1244_v34, %v1243_v15  ;;  %v1164_v51 = vadd.f32 %v1163_v44, %v1162_v23  ;;  %v1185_v18 = vrot.slane %v1184_v5, 1  ;;  %v1227_v42 = vadd.f32 %v1226_v6, %v1225_v49 }
 0x418   :  { %v1246_v33 = vrot.slane %v1245_v62, 2  ;;  %2670 = vpush %v1164_v51  ;;  %v1186_v30 = vadd.f32 %v1185_v18, %v1184_v5  ;;  %v4153_v51 = vld [vmem:[%s4898_s1] ss:$2 sm:$0x3f] }
 0x41a   :  { %2672 = vpush %v1186_v30  ;;  %v1247_v38 = vadd.f32 %v1246_v33, %v1245_v62 }
 0x41b   :  { %2674 = vpush %v1227_v42  ;;  %v4160_v42 = vld [vmem:[%s4898_s1 + $0x1] ss:$2 sm:$0x3f] }
 0x41c   :  { %v1248_v24 = vrot.slane %v1247_v38, 1 }
 0x41e   :  { %v1249_v12 = vadd.f32 %v1248_v24, %v1247_v38 }
 0x420   :  { %2676 = vpush %v1249_v12 }
 0x449   :  { %s2671_s7 = spop %2670 }
 0x44a   :  { %v1166_v37 = vstv %s2671_s7 }
 0x44b   :  { %v1167_v26 = vmul.f32 %v1166_v37, %v3766_v7  ;;  %s2673_s8 = spop %2672 }
 0x44c   :  { %v1188_v28 = vstv %s2673_s8  ;;  %s2675_s25 = spop %2674 }
 0x44d   :  { %v1190_v40 = vmul.f32 %v1167_v26, %v1167_v26  ;;  %v1189_v29 = vmul.f32 %v1188_v28, %v3766_v7  ;;  %v1229_v8 = vstv %s2675_s25 }
 0x44e   :  { %v1230_v3 = vmul.f32 %v1229_v8, %v3766_v7 }
 0x44f   :  { %v1191_v20 = vsub.f32 %v1189_v29, %v1190_v40 }
 0x450   :  { %v1253_v60 = vmul.f32 %v1230_v3, %v1230_v3 }
 0x451   :  { %v1192_v57 = vmax.f32 %v1191_v20, 0.0  ;;  %s2677_s26 = spop %2676 }
 0x452   :  { %v1251_v35 = vstv %s2677_s26 }
 0x453   :  { %v1193_v43 = vadd.f32 1e-05, %v1192_v57  ;;  %v1252_v22 = vmul.f32 %v1251_v35, %v3766_v7 }
 0x455   :  { %3169 = vrsqrt.f32 %v1193_v43  ;;  %v1254_v19 = vsub.f32 %v1252_v22, %v1253_v60  ;;  %vm1200_vm10 = vweird.f32 %v1193_v43 }
 0x457   :  { %v1255_v61 = vmax.f32 %v1254_v19, 0.0 }
 0x459   :  { %v1256_v25 = vadd.f32 1e-05, %v1255_v61 }
 0x45b   :  { %v3170_v9 = vpop.eup %3169  ;;  %3171 = vrsqrt.f32 %v1256_v25  ;;  %vm1263_vm13 = vweird.f32 %v1256_v25 }
 0x45c   :  { %v1195_v55 = vmul.f32 %v3170_v9, %v1193_v43  ;;  %vm1201_vm9 = vweird.f32 %v3170_v9 }
 0x45d   :  { %vm1202_vm11 = vmor %vm1200_vm10, %vm1201_vm9 }
 0x45e   :  { %v1196_v48 = vmul.f32 %v3170_v9, %v1195_v55 }
 0x460   :  { %v1197_v46 = vmul.f32 0.5, %v1196_v48 }
 0x461   :  { %v3172_v54 = vpop.eup %3171 }
 0x462   :  { %v1198_v45 = vsub.f32 1.5, %v1197_v46  ;;  %v1258_v23 = vmul.f32 %v3172_v54, %v1256_v25  ;;  %vm1264_vm12 = vweird.f32 %v3172_v54 }
 0x463   :  { %vm1265_vm14 = vmor %vm1263_vm13, %vm1264_vm12 }
 0x464   :  { %v1199_v49 = vmul.f32 %v3170_v9, %v1198_v45  ;;  %v1259_v15 = vmul.f32 %v3172_v54, %v1258_v23 }
 0x466   :  { %v1203_v34 = vsel %vm1202_vm11, %v3170_v9, %v1199_v49  ;;  %v1260_v44 = vmul.f32 0.5, %v1259_v15  ;;  %v1314_v49 = vpop.permute.xlu1 %1313 }
 0x467   :  { %v1206_v5 = vmul.f32 %v1203_v34, %v1167_v26  ;;  %v1204_v30 = vmul.f32 %v4153_v51, %v1203_v34 }
 0x468   :  { %v1261_v6 = vsub.f32 1.5, %v1260_v44 }
 0x469   :  { %v1207_v18 = vmul.f32 %v4153_v51, %v1206_v5 }
 0x46a   :  { %v1262_v62 = vmul.f32 %v3172_v54, %v1261_v6 }
 0x46b   :  { %v1208_v12 = vsub.f32 0.0, %v1207_v18 }
 0x46c   :  { %v1266_v33 = vsel %vm1265_vm14, %v3172_v54, %v1262_v62 }
 0x46d   :  { %v1267_v38 = vmul.f32 %v4160_v42, %v1266_v33  ;;  %v1269_v24 = vmul.f32 %v1266_v33, %v1230_v3 }
 0x46f   :  { %v1268_v37 = vadd.f32 %v1267_v38, %v1204_v30  ;;  %v1270_v26 = vmul.f32 %v4160_v42, %v1269_v24 }
 0x471   :  { %v1271_v28 = vsub.f32 %v1208_v12, %v1270_v26  ;;  %v1273_v40 = vperm.slane %v1268_v37, 0  ;;  %v1274_v29 = vperm.slane %v1268_v37, 1  ;;  %v1275_v8 = vperm.slane %v1268_v37, 2 }
 0x472   :  { %v1276_v20 = vperm.slane %v1268_v37, 3  ;;  %v1277_v57 = vperm.slane %v1268_v37, 4  ;;  %v1278_v35 = vperm.slane %v1268_v37, 5 }
 0x473   :  { %v1285_v43 = vmul.f32 %v1273_v40, %v4104_v32  ;;  %v1286_v60 = vmul.f32 %v1274_v29, %v4106_v53  ;;  %v1287_v22 = vmul.f32 %v1275_v8, %v4116_v41  ;;  %v1292_v19 = vperm.slane %v1271_v28, 0  ;;  %v1326_v32 = vpop.permute.xlu0 %1325  ;;  %v3209_v8 = vld [vmem:[#allocation3] sm:$0xff] }
 0x474   :  { %v1288_v3 = vmul.f32 %v1276_v20, %v4122_v36  ;;  %v1289_v61 = vmul.f32 %v1277_v57, %v4128_v17  ;;  %v1290_v25 = vmul.f32 %v1278_v35, %v4134_v1  ;;  %v1293_v9 = vperm.slane %v1271_v28, 1  ;;  %v3210_v57 = vld [vmem:[#allocation3 + $0x8] sm:$0xff] }
 0x475   :  { %v1294_v55 = vperm.slane %v1271_v28, 2  ;;  %v1295_v48 = vperm.slane %v1271_v28, 3  ;;  %v1296_v46 = vperm.slane %v1271_v28, 4  ;;  %v1297_v54 = vperm.slane %v1271_v28, 5 }
 0x476   :  { %v1304_v45 = vadd.f32 %v1292_v19, %v1285_v43  ;;  %v1305_v23 = vadd.f32 %v1293_v9, %v1286_v60  ;;  %v3211_v43 = vld [vmem:[#allocation3 + $0x10] sm:$0xff] }
 0x477   :  { %v1306_v15 = vadd.f32 %v1294_v55, %v1287_v22  ;;  %v1307_v53 = vadd.f32 %v1295_v48, %v1288_v3  ;;  %v1308_v34 = vadd.f32 %v1296_v46, %v1289_v61  ;;  %v1309_v41 = vadd.f32 %v1297_v54, %v1290_v25  ;;  %v3212_v22 = vld [vmem:[#allocation3 + $0x18] sm:$0xff]  ;;  %v3213_v3 = vld [vmem:[#allocation3 + $0x20] sm:$0xff]  ;;  %v3214_v25 = vld [vmem:[#allocation3 + $0x28] sm:$0xff] }
 0x478   :  { %v1316_v44 = vmul.f32 %v1314_v49, %v1304_v45  ;;  %v1317_v5 = vmul.f32 %v1314_v49, %v1305_v23 }
 0x479   :  { %v1318_v36 = vmul.f32 %v1314_v49, %v1306_v15  ;;  %v1319_v6 = vmul.f32 %v1314_v49, %v1307_v53  ;;  %v1320_v17 = vmul.f32 %v1314_v49, %v1308_v34  ;;  %v1321_v62 = vmul.f32 %v1314_v49, %v1309_v41 }
 0x47a   :  { %v1328_v1 = vadd.f32 %v1326_v32, %v1316_v44  ;;  %v1329_v18 = vadd.f32 %v1326_v32, %v1317_v5 }
 0x47b   :  { %v1330_v33 = vadd.f32 %v1326_v32, %v1318_v36  ;;  %v1331_v30 = vadd.f32 %v1326_v32, %v1319_v6  ;;  %v1332_v38 = vadd.f32 %v1326_v32, %v1320_v17  ;;  %v1333_v24 = vadd.f32 %v1326_v32, %v1321_v62 }
 0x47c   :  { %v1334_v12 = vmul.f32 %v1328_v1, %v3784_v2  ;;  %v1335_v37 = vmul.f32 %v1329_v18, %v3786_v16 }
 0x47d   :  { %v1336_v26 = vmul.f32 %v1330_v33, %v3788_v10  ;;  %v1337_v28 = vmul.f32 %v1331_v30, %v3801_v52  ;;  %v1338_v40 = vmul.f32 %v1332_v38, %v3790_v50  ;;  %v1339_v29 = vmul.f32 %v1333_v24, %v3792_v0 }
 0x47e   :  { %v4176_v20 = vadd.f32 %v3209_v8, %v1334_v12  ;;  %v4178_v35 = vadd.f32 %v3210_v57, %v1335_v37 }
 0x47f   :  { %v1342_v60 = vadd.f32 %v3211_v43, %v1336_v26  ;;  %v1343_v19 = vadd.f32 %v3212_v22, %v1337_v28  ;;  %v1344_v61 = vadd.f32 %v3213_v3, %v1338_v40  ;;  %v1345_v9 = vadd.f32 %v3214_v25, %v1339_v29 }
 0x480   :  { %v1352_v55 = vmul.f32 0.044715, %v4176_v20  ;;  %v1353_v48 = vmul.f32 0.044715, %v4178_v35 }
 0x481   :  { %v1354_v46 = vmul.f32 0.044715, %v1342_v60  ;;  %v1355_v54 = vmul.f32 0.044715, %v1343_v19  ;;  %v1356_v45 = vmul.f32 0.044715, %v1344_v61 }
 0x482   :  { %v1358_v23 = vmul.f32 %v1352_v55, %v4176_v20  ;;  %v1357_v49 = vmul.f32 0.044715, %v1345_v9  ;;  %v1359_v32 = vmul.f32 %v1353_v48, %v4178_v35  ;;  %v1348_v3 = vmul.f32 0.5, %v1342_v60 }
 0x483   :  { %v1360_v15 = vmul.f32 %v1354_v46, %v1342_v60  ;;  %v1361_v53 = vmul.f32 %v1355_v54, %v1343_v19  ;;  %v1362_v34 = vmul.f32 %v1356_v45, %v1344_v61  ;;  %v1349_v48 = vmul.f32 0.5, %v1343_v19 }
 0x484   :  { %v1364_v41 = vmul.f32 %v1358_v23, %v4176_v20  ;;  %v1363_v44 = vmul.f32 %v1357_v49, %v1345_v9  ;;  %v1365_v5 = vmul.f32 %v1359_v32, %v4178_v35  ;;  %v1350_v45 = vmul.f32 0.5, %v1344_v61 }
 0x485   :  { %v1366_v36 = vmul.f32 %v1360_v15, %v1342_v60  ;;  %v1367_v6 = vmul.f32 %v1361_v53, %v1343_v19  ;;  %v1368_v17 = vmul.f32 %v1362_v34, %v1344_v61  ;;  %v1351_v32 = vmul.f32 0.5, %v1345_v9 }
 0x486   :  { %v1370_v62 = vadd.f32 %v1364_v41, %v4176_v20  ;;  %v1369_v1 = vmul.f32 %v1363_v44, %v1345_v9  ;;  %v1371_v18 = vadd.f32 %v1365_v5, %v4178_v35 }
 0x487   :  { %v1372_v33 = vadd.f32 %v1366_v36, %v1342_v60  ;;  %v1373_v30 = vadd.f32 %v1367_v6, %v1343_v19  ;;  %v1374_v38 = vadd.f32 %v1368_v17, %v1344_v61  ;;  %v1346_v19 = vmul.f32 0.5, %v4176_v20 }
 0x488   :  { %v1376_v24 = vmul.f32 0.7978846, %v1370_v62  ;;  %v1375_v12 = vadd.f32 %v1369_v1, %v1345_v9  ;;  %v1377_v37 = vmul.f32 0.7978846, %v1371_v18  ;;  %v1347_v61 = vmul.f32 0.5, %v4178_v35 }
 0x489   :  { %v1378_v26 = vmul.f32 0.7978846, %v1372_v33  ;;  %v1379_v28 = vmul.f32 0.7978846, %v1373_v30  ;;  %v1380_v40 = vmul.f32 0.7978846, %v1374_v38 }
 0x48a   :  { %3173 = vtanh.f32 %v1376_v24  ;;  %v1381_v29 = vmul.f32 0.7978846, %v1375_v12 }
 0x48b   :  { %3175 = vtanh.f32 %v1377_v37 }
 0x48c   :  { %3177 = vtanh.f32 %v1378_v26 }
 0x48d   :  { %3179 = vtanh.f32 %v1379_v28 }
 0x48e   :  { %3181 = vtanh.f32 %v1380_v40 }
 0x48f   :  { %3183 = vtanh.f32 %v1381_v29 }
 0x490   :  { %v3174_v8 = vpop.eup %3173 }
 0x491   :  { %v3176_v57 = vpop.eup %3175  ;;  %v1388_v34 = vadd.f32 1.0, %v3174_v8 }
 0x492   :  { %v3178_v43 = vpop.eup %3177  ;;  %v1389_v44 = vadd.f32 1.0, %v3176_v57 }
 0x493   :  { %v3180_v22 = vpop.eup %3179  ;;  %v1390_v25 = vadd.f32 1.0, %v3178_v43  ;;  %v4204_v9 = vmul.f32 %v1388_v34, %v1346_v19 }
 0x494   :  { %v3182_v55 = vpop.eup %3181  ;;  %v1391_v46 = vadd.f32 1.0, %v3180_v22  ;;  %v4206_v6 = vmul.f32 %v1389_v44, %v1347_v61 }
 0x495   :  { %v3184_v54 = vpop.eup %3183  ;;  %v1392_v23 = vadd.f32 1.0, %v3182_v55  ;;  %v4188_v49 = vmul.f32 %v1390_v25, %v1348_v3 }
 0x496   :  { %v1393_v15 = vadd.f32 1.0, %v3184_v54  ;;  %v4190_v53 = vmul.f32 %v1391_v46, %v1349_v48  ;;  %v2941_v17 = vpack.i.bf16 %v4206_v6, %v4204_v9 }
 0x497   :  { %v4192_v41 = vmul.f32 %v1392_v23, %v1350_v45  ;;  %v2991_v20 = vpack.i.bf16 %v4188_v49, %v4206_v6 }
 0x498   :  { %v4194_v5 = vmul.f32 %v1393_v15, %v1351_v32  ;;  %v2936_v60 = vpack.i.bf16 %v4190_v53, %v4188_v49  ;;  %v3001_v35 = vpack.i.bf16 %v4190_v53, %v4204_v9 }
 0x49a   :  { %v2961_v36 = vpack.i.bf16 %v4194_v5, %v4192_v41  ;;  %2937 = vrot.lane.b32.xlu1 %v2936_v60, %s3299_s28  ;;  %2932 = vrot.lane.b32.xlu2 %v2936_v60, %s3297_s0 }
 0x49c   :  { %2962 = vrot.lane.b32.xlu0 %v2961_v36, %s3299_s28 }
 0x4a2   :  { %2947 = vrot.lane.b32.xlu1 %v2961_v36, %s3297_s0  ;;  %2942 = vrot.lane.b32.xlu2 %v2941_v17, %s3297_s0 }
 0x4a4   :  { %2977 = vrot.lane.b32.xlu0 %v2961_v36, %s3298_s2 }
 0x4aa   :  { %2957 = vrot.lane.b32.xlu1 %v2941_v17, %s3299_s28  ;;  %2952 = vrot.lane.b32.xlu2 %v2936_v60, %s3298_s2 }
 0x4ac   :  { %2992 = vrot.lane.b32.xlu0 %v2991_v20, %s3301_s30 }
 0x4b2   :  { %2972 = vrot.lane.b32.xlu1 %v2941_v17, %s3298_s2  ;;  %2967 = vrot.lane.b32.xlu2 %v2936_v60, %s3300_s29 }
 0x4b4   :  { %1482 = vrot.lane.b32.xlu0 %v4194_v5, %s3301_s30 }
 0x4ba   :  { %2987 = vrot.lane.b32.xlu1 %v2961_v36, %s3300_s29  ;;  %2982 = vrot.lane.b32.xlu2 %v2941_v17, %s3300_s29 }
 0x4bc   :  { %1458 = vrot.lane.b32.xlu0 %v4194_v5, %s3302_s16 }
 0x4c2   :  { %3002 = vrot.lane.b32.xlu1 %v3001_v35, %s3301_s30  ;;  %2997 = vrot.lane.b32.xlu2 %v2991_v20, %s3302_s16 }
 0x4c4   :  { %1434 = vrot.lane.b32.xlu0 %v4194_v5, %s3303_s17 }
 0x4ca   :  { %3012 = vrot.lane.b32.xlu1 %v3001_v35, %s3302_s16  ;;  %3007 = vrot.lane.b32.xlu2 %v2991_v20, %s3303_s17 }
 0x4cc   :  { %1480 = vrot.lane.b32.xlu0 %v4192_v41, %s3301_s30 }
 0x4d2   :  { %3022 = vrot.lane.b32.xlu1 %v3001_v35, %s3303_s17  ;;  %3017 = vrot.lane.b32.xlu2 %v2991_v20, %s3304_s18 }
 0x4d4   :  { %1408 = vrot.lane.b32.xlu0 %v4192_v41, %s3304_s18 }
 0x4da   :  { %1410 = vrot.lane.b32.xlu1 %v4194_v5, %s3304_s18  ;;  %3027 = vrot.lane.b32.xlu2 %v3001_v35, %s3304_s18 }
 0x4e2   :  { %1432 = vrot.lane.b32.xlu1 %v4192_v41, %s3303_s17  ;;  %1456 = vrot.lane.b32.xlu2 %v4192_v41, %s3302_s16 }
 0x4f4   :  { %v2933_v62 = vpop.permute.xlu2 %2932 }
 0x4f5   :  { %v2935_v1 = vunpack.i.h.bf16 %v2933_v62  ;;  %v2934_v18 = vunpack.i.l.bf16 %v2933_v62 }
 0x4f7   :  { %v1588_v33 = vsel %vm284_vm0, %v2934_v18, %v2935_v1 }
 0x4f8   :  { %1703 = vmatpush.msrb.mxu2 %v1588_v33 }
 0x4fc   :  { %v4250_v30 = vpop.permute.xlu2 %2942 }
 0x4fd   :  { %v2945_v38 = vunpack.i.h.bf16 %v4250_v30  ;;  %v2944_v24 = vunpack.i.l.bf16 %v4250_v30 }
 0x4ff   :  { %v1590_v12 = vsel %vm284_vm0, %v2944_v24, %v2945_v38  ;;  %v1589_v37 = vsel %vm284_vm0, %v2945_v38, %v2934_v18 }
 0x500   :  { %1663 = vmatpush.msrb.mxu0 %v1590_v12  ;;  %1683 = vmatpush.msrb.mxu1 %v1589_v37 }
 0x504   :  { %v2953_v26 = vpop.permute.xlu2 %2952 }
 0x505   :  { %v2955_v29 = vunpack.i.h.bf16 %v2953_v26  ;;  %v2954_v8 = vunpack.i.l.bf16 %v2953_v26 }
 0x507   :  { %v1540_v48 = vsel %vm234_vm2, %v2954_v8, %v2955_v29 }
 0x50c   :  { %v2938_v28 = vpop.permute.xlu1 %2937  ;;  %v4260_v40 = vpop.permute.xlu2 %2967 }
 0x50d   :  { %v2940_v57 = vunpack.i.h.bf16 %v2938_v28  ;;  %v2939_v43 = vunpack.i.l.bf16 %v2938_v28  ;;  %v2970_v3 = vunpack.i.h.bf16 %v4260_v40  ;;  %v2969_v25 = vunpack.i.l.bf16 %v4260_v40 }
 0x50e   :  { %v4262_v22 = vpop.permute.xlu0 %2962 }
 0x50f   :  { %v1564_v55 = vsel %vm259_vm1, %v2939_v43, %v2940_v57  ;;  %v1516_v46 = vsel %vm209_vm3, %v2969_v25, %v2970_v3  ;;  %v2964_v23 = vunpack.i.l.bf16 %v4262_v22 }
 0x510   :  { %1704 = vmatpush.msrb.mxu2 %v1564_v55 }
 0x511   :  { %v1563_v60 = vsel %vm259_vm1, %v2940_v57, %v2964_v23 }
 0x512   :  { %1705 = vmatpush.msrb.mxu2 %v1540_v48 }
 0x514   :  { %v4274_v54 = vpop.permute.xlu1 %2947  ;;  %v4276_v45 = vpop.permute.xlu2 %2982  ;;  %1706 = vmatpush.msrb.mxu2 %v1516_v46 }
 0x515   :  { %v2949_v32 = vunpack.i.l.bf16 %v4274_v54  ;;  %v2985_v26 = vunpack.i.h.bf16 %v4276_v45  ;;  %v2984_v28 = vunpack.i.l.bf16 %v4276_v45 }
 0x516   :  { %v4280_v15 = vpop.permute.xlu0 %2977  ;;  %1707 = vmatpush.msrb.mxu2 %v4188_v49 }
 0x517   :  { %v2979_v34 = vunpack.i.l.bf16 %v4280_v15  ;;  %v1587_v44 = vsel %vm284_vm0, %v2935_v1, %v2949_v32 }
 0x518   :  { %1723 = vmatpush.msrb.mxu3 %v1587_v44 }
 0x519   :  { %v1539_v19 = vsel %vm234_vm2, %v2955_v29, %v2979_v34 }
 0x51a   :  { %1724 = vmatpush.msrb.mxu3 %v1563_v60 }
 0x51c   :  { %v4296_v49 = vpop.permute.xlu1 %2957  ;;  %v4298_v61 = vpop.permute.xlu2 %2997  ;;  %1725 = vmatpush.msrb.mxu3 %v1539_v19 }
 0x51d   :  { %v2960_v36 = vunpack.i.h.bf16 %v4296_v49  ;;  %v2959_v17 = vunpack.i.l.bf16 %v4296_v49  ;;  %v3000_v35 = vunpack.i.h.bf16 %v4298_v61  ;;  %v2999_v62 = vunpack.i.l.bf16 %v4298_v61 }
 0x51e   :  { %v2993_v20 = vpop.permute.xlu0 %2992  ;;  %v1518_v61 = vsel %vm209_vm3, %v2984_v28, %v2985_v26 }
 0x51f   :  { %v2995_v1 = vunpack.i.h.bf16 %v2993_v20  ;;  %v2994_v18 = vunpack.i.l.bf16 %v2993_v20  ;;  %v1566_v33 = vsel %vm259_vm1, %v2959_v17, %v2960_v36  ;;  %v1565_v38 = vsel %vm259_vm1, %v2960_v36, %v2939_v43 }
 0x520   :  { %1664 = vmatpush.msrb.mxu0 %v1566_v33  ;;  %1684 = vmatpush.msrb.mxu1 %v1565_v38  ;;  %v1463_v37 = vsel %vm153_vm5, %v2999_v62, %v3000_v35  ;;  %v1517_v36 = vsel %vm209_vm3, %v2985_v26, %v2969_v25 }
 0x521   :  { %v1487_v12 = vsel %vm178_vm4, %v2994_v18, %v2995_v1 }
 0x522   :  { %1708 = vmatpush.msrb.mxu2 %v1487_v12 }
 0x524   :  { %1709 = vmatpush.msrb.mxu2 %v1463_v37  ;;  %v4316_v29 = vpop.permute.xlu1 %2972  ;;  %v3008_v57 = vpop.permute.xlu2 %3007 }
 0x525   :  { %v2975_v55 = vunpack.i.h.bf16 %v4316_v29  ;;  %v2974_v43 = vunpack.i.l.bf16 %v4316_v29  ;;  %v3010_v48 = vunpack.i.h.bf16 %v3008_v57  ;;  %v3009_v46 = vunpack.i.l.bf16 %v3008_v57 }
 0x526   :  { %v4347_v26 = vpop.permute.xlu0 %1482 }
 0x527   :  { %v1542_v44 = vsel %vm234_vm2, %v2974_v43, %v2975_v55  ;;  %v1541_v60 = vsel %vm234_vm2, %v2975_v55, %v2954_v8  ;;  %v1439_v19 = vsel %vm128_vm6, %v3009_v46, %v3010_v48 }
 0x528   :  { %1665 = vmatpush.msrb.mxu0 %v1542_v44  ;;  %1685 = vmatpush.msrb.mxu1 %v1541_v60 }
 0x529   :  { %1710 = vmatpush.msrb.mxu2 %v1439_v19 }
 0x52a   :  { %1666 = vmatpush.msrb.mxu0 %v1518_v61  ;;  %1686 = vmatpush.msrb.mxu1 %v1517_v36 }
 0x52c   :  { %v4334_v20 = vpop.permute.xlu1 %2987  ;;  %v3018_v33 = vpop.permute.xlu2 %3017  ;;  %1667 = vmatpush.msrb.mxu0 %v4204_v9  ;;  %1687 = vmatpush.msrb.mxu1 %v4206_v6  ;;  %v4355_v6 = vld [vmem:[%s4906_s9] sm:$0xff] }
 0x52d   :  { %v2989_v8 = vunpack.i.l.bf16 %v4334_v20  ;;  %v3020_v38 = vunpack.i.h.bf16 %v3018_v33  ;;  %v3019_v12 = vunpack.i.l.bf16 %v3018_v33 }
 0x52e   :  { %v1459_v44 = vpop.permute.xlu0 %1458 }
 0x52f   :  { %v1415_v37 = vsel %vm103_vm7, %v3019_v12, %v3020_v38  ;;  %v1515_v25 = vsel %vm209_vm3, %v2970_v3, %v2989_v8 }
 0x530   :  { %1711 = vmatpush.msrb.mxu2 %v1415_v37  ;;  %1726 = vmatpush.msrb.mxu3 %v1515_v25 }
 0x531   :  { %2652 = vmatmul.msk.f32.vlgmr.msrb.gmra.mxu2 %vm352_vm8, %v4355_v6 }
 0x532   :  { %1727 = vmatpush.msrb.mxu3 %v4190_v53 }
 0x534   :  { %v4350_v9 = vpop.permute.xlu1 %3002  ;;  %v4382_v33 = vpop.permute.xlu2 %3027 }
 0x535   :  { %v3005_v57 = vunpack.i.h.bf16 %v4350_v9  ;;  %v3004_v40 = vunpack.i.l.bf16 %v4350_v9 }
 0x536   :  { %v1435_v25 = vpop.permute.xlu0 %1434 }
 0x537   :  { %v1489_v3 = vsel %vm178_vm4, %v4347_v26, %v3004_v40  ;;  %v1488_v53 = vsel %vm178_vm4, %v3004_v40, %v2994_v18  ;;  %v1486_v55 = vsel %vm178_vm4, %v2995_v1, %v3005_v57  ;;  %v3029_v40 = vunpack.i.l.bf16 %v4382_v33 }
 0x538   :  { %1668 = vmatpush.msrb.mxu0 %v1489_v3  ;;  %1688 = vmatpush.msrb.mxu1 %v1488_v53 }
 0x539   :  { %1728 = vmatpush.msrb.mxu3 %v1486_v55  ;;  %v2950_v55 = vunpack.i.h.bf16 %v4274_v54 }
 0x53c   :  { %v4370_v60 = vpop.permute.xlu1 %3012  ;;  %v1457_v29 = vpop.permute.xlu2 %1456 }
 0x53d   :  { %v3015_v19 = vunpack.i.h.bf16 %v4370_v60  ;;  %v3014_v61 = vunpack.i.l.bf16 %v4370_v60 }
 0x53f   :  { %v1465_v36 = vsel %vm153_vm5, %v1459_v44, %v3014_v61  ;;  %v1464_v18 = vsel %vm153_vm5, %v3014_v61, %v2999_v62  ;;  %v1462_v1 = vsel %vm153_vm5, %v3000_v35, %v3015_v19  ;;  %v3030_v62 = vunpack.i.h.bf16 %v4382_v33 }
 0x540   :  { %1669 = vmatpush.msrb.mxu0 %v1465_v36  ;;  %1689 = vmatpush.msrb.mxu1 %v1464_v18  ;;  %v1416_v18 = vsel %vm103_vm7, %v3029_v40, %v3019_v12 }
 0x541   :  { %1729 = vmatpush.msrb.mxu3 %v1462_v1  ;;  %v2965_v1 = vunpack.i.h.bf16 %v4262_v22  ;;  %v1414_v33 = vsel %vm103_vm7, %v3020_v38, %v3030_v62 }
 0x543   :  { %v1567_v12 = vsel %vm259_vm1, %v2965_v1, %v2959_v17  ;;  %v1481_v17 = vpop.permute.xlu0 %1480  ;;  %v1562_v38 = vsel %vm259_vm1, %v2964_v23, %v2965_v1 }
 0x544   :  { %v3023_v37 = vpop.permute.xlu1 %3022  ;;  %v1484_v45 = vsel %vm178_vm4, %v1481_v17, %v4347_v26 }
 0x545   :  { %v3025_v3 = vunpack.i.h.bf16 %v3023_v37  ;;  %v3024_v53 = vunpack.i.l.bf16 %v3023_v37  ;;  %v2990_v37 = vunpack.i.h.bf16 %v4334_v20 }
 0x547   :  { %v1441_v61 = vsel %vm128_vm6, %v1435_v25, %v3024_v53  ;;  %v1440_v35 = vsel %vm128_vm6, %v3024_v53, %v3009_v46  ;;  %v1438_v36 = vsel %vm128_vm6, %v3010_v48, %v3025_v3  ;;  %v1591_v46 = vsel %vm284_vm0, %v2950_v55, %v2944_v24 }
 0x548   :  { %1670 = vmatpush.msrb.mxu0 %v1441_v61  ;;  %1690 = vmatpush.msrb.mxu1 %v1440_v35  ;;  %v2980_v48 = vunpack.i.h.bf16 %v4280_v15  ;;  %v1586_v24 = vsel %vm284_vm0, %v2949_v32, %v2950_v55  ;;  %v1519_v54 = vsel %vm209_vm3, %v2990_v37, %v2984_v28  ;;  %v1514_v22 = vsel %vm209_vm3, %v2989_v8, %v2990_v37 }
 0x549   :  { %1730 = vmatpush.msrb.mxu3 %v1438_v36  ;;  %v1460_v15 = vsel %vm153_vm5, %v1457_v29, %v1459_v44 }
 0x54a   :  { %1691 = vmatpush.msrb.mxu1 %v1416_v18  ;;  %v1543_v49 = vsel %vm234_vm2, %v2980_v48, %v2974_v43  ;;  %v1538_v32 = vsel %vm234_vm2, %v2979_v34, %v2980_v48  ;;  %v1461_v43 = vsel %vm153_vm5, %v3015_v19, %v1457_v29 }
 0x54b   :  { %1731 = vmatpush.msrb.mxu3 %v1414_v33  ;;  %2651 = vmatmul.msk.f32.vlgmr.msrb.gmra.mxu1 %vm352_vm8, %v4355_v6  ;;  %v1409_v28 = vpop.permute.xlu0 %1408 }
 0x54c   :  { %1763 = vmatpush.msra.mxu1 %v1591_v46  ;;  %v1411_v53 = vpop.permute.xlu1 %1410  ;;  %2653 = vmatmul.msk.f32.vlgmr.msrb.gmra.mxu3 %vm352_vm8, %v4355_v6  ;;  %v1413_v8 = vsel %vm103_vm7, %v3030_v62, %v1409_v28 }
 0x54d   :  { %v1417_v30 = vsel %vm103_vm7, %v1411_v53, %v3029_v40 }
 0x54e   :  { %1764 = vmatpush.msra.mxu1 %v1567_v12  ;;  %1671 = vmatpush.msrb.mxu0 %v1417_v30 }
 0x54f   :  { %2650 = vmatmul.msk.f32.vlgmr.msrb.gmra.mxu0 %vm352_vm8, %v4355_v6 }
 0x550   :  { %1743 = vmatpush.msra.mxu0 %v1586_v24  ;;  %1765 = vmatpush.msra.mxu1 %v1543_v49 }
 0x552   :  { %1744 = vmatpush.msra.mxu0 %v1562_v38  ;;  %1766 = vmatpush.msra.mxu1 %v1519_v54 }
 0x554   :  { %1745 = vmatpush.msra.mxu0 %v1538_v32  ;;  %1767 = vmatpush.msra.mxu1 %v4194_v5  ;;  %v1433_v23 = vpop.permute.xlu1 %1432  ;;  %v1485_v5 = vsel %vm178_vm4, %v3005_v57, %v1481_v17 }
 0x555   :  { %v1436_v34 = vsel %vm128_vm6, %v1433_v23, %v1435_v25  ;;  %v1437_v20 = vsel %vm128_vm6, %v3025_v3, %v1433_v23 }
 0x556   :  { %1746 = vmatpush.msra.mxu0 %v1514_v22  ;;  %1768 = vmatpush.msra.mxu1 %v1484_v45 }
 0x558   :  { %1747 = vmatpush.msra.mxu0 %v4192_v41  ;;  %1769 = vmatpush.msra.mxu1 %v1460_v15  ;;  %v1412_v41 = vsel %vm103_vm7, %v1409_v28, %v1411_v53 }
 0x55a   :  { %1748 = vmatpush.msra.mxu0 %v1485_v5  ;;  %1770 = vmatpush.msra.mxu1 %v1436_v34 }
 0x55c   :  { %1749 = vmatpush.msra.mxu0 %v1461_v43  ;;  %1771 = vmatpush.msra.mxu1 %v1412_v41 }
 0x55d   :  { %2655 = vmatmul.msk.f32.vlgmr.msra.gmra.mxu1 %vm352_vm8, %v4355_v6 }
 0x55e   :  { %1750 = vmatpush.msra.mxu0 %v1437_v20 }
 0x560   :  { %1751 = vmatpush.msra.mxu0 %v1413_v8 }
 0x561   :  { %2654 = vmatmul.msk.f32.vlgmr.msra.gmra.mxu0 %vm352_vm8, %v4355_v6 }
 0x5b4   :  { %v4475_v60 = vpop.f32.mrf.mxu2 }
 0x5b5   :  { %v1778_v6 = vmul.f32 %v4475_v60, %v3709_v21  ;;  %v1848_v61 = vmul.f32 %v4475_v60, %v3718_v27 }
 0x5b7   :  { %v1807_v36 = vmul.f32 %v1778_v6, %v1778_v6  ;;  %v1870_v24 = vmul.f32 %v1848_v61, %v1848_v61 }
 0x5c8   :  { %v4467_v26 = vpop.f32.mrf.mxu1 }
 0x5c9   :  { %v1777_v44 = vmul.f32 %v4467_v26, %v3692_v11  ;;  %v1847_v25 = vmul.f32 %v4467_v26, %v3700_v4 }
 0x5cb   :  { %v1806_v3 = vmul.f32 %v1777_v44, %v1777_v44  ;;  %v1869_v33 = vmul.f32 %v1847_v25, %v1847_v25 }
 0x5cc   :  { %v4469_v9 = vpop.f32.mrf.mxu0 }
 0x5cd   :  { %v1776_v57 = vmul.f32 %v4469_v9, %v3689_v63  ;;  %v1846_v19 = vmul.f32 %v4469_v9, %v3695_v13 }
 0x5cf   :  { %v1805_v40 = vmul.f32 %v1776_v57, %v1776_v57  ;;  %v4483_v55 = vpop.f32.mrf.mxu3  ;;  %v1852_v62 = vadd.f32 %v1847_v25, %v1846_v19  ;;  %v1782_v35 = vadd.f32 %v1777_v44, %v1776_v57  ;;  %v1868_v18 = vmul.f32 %v1846_v19, %v1846_v19 }
 0x5d0   :  { %v1779_v46 = vmul.f32 %v4483_v55, %v3723_v31  ;;  %v1849_v37 = vmul.f32 %v4483_v55, %v3730_v39 }
 0x5d1   :  { %v1811_v1 = vadd.f32 %v1806_v3, %v1805_v40  ;;  %v1853_v48 = vadd.f32 %v1852_v62, %v1848_v61  ;;  %v1783_v12 = vadd.f32 %v1782_v35, %v1778_v6  ;;  %v1874_v30 = vadd.f32 %v1869_v33, %v1868_v18  ;;  %v1959_v61 = vld [vmem:[%s4908_s11] sm:$0xff] }
 0x5d2   :  { %v1808_v49 = vmul.f32 %v1779_v46, %v1779_v46  ;;  %v1871_v15 = vmul.f32 %v1849_v37, %v1849_v37  ;;  %v1947_v35 = vld [vmem:[%s4907_s10] sm:$0xff] }
 0x5d3   :  { %v1812_v17 = vadd.f32 %v1811_v1, %v1807_v36  ;;  %v1854_v32 = vadd.f32 %v1853_v48, %v1849_v37  ;;  %v1784_v23 = vadd.f32 %v1783_v12, %v1779_v46  ;;  %v1875_v34 = vadd.f32 %v1874_v30, %v1870_v24 }
 0x5d5   :  { %v1813_v5 = vadd.f32 %v1812_v17, %v1808_v49  ;;  %v1876_v6 = vadd.f32 %v1875_v34, %v1871_v15 }
 0x5da   :  { %v4491_v53 = vpop.f32.mrf.mxu1 }
 0x5db   :  { %v1781_v38 = vmul.f32 %v4491_v53, %v3746_v59  ;;  %v1851_v45 = vmul.f32 %v4491_v53, %v3743_v58 }
 0x5dd   :  { %v1810_v20 = vmul.f32 %v1781_v38, %v1781_v38  ;;  %v1873_v40 = vmul.f32 %v1851_v45, %v1851_v45 }
 0x5de   :  { %v4495_v54 = vpop.f32.mrf.mxu0 }
 0x5df   :  { %v1780_v29 = vmul.f32 %v4495_v54, %v3735_v47  ;;  %v1850_v22 = vmul.f32 %v4495_v54, %v3740_v56 }
 0x5e1   :  { %v1855_v28 = vadd.f32 %v1854_v32, %v1850_v22  ;;  %v1785_v43 = vadd.f32 %v1784_v23, %v1780_v29  ;;  %v1809_v41 = vmul.f32 %v1780_v29, %v1780_v29  ;;  %v1872_v19 = vmul.f32 %v1850_v22, %v1850_v22 }
 0x5e3   :  { %v1856_v8 = vadd.f32 %v1855_v28, %v1851_v45  ;;  %v1786_v57 = vadd.f32 %v1785_v43, %v1781_v38  ;;  %v1814_v44 = vadd.f32 %v1813_v5, %v1809_v41  ;;  %v1877_v3 = vadd.f32 %v1876_v6, %v1872_v19 }
 0x5e4   :  { %v3307_v19 = vmov 1024.0  }
 0x5e5   :  { %1857 = vadd.xlane.f32.xlu0 %v1856_v8  ;;  %1787 = vadd.xlane.f32.xlu2 %v1786_v57  ;;  %v1815_v25 = vadd.f32 %v1814_v44, %v1810_v20  ;;  %v1878_v62 = vadd.f32 %v1877_v3, %v1873_v40  ;;  %3185 = vrcp.f32 %v3307_v19 }
 0x5e7   :  { %1816 = vadd.xlane.f32.xlu1 %v1815_v25 }
 0x5eb   :  { %v3186_v25 = vpop.eup %3185 }
 0x5ec   :  { %v1798_v6 = vmul.f32 1024.0, %v3186_v25  ;;  %vm1802_vm15 = vweird.f32 %v3186_v25 }
 0x5ed   :  { %1879 = vadd.xlane.f32.xlu2 %v1878_v62 }
 0x5ee   :  { %v1799_v40 = vsub.f32 1.0, %v1798_v6 }
 0x5f0   :  { %v1800_v3 = vmul.f32 %v3186_v25, %v1799_v40 }
 0x5f2   :  { %v1801_v62 = vadd.f32 %v3186_v25, %v1800_v3 }
 0x5f9   :  { %1962 = vperm.xlu0 %2930, %v1959_v61   ;;  %v1803_v61 = vsel %vm1802_vm15, %v3186_v25, %v1801_v62 }
 0x600   :  { %1950 = vperm.xlu1 %2808, %v1947_v35  }
 0x658   :  { %v1858_v36 = vpop.xlane.xlu0 %1857  ;;  %v1788_v18 = vpop.xlane.xlu2 %1787 }
 0x659   :  { %v1859_v1 = vrot.slane %v1858_v36, 4  ;;  %v1789_v33 = vrot.slane %v1788_v18, 4 }
 0x65a   :  { %v1817_v46 = vpop.xlane.xlu1 %1816 }
 0x65b   :  { %v1860_v48 = vadd.f32 %v1859_v1, %v1858_v36  ;;  %v1790_v37 = vadd.f32 %v1789_v33, %v1788_v18  ;;  %v1818_v12 = vrot.slane %v1817_v46, 4 }
 0x65d   :  { %v1861_v30 = vrot.slane %v1860_v48, 2  ;;  %v1791_v24 = vrot.slane %v1790_v37, 2  ;;  %v1819_v49 = vadd.f32 %v1818_v12, %v1817_v46 }
 0x65f   :  { %v1820_v17 = vrot.slane %v1819_v49, 2  ;;  %v1792_v38 = vadd.f32 %v1791_v24, %v1790_v37  ;;  %v1862_v32 = vadd.f32 %v1861_v30, %v1860_v48 }
 0x660   :  { %v1880_v29 = vpop.xlane.xlu2 %1879 }
 0x661   :  { %v1881_v22 = vrot.slane %v1880_v29, 4  ;;  %v1793_v45 = vrot.slane %v1792_v38, 1  ;;  %v1821_v23 = vadd.f32 %v1820_v17, %v1819_v49  ;;  %v1863_v15 = vrot.slane %v1862_v32, 1 }
 0x663   :  { %v1882_v5 = vadd.f32 %v1881_v22, %v1880_v29  ;;  %v1794_v34 = vadd.f32 %v1793_v45, %v1792_v38  ;;  %v1822_v28 = vrot.slane %v1821_v23, 1  ;;  %v1864_v20 = vadd.f32 %v1863_v15, %v1862_v32 }
 0x665   :  { %v1883_v43 = vrot.slane %v1882_v5, 2  ;;  %2678 = vpush %v1794_v34  ;;  %v1823_v41 = vadd.f32 %v1822_v28, %v1821_v23 }
 0x667   :  { %2680 = vpush %v1823_v41  ;;  %v1884_v8 = vadd.f32 %v1883_v43, %v1882_v5 }
 0x668   :  { %2682 = vpush %v1864_v20 }
 0x669   :  { %v1885_v57 = vrot.slane %v1884_v8, 1 }
 0x66b   :  { %v1886_v44 = vadd.f32 %v1885_v57, %v1884_v8 }
 0x66d   :  { %2684 = vpush %v1886_v44 }
 0x696   :  { %s2679_s10 = spop %2678 }
 0x697   :  { %v1796_v35 = vstv %s2679_s10 }
 0x698   :  { %v1804_v36 = vmul.f32 %v1803_v61, %v1796_v35  ;;  %s2681_s11 = spop %2680 }
 0x699   :  { %v1825_v18 = vstv %s2681_s11  ;;  %s2683_s23 = spop %2682 }
 0x69a   :  { %v1827_v1 = vmul.f32 %v1804_v36, %v1804_v36  ;;  %v1826_v33 = vmul.f32 %v1825_v18, %v1803_v61  ;;  %v1866_v46 = vstv %s2683_s23 }
 0x69b   :  { %v1867_v37 = vmul.f32 %v1866_v46, %v1803_v61 }
 0x69c   :  { %v1828_v48 = vsub.f32 %v1826_v33, %v1827_v1 }
 0x69d   :  { %v1890_v49 = vmul.f32 %v1867_v37, %v1867_v37 }
 0x69e   :  { %v1829_v12 = vmax.f32 %v1828_v48, 0.0  ;;  %s2685_s24 = spop %2684 }
 0x69f   :  { %v1888_v30 = vstv %s2685_s24 }
 0x6a0   :  { %v1830_v24 = vadd.f32 1e-05, %v1829_v12  ;;  %v1889_v17 = vmul.f32 %v1888_v30, %v1803_v61 }
 0x6a2   :  { %3187 = vrsqrt.f32 %v1830_v24  ;;  %v1891_v38 = vsub.f32 %v1889_v17, %v1890_v49  ;;  %vm1837_vm10 = vweird.f32 %v1830_v24 }
 0x6a4   :  { %v1892_v32 = vmax.f32 %v1891_v38, 0.0 }
 0x6a6   :  { %v1893_v29 = vadd.f32 1e-05, %v1892_v32 }
 0x6a8   :  { %v3188_v22 = vpop.eup %3187  ;;  %3189 = vrsqrt.f32 %v1893_v29  ;;  %vm1900_vm13 = vweird.f32 %v1893_v29 }
 0x6a9   :  { %v1832_v45 = vmul.f32 %v3188_v22, %v1830_v24  ;;  %vm1838_vm9 = vweird.f32 %v3188_v22 }
 0x6aa   :  { %vm1839_vm11 = vmor %vm1837_vm10, %vm1838_vm9 }
 0x6ab   :  { %v1833_v23 = vmul.f32 %v3188_v22, %v1832_v45 }
 0x6ad   :  { %v1834_v15 = vmul.f32 0.5, %v1833_v23 }
 0x6ae   :  { %v3190_v5 = vpop.eup %3189 }
 0x6af   :  { %v1835_v34 = vsub.f32 1.5, %v1834_v15  ;;  %v1895_v28 = vmul.f32 %v3190_v5, %v1893_v29  ;;  %vm1901_vm12 = vweird.f32 %v3190_v5 }
 0x6b0   :  { %vm1902_vm14 = vmor %vm1900_vm13, %vm1901_vm12 }
 0x6b1   :  { %v1836_v43 = vmul.f32 %v3188_v22, %v1835_v34  ;;  %v1896_v41 = vmul.f32 %v3190_v5, %v1895_v28  ;;  %v1951_v34 = vpop.permute.xlu1 %1950 }
 0x6b3   :  { %v1840_v20 = vsel %vm1839_vm11, %v3188_v22, %v1836_v43  ;;  %v1897_v8 = vmul.f32 0.5, %v1896_v41 }
 0x6b4   :  { %v1843_v57 = vmul.f32 %v1840_v20, %v1804_v36  ;;  %v1841_v40 = vmul.f32 %v4153_v51, %v1840_v20  ;;  %v1963_v20 = vpop.permute.xlu0 %1962 }
 0x6b5   :  { %v1898_v44 = vsub.f32 1.5, %v1897_v8 }
 0x6b6   :  { %v1844_v25 = vmul.f32 %v4153_v51, %v1843_v57 }
 0x6b7   :  { %v1899_v19 = vmul.f32 %v3190_v5, %v1898_v44 }
 0x6b8   :  { %v1845_v61 = vsub.f32 0.0, %v1844_v25 }
 0x6b9   :  { %v1903_v6 = vsel %vm1902_vm14, %v3190_v5, %v1899_v19 }
 0x6ba   :  { %v1904_v3 = vmul.f32 %v4160_v42, %v1903_v6  ;;  %v1906_v62 = vmul.f32 %v1903_v6, %v1867_v37 }
 0x6bc   :  { %v1905_v35 = vadd.f32 %v1904_v3, %v1841_v40  ;;  %v1907_v18 = vmul.f32 %v4160_v42, %v1906_v62 }
 0x6be   :  { %v1908_v1 = vsub.f32 %v1845_v61, %v1907_v18  ;;  %v1910_v33 = vperm.slane %v1905_v35, 0  ;;  %v1911_v36 = vperm.slane %v1905_v35, 1  ;;  %v1912_v46 = vperm.slane %v1905_v35, 2 }
 0x6bf   :  { %v1913_v48 = vperm.slane %v1905_v35, 3  ;;  %v1914_v12 = vperm.slane %v1905_v35, 4  ;;  %v1915_v30 = vperm.slane %v1905_v35, 5 }
 0x6c0   :  { %v1922_v24 = vmul.f32 %v1910_v33, %v4469_v9  ;;  %v1923_v49 = vmul.f32 %v1911_v36, %v4467_v26  ;;  %v1924_v51 = vmul.f32 %v1912_v46, %v4475_v60  ;;  %v1929_v17 = vperm.slane %v1908_v1, 0 }
 0x6c1   :  { %v1925_v37 = vmul.f32 %v1913_v48, %v4483_v55  ;;  %v1926_v38 = vmul.f32 %v1914_v12, %v4495_v54  ;;  %v1927_v42 = vmul.f32 %v1915_v30, %v4491_v53  ;;  %v1930_v32 = vperm.slane %v1908_v1, 1 }
 0x6c2   :  { %v1931_v29 = vperm.slane %v1908_v1, 2  ;;  %v1932_v22 = vperm.slane %v1908_v1, 3  ;;  %v1933_v45 = vperm.slane %v1908_v1, 4  ;;  %v1934_v23 = vperm.slane %v1908_v1, 5 }
 0x6c3   :  { %v1941_v15 = vadd.f32 %v1929_v17, %v1922_v24  ;;  %v1942_v5 = vadd.f32 %v1930_v32, %v1923_v49 }
 0x6c4   :  { %v1943_v9 = vadd.f32 %v1931_v29, %v1924_v51  ;;  %v1944_v28 = vadd.f32 %v1932_v22, %v1925_v37  ;;  %v1945_v26 = vadd.f32 %v1933_v45, %v1926_v38  ;;  %v1946_v43 = vadd.f32 %v1934_v23, %v1927_v42 }
 0x6c5   :  { %v1953_v60 = vmul.f32 %v1951_v34, %v1941_v15  ;;  %v1954_v41 = vmul.f32 %v1951_v34, %v1942_v5 }
 0x6c6   :  { %v1955_v55 = vmul.f32 %v1951_v34, %v1943_v9  ;;  %v1956_v8 = vmul.f32 %v1951_v34, %v1944_v28  ;;  %v1957_v54 = vmul.f32 %v1951_v34, %v1945_v26  ;;  %v1958_v57 = vmul.f32 %v1951_v34, %v1946_v43 }
 0x6c7   :  { %v1965_v53 = vadd.f32 %v1963_v20, %v1953_v60  ;;  %v1966_v44 = vadd.f32 %v1963_v20, %v1954_v41 }
 0x6c8   :  { %v1967_v19 = vadd.f32 %v1963_v20, %v1955_v55  ;;  %v1968_v25 = vadd.f32 %v1963_v20, %v1956_v8  ;;  %v1969_v6 = vadd.f32 %v1963_v20, %v1957_v54  ;;  %v1970_v40 = vadd.f32 %v1963_v20, %v1958_v57 }
 0x6c9   :  { %v1971_v3 = vmul.f32 %v1965_v53, %v3784_v2  ;;  %v1972_v62 = vmul.f32 %v1966_v44, %v3786_v16 }
 0x6ca   :  { %v1973_v61 = vmul.f32 %v1967_v19, %v3788_v10  ;;  %v4523_v35 = vmul.f32 %v1968_v25, %v3801_v52  ;;  %v1975_v18 = vmul.f32 %v1969_v6, %v3790_v50  ;;  %v4527_v1 = vmul.f32 %v1970_v40, %v3792_v0 }
 0x6cb   :  { %v1983_v33 = vmul.f32 0.044715, %v1971_v3  ;;  %v1984_v36 = vmul.f32 0.044715, %v1972_v62  ;;  %v1977_v25 = vmul.f32 0.5, %v1971_v3 }
 0x6cc   :  { %v1985_v46 = vmul.f32 0.044715, %v1973_v61  ;;  %v1987_v48 = vmul.f32 0.044715, %v1975_v18  ;;  %v1986_v51 = vmul.f32 0.044715, %v4523_v35 }
 0x6cd   :  { %v1989_v12 = vmul.f32 %v1983_v33, %v1971_v3  ;;  %v1990_v30 = vmul.f32 %v1984_v36, %v1972_v62  ;;  %v1988_v17 = vmul.f32 0.044715, %v4527_v1  ;;  %v1979_v44 = vmul.f32 0.5, %v1973_v61 }
 0x6ce   :  { %v1991_v24 = vmul.f32 %v1985_v46, %v1973_v61  ;;  %v1993_v49 = vmul.f32 %v1987_v48, %v1975_v18  ;;  %v1992_v29 = vmul.f32 %v1986_v51, %v4523_v35  ;;  %v1981_v33 = vmul.f32 0.5, %v1975_v18 }
 0x6cf   :  { %v1995_v37 = vmul.f32 %v1989_v12, %v1971_v3  ;;  %v1996_v38 = vmul.f32 %v1990_v30, %v1972_v62  ;;  %v1994_v23 = vmul.f32 %v1988_v17, %v4527_v1  ;;  %v1978_v48 = vmul.f32 0.5, %v1972_v62 }
 0x6d0   :  { %v1997_v42 = vmul.f32 %v1991_v24, %v1973_v61  ;;  %v1999_v32 = vmul.f32 %v1993_v49, %v1975_v18  ;;  %v1998_v43 = vmul.f32 %v1992_v29, %v4523_v35 }
 0x6d1   :  { %v2001_v22 = vadd.f32 %v1995_v37, %v1971_v3  ;;  %v2002_v45 = vadd.f32 %v1996_v38, %v1972_v62  ;;  %v2000_v60 = vmul.f32 %v1994_v23, %v4527_v1  ;;  %v1980_v37 = vmul.f32 0.5, %v4523_v35 }
 0x6d2   :  { %v2003_v15 = vadd.f32 %v1997_v42, %v1973_v61  ;;  %v2005_v5 = vadd.f32 %v1999_v32, %v1975_v18  ;;  %v2004_v41 = vadd.f32 %v1998_v43, %v4523_v35  ;;  %v1982_v38 = vmul.f32 0.5, %v4527_v1 }
 0x6d3   :  { %v2007_v34 = vmul.f32 0.7978846, %v2001_v22  ;;  %v2008_v26 = vmul.f32 0.7978846, %v2002_v45  ;;  %v2006_v20 = vadd.f32 %v2000_v60, %v4527_v1 }
 0x6d4   :  { %v2009_v9 = vmul.f32 0.7978846, %v2003_v15  ;;  %v2011_v28 = vmul.f32 0.7978846, %v2005_v5  ;;  %v2010_v57 = vmul.f32 0.7978846, %v2004_v41 }
 0x6d5   :  { %3191 = vtanh.f32 %v2007_v34  ;;  %v2012_v6 = vmul.f32 0.7978846, %v2006_v20 }
 0x6d6   :  { %3193 = vtanh.f32 %v2009_v9 }
 0x6d7   :  { %3195 = vtanh.f32 %v2011_v28 }
 0x6d8   :  { %3197 = vtanh.f32 %v2008_v26 }
 0x6d9   :  { %3199 = vtanh.f32 %v2010_v57 }
 0x6da   :  { %3201 = vtanh.f32 %v2012_v6 }
 0x6db   :  { %v3192_v55 = vpop.eup %3191 }
 0x6dc   :  { %v3194_v8 = vpop.eup %3193  ;;  %v2019_v54 = vadd.f32 1.0, %v3192_v55 }
 0x6dd   :  { %v3196_v53 = vpop.eup %3195  ;;  %v2021_v19 = vadd.f32 1.0, %v3194_v8 }
 0x6de   :  { %v3198_v40 = vpop.eup %3197  ;;  %v2023_v36 = vadd.f32 1.0, %v3196_v53  ;;  %v4539_v30 = vmul.f32 %v2019_v54, %v1977_v25 }
 0x6df   :  { %v4537_v46 = vmul.f32 %v2021_v19, %v1979_v44  ;;  %v2020_v12 = vadd.f32 1.0, %v3198_v40  ;;  %v3200_v62 = vpop.eup %3199 }
 0x6e0   :  { %v4541_v24 = vmul.f32 %v2023_v36, %v1981_v33  ;;  %v3202_v18 = vpop.eup %3201  ;;  %v2022_v51 = vadd.f32 1.0, %v3200_v62 }
 0x6e1   :  { %v4543_v49 = vmul.f32 %v2020_v12, %v1978_v48  ;;  %v2024_v17 = vadd.f32 1.0, %v3202_v18 }
 0x6e2   :  { %v3041_v61 = vpack.i.bf16 %v4541_v24, %v4537_v46  ;;  %v4557_v42 = vmul.f32 %v2022_v51, %v1980_v37  ;;  %v3131_v22 = vpack.i.bf16 %v4537_v46, %v4541_v24 }
 0x6e3   :  { %v3036_v3 = vpack.i.bf16 %v4543_v49, %v4539_v30  ;;  %v4559_v32 = vmul.f32 %v2024_v17, %v1982_v38 }
 0x6e4   :  { %3042 = vrot.lane.b32.xlu1 %v3041_v61, %s3297_s0  ;;  %v3091_v1 = vpack.i.bf16 %v4557_v42, %v4543_v49 }
 0x6e5   :  { %3037 = vrot.lane.b32.xlu0 %v3036_v3, %s3299_s28  ;;  %3032 = vrot.lane.b32.xlu2 %v3036_v3, %s3297_s0  ;;  %v3071_v29 = vpack.i.bf16 %v4557_v42, %v4559_v32  ;;  %v3086_v35 = vpack.i.bf16 %v4559_v32, %v4539_v30 }
 0x6ec   :  { %3057 = vrot.lane.b32.xlu1 %v3036_v3, %s3300_s29 }
 0x6ed   :  { %3052 = vrot.lane.b32.xlu0 %v3041_v61, %s3299_s28  ;;  %3047 = vrot.lane.b32.xlu2 %v3036_v3, %s3298_s2 }
 0x6f4   :  { %3072 = vrot.lane.b32.xlu1 %v3071_v29, %s3297_s0 }
 0x6f5   :  { %3067 = vrot.lane.b32.xlu0 %v3041_v61, %s3300_s29  ;;  %3062 = vrot.lane.b32.xlu2 %v3041_v61, %s3298_s2 }
 0x6fc   :  { %3087 = vrot.lane.b32.xlu1 %v3086_v35, %s3302_s16 }
 0x6fd   :  { %3082 = vrot.lane.b32.xlu0 %v3071_v29, %s3299_s28  ;;  %3077 = vrot.lane.b32.xlu2 %v3086_v35, %s3301_s30 }
 0x704   :  { %3102 = vrot.lane.b32.xlu1 %v3086_v35, %s3303_s17 }
 0x705   :  { %3097 = vrot.lane.b32.xlu0 %v3071_v29, %s3298_s2  ;;  %3092 = vrot.lane.b32.xlu2 %v3091_v1, %s3301_s30 }
 0x70c   :  { %3117 = vrot.lane.b32.xlu1 %v3086_v35, %s3304_s18 }
 0x70d   :  { %3112 = vrot.lane.b32.xlu0 %v3071_v29, %s3300_s29  ;;  %3107 = vrot.lane.b32.xlu2 %v3091_v1, %s3302_s16 }
 0x714   :  { %3132 = vrot.lane.b32.xlu1 %v3131_v22, %s3301_s30 }
 0x715   :  { %3127 = vrot.lane.b32.xlu0 %v3091_v1, %s3304_s18  ;;  %3122 = vrot.lane.b32.xlu2 %v3091_v1, %s3303_s17 }
 0x71c   :  { %3147 = vrot.lane.b32.xlu1 %v3131_v22, %s3304_s18 }
 0x71d   :  { %3142 = vrot.lane.b32.xlu0 %v3131_v22, %s3303_s17  ;;  %3137 = vrot.lane.b32.xlu2 %v3131_v22, %s3302_s16 }
 0x73f   :  { %v4587_v45 = vpop.permute.xlu2 %3032 }
 0x740   :  { %v3035_v23 = vunpack.i.h.bf16 %v4587_v45  ;;  %v3034_v15 = vunpack.i.l.bf16 %v4587_v45 }
 0x742   :  { %v2221_v5 = vsel %vm284_vm0, %v3034_v15, %v3035_v23 }
 0x743   :  { %2294 = vmatpush.msra.mxu2 %v2221_v5 }
 0x747   :  { %v4595_v34 = vpop.permute.xlu2 %3047 }
 0x748   :  { %v3050_v41 = vunpack.i.h.bf16 %v4595_v34  ;;  %v3049_v20 = vunpack.i.l.bf16 %v4595_v34 }
 0x74a   :  { %v2173_v53 = vsel %vm234_vm2, %v3049_v20, %v3050_v41 }
 0x74f   :  { %v4597_v9 = vpop.permute.xlu2 %3062 }
 0x750   :  { %v3064_v40 = vunpack.i.l.bf16 %v4597_v9 }
 0x752   :  { %v2172_v62 = vsel %vm234_vm2, %v3050_v41, %v3064_v40 }
 0x756   :  { %v4599_v28 = vpop.permute.xlu1 %3042 }
 0x757   :  { %v3044_v26 = vunpack.i.l.bf16 %v4599_v28  ;;  %v4602_v43 = vpop.permute.xlu0 %3037  ;;  %v4604_v60 = vpop.permute.xlu2 %3077  ;;  %v3045_v17 = vunpack.i.h.bf16 %v4599_v28 }
 0x758   :  { %v3040_v55 = vunpack.i.h.bf16 %v4602_v43  ;;  %v3039_v8 = vunpack.i.l.bf16 %v4602_v43  ;;  %v3080_v48 = vunpack.i.h.bf16 %v4604_v60  ;;  %v3079_v12 = vunpack.i.l.bf16 %v4604_v60 }
 0x759   :  { %v2220_v54 = vsel %vm284_vm0, %v3035_v23, %v3044_v26 }
 0x75a   :  { %v2197_v57 = vsel %vm259_vm1, %v3039_v8, %v3040_v55  ;;  %2314 = vmatpush.msra.mxu3 %v2220_v54  ;;  %v2120_v18 = vsel %vm178_vm4, %v3080_v48, %v3079_v12 }
 0x75b   :  { %2295 = vmatpush.msra.mxu2 %v2197_v57 }
 0x75d   :  { %2296 = vmatpush.msra.mxu2 %v2173_v53 }
 0x75e   :  { %v4620_v44 = vpop.permute.xlu1 %3057 }
 0x75f   :  { %v3060_v19 = vunpack.i.h.bf16 %v4620_v44  ;;  %v3059_v25 = vunpack.i.l.bf16 %v4620_v44  ;;  %v4624_v6 = vpop.permute.xlu0 %3052  ;;  %v4628_v36 = vpop.permute.xlu2 %3092 }
 0x760   :  { %v3054_v33 = vunpack.i.l.bf16 %v4624_v6  ;;  %v3094_v1 = vunpack.i.l.bf16 %v4628_v36  ;;  %v3055_v57 = vunpack.i.h.bf16 %v4624_v6 }
 0x761   :  { %v2149_v61 = vsel %vm209_vm3, %v3059_v25, %v3060_v19 }
 0x762   :  { %2297 = vmatpush.msra.mxu2 %v2149_v61  ;;  %v2196_v3 = vsel %vm259_vm1, %v3040_v55, %v3054_v33  ;;  %v2119_v28 = vsel %vm178_vm4, %v3079_v12, %v3094_v1 }
 0x763   :  { %2315 = vmatpush.msra.mxu3 %v2196_v3 }
 0x764   :  { %2298 = vmatpush.msra.mxu2 %v4539_v30 }
 0x765   :  { %2316 = vmatpush.msra.mxu3 %v2172_v62 }
 0x766   :  { %v4645_v51 = vpop.permute.xlu1 %3072  ;;  %2299 = vmatpush.msra.mxu2 %v2120_v18 }
 0x767   :  { %v3075_v37 = vunpack.i.h.bf16 %v4645_v51  ;;  %v4649_v38 = vpop.permute.xlu0 %3067  ;;  %v4657_v22 = vpop.permute.xlu2 %3107 }
 0x768   :  { %v3069_v30 = vunpack.i.l.bf16 %v4649_v38 }
 0x769   :  { %v2219_v29 = vsel %vm284_vm0, %v3044_v26, %v3075_v37  ;;  %v2218_v35 = vsel %vm284_vm0, %v3075_v37, %v3045_v17  ;;  %v3109_v26 = vunpack.i.l.bf16 %v4657_v22 }
 0x76a   :  { %v2148_v23 = vsel %vm209_vm3, %v3060_v19, %v3069_v30  ;;  %2334 = vmatpush.msrb.mxu0 %v2219_v29  ;;  %2354 = vmatpush.msrb.mxu1 %v2218_v35  ;;  %v3065_v35 = vunpack.i.h.bf16 %v4597_v9 }
 0x76b   :  { %2317 = vmatpush.msra.mxu3 %v2148_v23 }
 0x76d   :  { %2318 = vmatpush.msra.mxu3 %v4543_v49 }
 0x76e   :  { %v4662_v5 = vpop.permute.xlu1 %3087 }
 0x76f   :  { %v3090_v41 = vunpack.i.h.bf16 %v4662_v5  ;;  %v3089_v55 = vunpack.i.l.bf16 %v4662_v5  ;;  %v4671_v54 = vpop.permute.xlu0 %3082  ;;  %2319 = vmatpush.msra.mxu3 %v2119_v28  ;;  %v4687_v61 = vpop.permute.xlu2 %3122 }
 0x770   :  { %v3085_v49 = vunpack.i.h.bf16 %v4671_v54  ;;  %v3124_v62 = vunpack.i.l.bf16 %v4687_v61  ;;  %v3125_v43 = vunpack.i.h.bf16 %v4687_v61 }
 0x771   :  { %v2096_v53 = vsel %vm153_vm5, %v3090_v41, %v3089_v55  ;;  %v2095_v19 = vsel %vm153_vm5, %v3089_v55, %v3109_v26 }
 0x772   :  { %2300 = vmatpush.msra.mxu2 %v2096_v53  ;;  %2320 = vmatpush.msra.mxu3 %v2095_v19  ;;  %v2195_v12 = vsel %vm259_vm1, %v3054_v33, %v3085_v49  ;;  %v2194_v6 = vsel %vm259_vm1, %v3085_v49, %v3055_v57  ;;  %v3074_v53 = vunpack.i.l.bf16 %v4645_v51 }
 0x773   :  { %2335 = vmatpush.msrb.mxu0 %v2195_v12  ;;  %2355 = vmatpush.msrb.mxu1 %v2194_v6 }
 0x776   :  { %v4689_v3 = vpop.permute.xlu1 %3102 }
 0x777   :  { %v3105_v18 = vunpack.i.h.bf16 %v4689_v3  ;;  %v3104_v37 = vunpack.i.l.bf16 %v4689_v3  ;;  %v4694_v29 = vpop.permute.xlu0 %3097 }
 0x778   :  { %v3100_v33 = vunpack.i.h.bf16 %v4694_v29 }
 0x779   :  { %v2072_v23 = vsel %vm128_vm6, %v3105_v18, %v3104_v37  ;;  %v2071_v28 = vsel %vm128_vm6, %v3104_v37, %v3124_v62  ;;  %v3070_v37 = vunpack.i.h.bf16 %v4649_v38  ;;  %v2217_v38 = vsel %vm284_vm0, %v3045_v17, %v3074_v53 }
 0x77a   :  { %2301 = vmatpush.msra.mxu2 %v2072_v23  ;;  %2321 = vmatpush.msra.mxu3 %v2071_v28  ;;  %v2171_v55 = vsel %vm234_vm2, %v3064_v40, %v3100_v33  ;;  %v2170_v9 = vsel %vm234_vm2, %v3100_v33, %v3065_v35  ;;  %v3084_v40 = vunpack.i.l.bf16 %v4671_v54  ;;  %v4734_v54 = vld [vmem:[%s4909_s12] sm:$0xff]  ;;  %v3095_v17 = vunpack.i.h.bf16 %v4628_v36 }
 0x77b   :  { %2336 = vmatpush.msrb.mxu0 %v2171_v55  ;;  %2356 = vmatpush.msrb.mxu1 %v2170_v9  ;;  %v3099_v55 = vunpack.i.l.bf16 %v4694_v29  ;;  %v4736_v9 = vpop.permute.xlu2 %3137  ;;  %v2222_v36 = vsel %vm284_vm0, %v3074_v53, %v3034_v15 }
 0x77c   :  { %v2193_v29 = vsel %vm259_vm1, %v3055_v57, %v3084_v40  ;;  %v2198_v45 = vsel %vm259_vm1, %v3084_v40, %v3039_v8 }
 0x77e   :  { %v4710_v49 = vpop.permute.xlu1 %3117 }
 0x77f   :  { %v4913_v19 = vunpack.i.h.bf16 %v4710_v49  ;;  %v3119_v12 = vunpack.i.l.bf16 %v4710_v49  ;;  %v4715_v6 = vpop.permute.xlu0 %3112 }
 0x780   :  { %v3115_v23 = vunpack.i.h.bf16 %v4715_v6 }
 0x781   :  { %v2048_v33 = vsel %vm103_vm7, %v4913_v19, %v3119_v12 }
 0x782   :  { %2302 = vmatpush.msra.mxu2 %v2048_v33  ;;  %v2147_v51 = vsel %vm209_vm3, %v3069_v30, %v3115_v23  ;;  %v2146_v28 = vsel %vm209_vm3, %v3115_v23, %v3070_v37  ;;  %v3114_v30 = vunpack.i.l.bf16 %v4715_v6  ;;  %v3140_v6 = vunpack.i.h.bf16 %v4736_v9 }
 0x783   :  { %2337 = vmatpush.msrb.mxu0 %v2147_v51  ;;  %2357 = vmatpush.msrb.mxu1 %v2146_v28  ;;  %v2169_v28 = vsel %vm234_vm2, %v3065_v35, %v3099_v55  ;;  %v3110_v35 = vunpack.i.h.bf16 %v4657_v22 }
 0x784   :  { %2374 = vmatpush.msrb.mxu2 %v2217_v38  ;;  %v2145_v57 = vsel %vm209_vm3, %v3070_v37, %v3114_v30 }
 0x785   :  { %2338 = vmatpush.msrb.mxu0 %v4537_v46  ;;  %2358 = vmatpush.msrb.mxu1 %v4557_v42 }
 0x786   :  { %2375 = vmatpush.msrb.mxu2 %v2193_v29  ;;  %v3133_v23 = vpop.permute.xlu1 %3132 }
 0x787   :  { %v3135_v33 = vunpack.i.h.bf16 %v3133_v23  ;;  %v3128_v51 = vpop.permute.xlu0 %3127  ;;  %2656 = vmatmul.msk.f32.vlgmr.msra.gmra.mxu2 %vm352_vm8, %v4734_v54  ;;  %v3134_v42 = vunpack.i.l.bf16 %v3133_v23  ;;  %v3139_v23 = vunpack.i.l.bf16 %v4736_v9  ;;  %v2150_v9 = vsel %vm209_vm3, %v3114_v30, %v3059_v25 }
 0x788   :  { %v3129_v46 = vunpack.i.l.bf16 %v3128_v51  ;;  %2376 = vmatpush.msrb.mxu2 %v2169_v28  ;;  %v3130_v34 = vunpack.i.h.bf16 %v3128_v51 }
 0x789   :  { %v2118_v38 = vsel %vm178_vm4, %v3094_v1, %v3135_v33  ;;  %v2117_v29 = vsel %vm178_vm4, %v3135_v33, %v3095_v17  ;;  %v2094_v1 = vsel %vm153_vm5, %v3109_v26, %v3140_v6  ;;  %v2092_v22 = vsel %vm153_vm5, %v3110_v35, %v3139_v23 }
 0x78a   :  { %2377 = vmatpush.msrb.mxu2 %v2145_v57  ;;  %v2047_v19 = vsel %vm103_vm7, %v3119_v12, %v3129_v46  ;;  %2339 = vmatpush.msrb.mxu0 %v2118_v38  ;;  %v2093_v12 = vsel %vm153_vm5, %v3140_v6, %v3110_v35  ;;  %v2174_v26 = vsel %vm234_vm2, %v3099_v55, %v3049_v20 }
 0x78b   :  { %2322 = vmatpush.msra.mxu3 %v2047_v19  ;;  %2359 = vmatpush.msrb.mxu1 %v2117_v29  ;;  %v2116_v19 = vsel %vm178_vm4, %v3095_v17, %v3134_v42 }
 0x78c   :  { %2378 = vmatpush.msrb.mxu2 %v4541_v24  ;;  %2340 = vmatpush.msrb.mxu0 %v2094_v1 }
 0x78d   :  { %2394 = vmatpush.msrb.mxu3 %v2222_v36  ;;  %2360 = vmatpush.msrb.mxu1 %v2093_v12 }
 0x78e   :  { %2379 = vmatpush.msrb.mxu2 %v2116_v19  ;;  %v3148_v24 = vpop.permute.xlu1 %3147  ;;  %2657 = vmatmul.msk.f32.vlgmr.msra.gmra.mxu3 %vm352_vm8, %v4734_v54 }
 0x78f   :  { %2395 = vmatpush.msrb.mxu3 %v2198_v45  ;;  %v3143_v15 = vpop.permute.xlu0 %3142  ;;  %v3150_v53 = vunpack.i.h.bf16 %v3148_v24  ;;  %v3149_v40 = vunpack.i.l.bf16 %v3148_v24 }
 0x790   :  { %v3145_v37 = vunpack.i.h.bf16 %v3143_v15  ;;  %v3144_v8 = vunpack.i.l.bf16 %v3143_v15  ;;  %2380 = vmatpush.msrb.mxu2 %v2092_v22 }
 0x791   :  { %2396 = vmatpush.msrb.mxu3 %v2174_v26  ;;  %v2046_v44 = vsel %vm103_vm7, %v3129_v46, %v3150_v53  ;;  %v2045_v25 = vsel %vm103_vm7, %v3150_v53, %v3130_v34  ;;  %v2044_v61 = vsel %vm103_vm7, %v3130_v34, %v3149_v40 }
 0x792   :  { %v2070_v20 = vsel %vm128_vm6, %v3124_v62, %v3145_v37  ;;  %v2069_v55 = vsel %vm128_vm6, %v3145_v37, %v3125_v43  ;;  %v2068_v17 = vsel %vm128_vm6, %v3125_v43, %v3144_v8  ;;  %v2115_v62 = vsel %vm178_vm4, %v3134_v42, %v3080_v48 }
 0x793   :  { %2397 = vmatpush.msrb.mxu3 %v2150_v9  ;;  %2341 = vmatpush.msrb.mxu0 %v2070_v20  ;;  %v2067_v60 = vsel %vm128_vm6, %v3144_v8, %v3105_v18  ;;  %v4914_v48 = vunpack.i.h.bf16 %v4710_v49 }
 0x794   :  { %2361 = vmatpush.msrb.mxu1 %v2069_v55  ;;  %2381 = vmatpush.msrb.mxu2 %v2068_v17 }
 0x795   :  { %2398 = vmatpush.msrb.mxu3 %v4559_v32  ;;  %2342 = vmatpush.msrb.mxu0 %v2046_v44  ;;  %v2091_v32 = vsel %vm153_vm5, %v3139_v23, %v3090_v41  ;;  %v2043_v5 = vsel %vm103_vm7, %v3149_v40, %v4914_v48 }
 0x796   :  { %2362 = vmatpush.msrb.mxu1 %v2045_v25  ;;  %2382 = vmatpush.msrb.mxu2 %v2044_v61 }
 0x797   :  { %2399 = vmatpush.msrb.mxu3 %v2115_v62  ;;  %2660 = vmatmul.msk.f32.vlgmr.msrb.gmra.mxu2 %vm352_vm8, %v4734_v54 }
 0x798   :  { %2658 = vmatmul.msk.f32.vlgmr.msrb.gmra.mxu0 %vm352_vm8, %v4734_v54  ;;  %2659 = vmatmul.msk.f32.vlgmr.msrb.gmra.mxu1 %vm352_vm8, %v4734_v54 }
 0x799   :  { %2400 = vmatpush.msrb.mxu3 %v2091_v32 }
 0x79b   :  { %2401 = vmatpush.msrb.mxu3 %v2067_v60 }
 0x79d   :  { %2402 = vmatpush.msrb.mxu3 %v2043_v5 }
 0x79e   :  { %2661 = vmatmul.msk.f32.vlgmr.msrb.gmra.mxu3 %vm352_vm8, %v4734_v54 }
 0x80a   :  { %v4830_v41 = vpop.f32.mrf.mxu2 }
 0x80b   :  { %v2407_v30 = vmul.f32 %v4830_v41, %v3689_v63  ;;  %v2470_v3 = vmul.f32 %v4830_v41, %v3695_v13 }
 0x80d   :  { %v2429_v18 = vmul.f32 %v2407_v30, %v2407_v30  ;;  %v2492_v57 = vmul.f32 %v2470_v3, %v2470_v3 }
 0x811   :  { %v4836_v33 = vpop.f32.mrf.mxu3 }
 0x812   :  { %v2408_v49 = vmul.f32 %v4836_v33, %v3692_v11  ;;  %v2471_v14 = vmul.f32 %v4836_v33, %v3700_v4 }
 0x814   :  { %v2413_v54 = vadd.f32 %v2408_v49, %v2407_v30  ;;  %v2430_v28 = vmul.f32 %v2408_v49, %v2408_v49  ;;  %v2476_v6 = vadd.f32 %v2471_v14, %v2470_v3  ;;  %v2493_v38 = vmul.f32 %v2471_v14, %v2471_v14 }
 0x815   :  { %v4842_v51 = vpop.f32.mrf.mxu0  ;;  %v4844_v46 = vpop.f32.mrf.mxu1 }
 0x816   :  { %v2409_v63 = vmul.f32 %v4842_v51, %v3709_v21  ;;  %v2472_v13 = vmul.f32 %v4842_v51, %v3718_v27  ;;  %v2435_v42 = vadd.f32 %v2430_v28, %v2429_v18  ;;  %v2410_v11 = vmul.f32 %v4844_v46, %v3723_v31 }
 0x817   :  { %v2473_v23 = vmul.f32 %v4844_v46, %v3730_v39  ;;  %v2498_v27 = vadd.f32 %v2493_v38, %v2492_v57 }
 0x818   :  { %v2431_v4 = vmul.f32 %v2409_v63, %v2409_v63  ;;  %v2414_v29 = vadd.f32 %v2413_v54, %v2409_v63  ;;  %v2477_v35 = vadd.f32 %v2476_v6, %v2472_v13  ;;  %v2432_v12 = vmul.f32 %v2410_v11, %v2410_v11 }
 0x819   :  { %v2494_v19 = vmul.f32 %v2472_v13, %v2472_v13  ;;  %v2495_v43 = vmul.f32 %v2473_v23, %v2473_v23 }
 0x81a   :  { %v4854_v36 = vpop.f32.mrf.mxu2  ;;  %v2436_v1 = vadd.f32 %v2435_v42, %v2431_v4  ;;  %v2415_v45 = vadd.f32 %v2414_v29, %v2410_v11  ;;  %v2478_v24 = vadd.f32 %v2477_v35, %v2473_v23 }
 0x81b   :  { %v2411_v21 = vmul.f32 %v4854_v36, %v3735_v47  ;;  %v2474_v31 = vmul.f32 %v4854_v36, %v3740_v56  ;;  %v2499_v26 = vadd.f32 %v2498_v27, %v2494_v19 }
 0x81c   :  { %v2437_v22 = vadd.f32 %v2436_v1, %v2432_v12 }
 0x81d   :  { %v2433_v15 = vmul.f32 %v2411_v21, %v2411_v21  ;;  %v2479_v47 = vadd.f32 %v2478_v24, %v2474_v31  ;;  %v2416_v8 = vadd.f32 %v2415_v45, %v2411_v21  ;;  %v2496_v55 = vmul.f32 %v2474_v31, %v2474_v31 }
 0x81e   :  { %v2500_v17 = vadd.f32 %v2499_v26, %v2495_v43 }
 0x81f   :  { %v2438_v20 = vadd.f32 %v2437_v22, %v2433_v15 }
 0x820   :  { %v2501_v25 = vadd.f32 %v2500_v17, %v2496_v55 }
 0x821   :  { %v4860_v53 = vpop.f32.mrf.mxu3 }
 0x822   :  { %v2412_v39 = vmul.f32 %v4860_v53, %v3746_v59  ;;  %v2475_v37 = vmul.f32 %v4860_v53, %v3743_v58  ;;  %v2571_v58 = vld [vmem:[%s4910_s13] sm:$0xff] }
 0x823   :  { %v2583_v59 = vld [vmem:[%s4911_s14] sm:$0xff] }
 0x824   :  { %v2480_v40 = vadd.f32 %v2479_v47, %v2475_v37  ;;  %v2417_v9 = vadd.f32 %v2416_v8, %v2412_v39  ;;  %v2434_v34 = vmul.f32 %v2412_v39, %v2412_v39  ;;  %v2497_v44 = vmul.f32 %v2475_v37, %v2475_v37 }
 0x826   :  { %2481 = vadd.xlane.f32.xlu1 %v2480_v40  ;;  %2418 = vadd.xlane.f32.xlu2 %v2417_v9  ;;  %v2439_v56 = vadd.f32 %v2438_v20, %v2434_v34  ;;  %v2502_v61 = vadd.f32 %v2501_v25, %v2497_v44 }
 0x828   :  { %2440 = vadd.xlane.f32.xlu0 %v2439_v56 }
 0x82e   :  { %2503 = vadd.xlane.f32.xlu2 %v2502_v61 }
 0x83c   :  { %2574 = vperm.xlu0 %2930, %v2571_v58  }
 0x83f   :  { %2586 = vperm.xlu1 %2808, %v2583_v59  }
 0x899   :  { %v2482_v62 = vpop.xlane.xlu1 %2481  ;;  %v2419_v32 = vpop.xlane.xlu2 %2418 }
 0x89a   :  { %v2483_v60 = vrot.slane %v2482_v62, 4  ;;  %v2420_v48 = vrot.slane %v2419_v32, 4 }
 0x89b   :  { %v2441_v5 = vpop.xlane.xlu0 %2440 }
 0x89c   :  { %v2484_v30 = vadd.f32 %v2483_v60, %v2482_v62  ;;  %v2421_v3 = vadd.f32 %v2420_v48, %v2419_v32  ;;  %v2442_v18 = vrot.slane %v2441_v5, 4 }
 0x89e   :  { %v2485_v49 = vrot.slane %v2484_v30, 2  ;;  %v2422_v14 = vrot.slane %v2421_v3, 2  ;;  %v2443_v54 = vadd.f32 %v2442_v18, %v2441_v5 }
 0x8a0   :  { %v2444_v28 = vrot.slane %v2443_v54, 2  ;;  %v2423_v6 = vadd.f32 %v2422_v14, %v2421_v3  ;;  %v2486_v63 = vadd.f32 %v2485_v49, %v2484_v30  ;;  %v3215_v3 = vld [vmem:[%s4898_s1] ss:$2 sm:$0x3f] }
 0x8a1   :  { %v2504_v13 = vpop.xlane.xlu2 %2503 }
 0x8a2   :  { %v2505_v42 = vrot.slane %v2504_v13, 4  ;;  %v2424_v11 = vrot.slane %v2423_v6, 1  ;;  %v2445_v57 = vadd.f32 %v2444_v28, %v2443_v54  ;;  %v2487_v38 = vrot.slane %v2486_v63, 1  ;;  %v3216_v54 = vld [vmem:[%s4898_s1 + $0x1] ss:$2 sm:$0x3f] }
 0x8a3   :  { %s3308_s1 = smov [#allocation8]  }
 0x8a4   :  { %v2506_v4 = vadd.f32 %v2505_v42, %v2504_v13  ;;  %v2425_v29 = vadd.f32 %v2424_v11, %v2423_v6  ;;  %v2446_v35 = vrot.slane %v2445_v57, 1  ;;  %v2488_v12 = vadd.f32 %v2487_v38, %v2486_v63  ;;  %s2624_s26 = sshll.u32 %s3308_s1, 4  ;;  %s2625_s26 = int_to_ptr.vmem [resolvable:$true] %s2624_s26 }
 0x8a6   :  { %v2507_v23 = vrot.slane %v2506_v4, 2  ;;  %2686 = vpush %v2425_v29  ;;  %v2447_v1 = vadd.f32 %v2446_v35, %v2445_v57 }
 0x8a8   :  { %v2508_v21 = vadd.f32 %v2507_v23, %v2506_v4  ;;  %2688 = vpush %v2447_v1 }
 0x8a9   :  { %2690 = vpush %v2488_v12 }
 0x8aa   :  { %v2509_v27 = vrot.slane %v2508_v21, 1 }
 0x8ac   :  { %v2510_v19 = vadd.f32 %v2509_v27, %v2508_v21 }
 0x8ae   :  { %2692 = vpush %v2510_v19 }
 0x8d7   :  { %s2687_s13 = spop %2686 }
 0x8d8   :  { %v2427_v45 = vstv %s2687_s13 }
 0x8d9   :  { %v2428_v24 = vmul.f32 %v2427_v45, %v3766_v7  ;;  %s2689_s14 = spop %2688 }
 0x8da   :  { %v2449_v31 = vstv %s2689_s14  ;;  %s2691_s16 = spop %2690 }
 0x8db   :  { %v2451_v15 = vmul.f32 %v2428_v24, %v2428_v24  ;;  %v2450_v22 = vmul.f32 %v2449_v31, %v3766_v7  ;;  %v2490_v26 = vstv %s2691_s16 }
 0x8dc   :  { %v2491_v39 = vmul.f32 %v2490_v26, %v3766_v7 }
 0x8dd   :  { %v2452_v43 = vsub.f32 %v2450_v22, %v2451_v15 }
 0x8de   :  { %v2514_v40 = vmul.f32 %v2491_v39, %v2491_v39 }
 0x8df   :  { %v2453_v37 = vmax.f32 %v2452_v43, 0.0  ;;  %s2693_s17 = spop %2692 }
 0x8e0   :  { %v2512_v47 = vstv %s2693_s17 }
 0x8e1   :  { %v2454_v8 = vadd.f32 1e-05, %v2453_v37  ;;  %v2513_v9 = vmul.f32 %v2512_v47, %v3766_v7  ;;  %v2575_v47 = vpop.permute.xlu0 %2574 }
 0x8e3   :  { %3203 = vrsqrt.f32 %v2454_v8  ;;  %v2515_v34 = vsub.f32 %v2513_v9, %v2514_v40  ;;  %vm2461_vm1 = vweird.f32 %v2454_v8 }
 0x8e5   :  { %v2516_v20 = vmax.f32 %v2515_v34, 0.0  ;;  %v2587_v34 = vpop.permute.xlu1 %2586 }
 0x8e7   :  { %v2517_v55 = vadd.f32 1e-05, %v2516_v20 }
 0x8e9   :  { %v3204_v56 = vpop.eup %3203  ;;  %3205 = vrsqrt.f32 %v2517_v55  ;;  %vm2524_vm4 = vweird.f32 %v2517_v55 }
 0x8ea   :  { %v2456_v17 = vmul.f32 %v3204_v56, %v2454_v8  ;;  %vm2462_vm0 = vweird.f32 %v3204_v56 }
 0x8eb   :  { %vm2463_vm2 = vmor %vm2461_vm1, %vm2462_vm0 }
 0x8ec   :  { %v2457_v44 = vmul.f32 %v3204_v56, %v2456_v17 }
 0x8ee   :  { %v2458_v25 = vmul.f32 0.5, %v2457_v44 }
 0x8ef   :  { %v3206_v61 = vpop.eup %3205 }
 0x8f0   :  { %v2459_v58 = vsub.f32 1.5, %v2458_v25  ;;  %v2519_v59 = vmul.f32 %v3206_v61, %v2517_v55  ;;  %vm2525_vm3 = vweird.f32 %v3206_v61 }
 0x8f1   :  { %vm2526_vm5 = vmor %vm2524_vm4, %vm2525_vm3 }
 0x8f2   :  { %v2460_v62 = vmul.f32 %v3204_v56, %v2459_v58  ;;  %v2520_v32 = vmul.f32 %v3206_v61, %v2519_v59  ;;  %v2601_v58 = vld [vmem:[#allocation6] sm:$0xff]  ;;  %v2602_v59 = vld [vmem:[#allocation6 + $0x8] sm:$0xff] }
 0x8f4   :  { %v2464_v60 = vsel %vm2463_vm2, %v3204_v56, %v2460_v62  ;;  %v2521_v48 = vmul.f32 0.5, %v2520_v32 }
 0x8f5   :  { %v2467_v7 = vmul.f32 %v2464_v60, %v2428_v24  ;;  %v2465_v14 = vmul.f32 %v3215_v3, %v2464_v60  ;;  %v2603_v60 = vld [vmem:[#allocation6 + $0x10] sm:$0xff] }
 0x8f6   :  { %v2522_v5 = vsub.f32 1.5, %v2521_v48  ;;  %v2604_v48 = vld [vmem:[#allocation6 + $0x18] sm:$0xff] }
 0x8f7   :  { %v2468_v18 = vmul.f32 %v3215_v3, %v2467_v7 }
 0x8f8   :  { %v2523_v30 = vmul.f32 %v3206_v61, %v2522_v5 }
 0x8f9   :  { %v2469_v63 = vsub.f32 0.0, %v2468_v18  ;;  %v2605_v18 = vld [vmem:[#allocation6 + $0x20] sm:$0xff] }
 0x8fa   :  { %v2527_v49 = vsel %vm2526_vm5, %v3206_v61, %v2523_v30 }
 0x8fb   :  { %v2528_v28 = vmul.f32 %v3216_v54, %v2527_v49  ;;  %v2530_v6 = vmul.f32 %v2527_v49, %v2491_v39  ;;  %v2606_v49 = vld [vmem:[#allocation6 + $0x28] sm:$0xff] }
 0x8fd   :  { %v2529_v13 = vadd.f32 %v2528_v28, %v2465_v14  ;;  %v2531_v42 = vmul.f32 %v3216_v54, %v2530_v6 }
 0x8ff   :  { %v2532_v11 = vsub.f32 %v2469_v63, %v2531_v42  ;;  %v2534_v57 = vperm.slane %v2529_v13, 0  ;;  %v2535_v38 = vperm.slane %v2529_v13, 1  ;;  %v2536_v4 = vperm.slane %v2529_v13, 2 }
 0x900   :  { %v2537_v29 = vperm.slane %v2529_v13, 3  ;;  %v2538_v35 = vperm.slane %v2529_v13, 4  ;;  %v2539_v23 = vperm.slane %v2529_v13, 5 }
 0x901   :  { %v2546_v1 = vmul.f32 %v2534_v57, %v4830_v41  ;;  %v2547_v12 = vmul.f32 %v2535_v38, %v4836_v33  ;;  %v2548_v21 = vmul.f32 %v2536_v4, %v4842_v51  ;;  %v2553_v27 = vperm.slane %v2532_v11, 0 }
 0x902   :  { %v2549_v19 = vmul.f32 %v2537_v29, %v4844_v46  ;;  %v2550_v45 = vmul.f32 %v2538_v35, %v4854_v36  ;;  %v2551_v24 = vmul.f32 %v2539_v23, %v4860_v53  ;;  %v2554_v31 = vperm.slane %v2532_v11, 1 }
 0x903   :  { %v2555_v15 = vperm.slane %v2532_v11, 2  ;;  %v2556_v22 = vperm.slane %v2532_v11, 3  ;;  %v2557_v26 = vperm.slane %v2532_v11, 4  ;;  %v2558_v43 = vperm.slane %v2532_v11, 5 }
 0x904   :  { %v2565_v39 = vadd.f32 %v2553_v27, %v2546_v1  ;;  %v2566_v37 = vadd.f32 %v2554_v31, %v2547_v12 }
 0x905   :  { %v2567_v41 = vadd.f32 %v2555_v15, %v2548_v21  ;;  %v2568_v8 = vadd.f32 %v2556_v22, %v2549_v19  ;;  %v2569_v33 = vadd.f32 %v2557_v26, %v2550_v45  ;;  %v2570_v40 = vadd.f32 %v2558_v43, %v2551_v24 }
 0x906   :  { %v2577_v51 = vmul.f32 %v2575_v47, %v2565_v39  ;;  %v2578_v9 = vmul.f32 %v2575_v47, %v2566_v37 }
 0x907   :  { %v2579_v46 = vmul.f32 %v2575_v47, %v2567_v41  ;;  %v2580_v20 = vmul.f32 %v2575_v47, %v2568_v8  ;;  %v2581_v36 = vmul.f32 %v2575_v47, %v2569_v33  ;;  %v2582_v55 = vmul.f32 %v2575_v47, %v2570_v40 }
 0x908   :  { %v2589_v53 = vadd.f32 %v2587_v34, %v2577_v51  ;;  %v2590_v56 = vadd.f32 %v2587_v34, %v2578_v9 }
 0x909   :  { %v2591_v17 = vadd.f32 %v2587_v34, %v2579_v46  ;;  %v2592_v44 = vadd.f32 %v2587_v34, %v2580_v20  ;;  %v2593_v25 = vadd.f32 %v2587_v34, %v2581_v36  ;;  %v2594_v61 = vadd.f32 %v2587_v34, %v2582_v55 }
 0x90a   :  { %v2595_v62 = vmul.f32 %v2589_v53, %v3784_v2  ;;  %v2596_v32 = vmul.f32 %v2590_v56, %v3786_v16 }
 0x90b   :  { %v2597_v7 = vmul.f32 %v2591_v17, %v3788_v10  ;;  %v2598_v5 = vmul.f32 %v2592_v44, %v3801_v52  ;;  %v2599_v30 = vmul.f32 %v2593_v25, %v3790_v50  ;;  %v2600_v3 = vmul.f32 %v2594_v61, %v3792_v0 }
 0x90c   :  { %v2607_v14 = vadd.f32 %v2601_v58, %v2595_v62  ;;  %v2608_v54 = vadd.f32 %v2602_v59, %v2596_v32 }
 0x90d   :  { %v2609_v28 = vadd.f32 %v2603_v60, %v2597_v7  ;;  %v2610_v6 = vadd.f32 %v2604_v48, %v2598_v5  ;;  %v2611_v63 = vadd.f32 %v2605_v18, %v2599_v30  ;;  %v2612_v2 = vadd.f32 %v2606_v49, %v2600_v3 }
 0x90e   :  { %2613 = vst [vmem:[#allocation8] sm:$0xff] %v2607_v14 }
 0x90f   :  { %2614 = vst [vmem:[#allocation8 + $0x8] sm:$0xff] %v2608_v54 }
 0x910   :  { %2615 = vst [vmem:[#allocation8 + $0x10] sm:$0xff] %v2609_v28 }
 0x911   :  { %2616 = vst [vmem:[#allocation8 + $0x18] sm:$0xff] %v2610_v6 }
 0x912   :  { %2617 = vst [vmem:[#allocation8 + $0x20] sm:$0xff] %v2611_v63 }
 0x913   :  { %2618 = vst [vmem:[#allocation8 + $0x28] sm:$0xff] %v2612_v2 }
 0x914   :  { %2629 = dma.vmem_to_hbm [thread:$0]  %s2625_s26, 768, %s2627_s5, [#allocation5]  }
 0x915   :  { %3293 = dma.done.wait [#allocation5], 768  }
 0x916   :  { %3294 = vsyncadd [#allocation5], 4294966528 }
 0x917   :  { %2634 = vsyncpa [#allocation4], 1 }
 0x918   :  { %2635 = vsyncpa [#allocation7], 1 }
 0x919   :  { %2636 = vsyncpa [#allocation5], 1 }

</bundles_post_ra>
